<compile_context>
chip_gen: v7x
topology: tpu7x:2x2x1
jax: 0.10.0
libtpu: 0.0.40
codegen_flags: <defaults>
</compile_context>

<pallas_src>
import functools

import jax
import jax.numpy as jnp
from jax.experimental import pallas as pl
from jax.experimental.pallas import tpu as pltpu

LRELU_SLOPE = 0.2
IN_EPS = 1e-5        # PyTorch InstanceNorm2d default
MXU_DTYPE = jnp.float32


# ------------------------------ fused kernel --------------------------------

def _critic_fused_kernel(
    x_ref,                                            # (1, H0, C0*W0)
    r0_ref, m0_ref, b0_ref,                           # layer 0 (conv + bias)
    r1_ref, m1_ref, g1_ref, gt1_ref, ga1_ref, be1_ref,  # block 1
    r2_ref, m2_ref, g2_ref, gt2_ref, ga2_ref, be2_ref,  # block 2
    r3_ref, m3_ref, g3_ref, gt3_ref, ga3_ref, be3_ref,  # block 3
    w4_ref, b4_ref,                                   # head conv
    o_ref,                                            # (1, 1, 1)
):
    def conv(x, r_ref, m_ref):
        # x: (H, Cin*W)   r_ref: (4, Hn, H)   m_ref: (4, Cin*W, Cout*Wn)
        # Y[hn, co*Wn+wn] = sum_ki (R_ki @ X) @ M_ki  == stride-2 pad-1 4x4 conv.
        y = None
        for ki in range(4):
            a = jnp.dot(r_ref[ki], x, preferred_element_type=jnp.float32)
            t = jnp.dot(a, m_ref[ki], preferred_element_type=jnp.float32)
            y = t if y is None else y + t
        return y                                      # (Hn, Cout*Wn)

    def inorm_lrelu(y, gsum_ref, gbc_ref, gamma_ref, beta_ref):
        # y: (Hn, Cout*Wn), cols are (co, wn) co-major.
        cout, cwn = gbc_ref.shape
        inv_n = 1.0 / float(y.shape[0] * (cwn // cout))
        s1 = jnp.sum(y, axis=0, keepdims=True)            # (1, Cout*Wn)
        s2 = jnp.sum(y * y, axis=0, keepdims=True)
        mean = jnp.dot(s1, gsum_ref[...], preferred_element_type=jnp.float32) * inv_n
        ex2 = jnp.dot(s2, gsum_ref[...], preferred_element_type=jnp.float32) * inv_n
        var = ex2 - mean * mean                            # biased (PyTorch IN)
        scale = gamma_ref[...] * jax.lax.rsqrt(var + IN_EPS)   # (1, Cout)
        shift = beta_ref[...] - mean * scale
        scale_row = jnp.dot(scale, gbc_ref[...], preferred_element_type=jnp.float32)
        shift_row = jnp.dot(shift, gbc_ref[...], preferred_element_type=jnp.float32)
        y = y * scale_row + shift_row
        return jnp.maximum(y, LRELU_SLOPE * y)

    x0 = x_ref[0]                                          # (64, 192)

    # L0: Conv(img_ch -> f) + bias + LeakyReLU
    y = conv(x0, r0_ref, m0_ref) + b0_ref[...]
    y = jnp.maximum(y, LRELU_SLOPE * y)

    # Blocks 1..3: Conv(no bias) + InstanceNorm(affine) + LeakyReLU
    y = conv(y, r1_ref, m1_ref)
    y = inorm_lrelu(y, g1_ref, gt1_ref, ga1_ref, be1_ref)
    y = conv(y, r2_ref, m2_ref)
    y = inorm_lrelu(y, g2_ref, gt2_ref, ga2_ref, be2_ref)
    y = conv(y, r3_ref, m3_ref)
    y = inorm_lrelu(y, g3_ref, gt3_ref, ga3_ref, be3_ref)   # (4, 64*4)

    # Head: Conv2d(f*8 -> 1, 4, 2, 0) over the full 4x4 map == one reduce.
    s = jnp.sum(y * w4_ref[...], axis=1, keepdims=True)     # (4, 1)
    s = jnp.sum(s, axis=0, keepdims=True)                   # (1, 1)
    o_ref[0] = s + b4_ref[...]


# ----------------------- host-side constant builders ------------------------

def _row_select(h_in, h_out, k=4, stride=2, pad=1):
    """(k, h_out, h_in) 0/1 matrices: R[ki,hn,h] = (h == stride*hn + ki - pad)."""
    ki = jnp.arange(k)[:, None, None]
    ho = jnp.arange(h_out)[None, :, None]
    h = jnp.arange(h_in)[None, None, :]
    return (h == stride * ho + ki - pad).astype(jnp.float32)


def _col_folded_weight(w_hwio, w_in, w_out, stride=2, pad=1):
    """M[ki, ci*W+w, co*Wn+wn] = sum_kj w[ki,kj,ci,co] * (w == stride*wn+kj-pad)."""
    kh, kw, cin, cout = w_hwio.shape
    kj = jnp.arange(kw)[:, None, None]
    wi = jnp.arange(w_in)[None, :, None]
    wo = jnp.arange(w_out)[None, None, :]
    cs = (wi == stride * wo + kj - pad).astype(jnp.float32)      # (kw, W, Wn)
    m = jnp.einsum("kjio,jwn->kiwon", w_hwio.astype(jnp.float32), cs)
    return m.reshape(kh, cin * w_in, cout * w_out)


def _group_mats(cout, w_out):
    """Group-sum (Cout*Wn, Cout) and broadcast-back (Cout, Cout*Wn) matrices."""
    co = jnp.arange(cout)[:, None]
    j = jnp.arange(cout * w_out)[None, :]
    gbc = (j // w_out == co).astype(jnp.float32)                 # (Cout, Cout*Wn)
    return jnp.transpose(gbc), gbc


# ------------------------------ forward pass ---------------------------------

def critic_forward(params, x_nchw):
    """Forward pass. Input NCHW (N, C, 64, 64), output (N, 1, 1, 1)."""
    n, c, h, w = x_nchw.shape
    f = params["w0"].shape[-1]
    chans = [c, f, 2 * f, 4 * f, 8 * f]
    hs = [h // (2 ** i) for i in range(5)]          # 64, 32, 16, 8, 4
    ws = [w // (2 ** i) for i in range(5)]
    assert hs[4] == 4 and ws[4] == 4, "architecture expects 64x64 inputs"

    # Lane-dense (H, C*W) activation layout for the whole network.
    x_t = jnp.transpose(x_nchw, (0, 2, 1, 3)).reshape(n, h, c * w).astype(MXU_DTYPE)

    inputs = [x_t]
    in_specs = [pl.BlockSpec((1, h, c * w), lambda i: (i, 0, 0))]

    def add_const(arr, dtype=jnp.float32):
        arr = arr.astype(dtype)
        nd = arr.ndim
        inputs.append(arr)
        in_specs.append(pl.BlockSpec(arr.shape, lambda i, _nd=nd: (0,) * _nd))

    # Layer 0 constants.
    add_const(_row_select(hs[0], hs[1]), MXU_DTYPE)
    add_const(_col_folded_weight(params["w0"], ws[0], ws[1]), MXU_DTYPE)
    add_const(jnp.repeat(params["b0"].astype(jnp.float32), ws[1])[None, :])

    # Blocks 1..3 constants.
    for l in range(1, 4):
        cout = chans[l + 1]
        add_const(_row_select(hs[l], hs[l + 1]), MXU_DTYPE)
        add_const(_col_folded_weight(params[f"w{l}"], ws[l], ws[l + 1]), MXU_DTYPE)
        gsum, gbc = _group_mats(cout, ws[l + 1])
        add_const(gsum)
        add_const(gbc)
        add_const(params[f"g{l}"].astype(jnp.float32)[None, :])
        add_const(params[f"beta{l}"].astype(jnp.float32)[None, :])

    # Head constants: w4t[h, ci*4 + w] = w4[h, w, ci, 0].
    w4 = params["w4"].astype(jnp.float32)
    w4t = jnp.transpose(w4[:, :, :, 0], (0, 2, 1)).reshape(hs[4], chans[4] * ws[4])
    add_const(w4t)
    add_const(params["b4"].astype(jnp.float32).reshape(1, 1))

    out = pl.pallas_call(
        _critic_fused_kernel,
        out_shape=jax.ShapeDtypeStruct((n, 1, 1), jnp.float32),
        grid=(n,),
        in_specs=in_specs,
        out_specs=pl.BlockSpec((1, 1, 1), lambda i: (i, 0, 0)),
        compiler_params=pltpu.CompilerParams(
            dimension_semantics=("parallel",),
            vmem_limit_bytes=32 * 1024 * 1024),
    )(*inputs)
    return out.reshape(n, 1, 1, 1)


# ------------------------------ Critic params --------------------------------

def init_params(key, img_channels, features):
    """Deterministic synthetic weights, HWIO layout for convs."""
    ks = jax.random.split(key, 16)
    p = {}

    def conv_w(k, kh, kw, cin, cout):
        return (0.05 * jax.random.normal(k, (kh, kw, cin, cout))).astype(jnp.float32)

    p["w0"] = conv_w(ks[0], 4, 4, img_channels, features)
    p["b0"] = (0.05 * jax.random.normal(ks[1], (features,))).astype(jnp.float32)
    chans = [features, features * 2, features * 4, features * 8]
    for i in range(1, 4):
        cin, cout = chans[i - 1], chans[i]
        p[f"w{i}"] = conv_w(ks[2 * i], 4, 4, cin, cout)
        p[f"g{i}"] = (1.0 + 0.1 * jax.random.normal(ks[2 * i + 1], (cout,))).astype(jnp.float32)
        p[f"beta{i}"] = (0.05 * jax.random.normal(ks[8 + i], (cout,))).astype(jnp.float32)
    p["w4"] = conv_w(ks[12], 4, 4, features * 8, 1)
    p["b4"] = (0.05 * jax.random.normal(ks[13], (1,))).astype(jnp.float32)
    return p


# ------------------------------ Pure-JAX ref ---------------------------------

def _conv_ref(x, w, b, stride, pad):
    out = jax.lax.conv_general_dilated(
        x, w, window_strides=(stride, stride),
        padding=[(pad, pad), (pad, pad)],
        dimension_numbers=("NCHW", "HWIO", "NCHW"))
    if b is not None:
        out = out + b.reshape(1, -1, 1, 1)
    return out


def critic_ref(params, x_nchw):
    y = _conv_ref(x_nchw, params["w0"], params["b0"], 2, 1)
    y = jnp.where(y > 0, y, LRELU_SLOPE * y)
    for i in range(1, 4):
        y = _conv_ref(y, params[f"w{i}"], None, 2, 1)
        mean = jnp.mean(y, axis=(2, 3), keepdims=True)
        var = jnp.mean((y - mean) ** 2, axis=(2, 3), keepdims=True)
        y = (y - mean) * jax.lax.rsqrt(var + IN_EPS)
        y = (y * params[f"g{i}"].reshape(1, -1, 1, 1)
             + params[f"beta{i}"].reshape(1, -1, 1, 1))
        y = jnp.where(y > 0, y, LRELU_SLOPE * y)
    return _conv_ref(y, params["w4"], params["b4"], 2, 0)


# ---------------------------------- main -------------------------------------

if __name__ == "__main__":
    key = jax.random.PRNGKey(0)
    kx, kp = jax.random.split(key)

    batch, img_channels, features, spatial = 2, 3, 8, 64  # 64x64 required by arch
    x = jax.random.normal(kx, (batch, img_channels, spatial, spatial),
                          dtype=jnp.float32)
    params = init_params(kp, img_channels, features)

    fwd = jax.jit(functools.partial(critic_forward, params))
    out = jax.block_until_ready(fwd(x))
    assert out.shape == (batch, 1, 1, 1), out.shape

    ref = jax.block_until_ready(critic_ref(params, x))
    assert jnp.allclose(out, ref, atol=1e-3, rtol=1e-3), (out, ref)

    print("KERNEL_OK")
</pallas_src>

<mosaic_0001>
module attributes {stable_mosaic.version = 11 : i64} {
  func.func @_critic_fused_kernel(%arg0: i32, %arg1: memref<1x64x192xf32, #tpu.memory_space<vmem>>, %arg2: memref<4x32x64xf32, #tpu.memory_space<vmem>>, %arg3: memref<4x192x256xf32, #tpu.memory_space<vmem>>, %arg4: memref<1x256xf32, #tpu.memory_space<vmem>>, %arg5: memref<4x16x32xf32, #tpu.memory_space<vmem>>, %arg6: memref<4x256x256xf32, #tpu.memory_space<vmem>>, %arg7: memref<256x16xf32, #tpu.memory_space<vmem>>, %arg8: memref<16x256xf32, #tpu.memory_space<vmem>>, %arg9: memref<1x16xf32, #tpu.memory_space<vmem>>, %arg10: memref<1x16xf32, #tpu.memory_space<vmem>>, %arg11: memref<4x8x16xf32, #tpu.memory_space<vmem>>, %arg12: memref<4x256x256xf32, #tpu.memory_space<vmem>>, %arg13: memref<256x32xf32, #tpu.memory_space<vmem>>, %arg14: memref<32x256xf32, #tpu.memory_space<vmem>>, %arg15: memref<1x32xf32, #tpu.memory_space<vmem>>, %arg16: memref<1x32xf32, #tpu.memory_space<vmem>>, %arg17: memref<4x4x8xf32, #tpu.memory_space<vmem>>, %arg18: memref<4x256x256xf32, #tpu.memory_space<vmem>>, %arg19: memref<256x64xf32, #tpu.memory_space<vmem>>, %arg20: memref<64x256xf32, #tpu.memory_space<vmem>>, %arg21: memref<1x64xf32, #tpu.memory_space<vmem>>, %arg22: memref<1x64xf32, #tpu.memory_space<vmem>>, %arg23: memref<4x256xf32, #tpu.memory_space<vmem>>, %arg24: memref<1x1xf32, #tpu.memory_space<vmem>>, %arg25: memref<1x1x1xf32, #tpu.memory_space<vmem>>) attributes {dimension_semantics = [#tpu.dimension_semantics<parallel>], iteration_bounds = array<i64: 2>, scalar_prefetch = 0 : i64, scratch_operands = 0 : i64, tpu.core_type = #tpu.core_type<tc>, window_params = [{transform_indices = @transform_0, window_bounds = array<i64: 1, 64, 192>}, {pipeline_mode = #tpu.pipeline_mode<synchronous>, transform_indices = @transform_1, window_bounds = array<i64: 4, 32, 64>}, {pipeline_mode = #tpu.pipeline_mode<synchronous>, transform_indices = @transform_2, window_bounds = array<i64: 4, 192, 256>}, {pipeline_mode = #tpu.pipeline_mode<synchronous>, transform_indices = @transform_3, window_bounds = array<i64: 1, 256>}, {pipeline_mode = #tpu.pipeline_mode<synchronous>, transform_indices = @transform_4, window_bounds = array<i64: 4, 16, 32>}, {pipeline_mode = #tpu.pipeline_mode<synchronous>, transform_indices = @transform_5, window_bounds = array<i64: 4, 256, 256>}, {pipeline_mode = #tpu.pipeline_mode<synchronous>, transform_indices = @transform_6, window_bounds = array<i64: 256, 16>}, {pipeline_mode = #tpu.pipeline_mode<synchronous>, transform_indices = @transform_7, window_bounds = array<i64: 16, 256>}, {pipeline_mode = #tpu.pipeline_mode<synchronous>, transform_indices = @transform_8, window_bounds = array<i64: 1, 16>}, {pipeline_mode = #tpu.pipeline_mode<synchronous>, transform_indices = @transform_9, window_bounds = array<i64: 1, 16>}, {pipeline_mode = #tpu.pipeline_mode<synchronous>, transform_indices = @transform_10, window_bounds = array<i64: 4, 8, 16>}, {pipeline_mode = #tpu.pipeline_mode<synchronous>, transform_indices = @transform_11, window_bounds = array<i64: 4, 256, 256>}, {pipeline_mode = #tpu.pipeline_mode<synchronous>, transform_indices = @transform_12, window_bounds = array<i64: 256, 32>}, {pipeline_mode = #tpu.pipeline_mode<synchronous>, transform_indices = @transform_13, window_bounds = array<i64: 32, 256>}, {pipeline_mode = #tpu.pipeline_mode<synchronous>, transform_indices = @transform_14, window_bounds = array<i64: 1, 32>}, {pipeline_mode = #tpu.pipeline_mode<synchronous>, transform_indices = @transform_15, window_bounds = array<i64: 1, 32>}, {pipeline_mode = #tpu.pipeline_mode<synchronous>, transform_indices = @transform_16, window_bounds = array<i64: 4, 4, 8>}, {pipeline_mode = #tpu.pipeline_mode<synchronous>, transform_indices = @transform_17, window_bounds = array<i64: 4, 256, 256>}, {pipeline_mode = #tpu.pipeline_mode<synchronous>, transform_indices = @transform_18, window_bounds = array<i64: 256, 64>}, {pipeline_mode = #tpu.pipeline_mode<synchronous>, transform_indices = @transform_19, window_bounds = array<i64: 64, 256>}, {pipeline_mode = #tpu.pipeline_mode<synchronous>, transform_indices = @transform_20, window_bounds = array<i64: 1, 64>}, {pipeline_mode = #tpu.pipeline_mode<synchronous>, transform_indices = @transform_21, window_bounds = array<i64: 1, 64>}, {pipeline_mode = #tpu.pipeline_mode<synchronous>, transform_indices = @transform_22, window_bounds = array<i64: 4, 256>}, {pipeline_mode = #tpu.pipeline_mode<synchronous>, transform_indices = @transform_23, window_bounds = array<i64: 1, 1>}, {transform_indices = @transform_24, window_bounds = array<i64: 1, 1, 1>}]} {
    %c0 = arith.constant 0 : index
    %c0_0 = arith.constant 0 : index
    %c0_1 = arith.constant 0 : index
    %0 = vector.load %arg1[%c0, %c0_0, %c0_1] : memref<1x64x192xf32, #tpu.memory_space<vmem>>, vector<1x64x192xf32>
    %1 = vector.shape_cast %0 : vector<1x64x192xf32> to vector<64x192xf32>
    %c0_2 = arith.constant 0 : index
    %c0_3 = arith.constant 0 : index
    %c0_4 = arith.constant 0 : index
    %2 = vector.load %arg2[%c0_2, %c0_3, %c0_4] : memref<4x32x64xf32, #tpu.memory_space<vmem>>, vector<1x32x64xf32>
    %3 = vector.shape_cast %2 : vector<1x32x64xf32> to vector<32x64xf32>
    %cst = arith.constant dense<0.000000e+00> : vector<32x192xf32>
    %4 = tpu.matmul %3, %1, %cst {dimension_numbers = #tpu.dot_dimension_numbers<[1], [0], [0], [1], [0, 0, 1, 1], [], []>} : vector<32x64xf32>, vector<64x192xf32>, vector<32x192xf32> -> vector<32x192xf32>
    %c0_5 = arith.constant 0 : index
    %c0_6 = arith.constant 0 : index
    %c0_7 = arith.constant 0 : index
    %5 = vector.load %arg3[%c0_5, %c0_6, %c0_7] : memref<4x192x256xf32, #tpu.memory_space<vmem>>, vector<1x192x256xf32>
    %6 = vector.shape_cast %5 : vector<1x192x256xf32> to vector<192x256xf32>
    %cst_8 = arith.constant dense<0.000000e+00> : vector<32x256xf32>
    %7 = tpu.matmul %4, %6, %cst_8 {dimension_numbers = #tpu.dot_dimension_numbers<[1], [0], [0], [1], [0, 0, 1, 1], [], []>} : vector<32x192xf32>, vector<192x256xf32>, vector<32x256xf32> -> vector<32x256xf32>
    %c1 = arith.constant 1 : index
    %c0_9 = arith.constant 0 : index
    %c0_10 = arith.constant 0 : index
    %8 = vector.load %arg2[%c1, %c0_9, %c0_10] : memref<4x32x64xf32, #tpu.memory_space<vmem>>, vector<1x32x64xf32>
    %9 = vector.shape_cast %8 : vector<1x32x64xf32> to vector<32x64xf32>
    %cst_11 = arith.constant dense<0.000000e+00> : vector<32x192xf32>
    %10 = tpu.matmul %9, %1, %cst_11 {dimension_numbers = #tpu.dot_dimension_numbers<[1], [0], [0], [1], [0, 0, 1, 1], [], []>} : vector<32x64xf32>, vector<64x192xf32>, vector<32x192xf32> -> vector<32x192xf32>
    %c1_12 = arith.constant 1 : index
    %c0_13 = arith.constant 0 : index
    %c0_14 = arith.constant 0 : index
    %11 = vector.load %arg3[%c1_12, %c0_13, %c0_14] : memref<4x192x256xf32, #tpu.memory_space<vmem>>, vector<1x192x256xf32>
    %12 = vector.shape_cast %11 : vector<1x192x256xf32> to vector<192x256xf32>
    %cst_15 = arith.constant dense<0.000000e+00> : vector<32x256xf32>
    %13 = tpu.matmul %10, %12, %cst_15 {dimension_numbers = #tpu.dot_dimension_numbers<[1], [0], [0], [1], [0, 0, 1, 1], [], []>} : vector<32x192xf32>, vector<192x256xf32>, vector<32x256xf32> -> vector<32x256xf32>
    %14 = arith.addf %7, %13 : vector<32x256xf32>
    %c2 = arith.constant 2 : index
    %c0_16 = arith.constant 0 : index
    %c0_17 = arith.constant 0 : index
    %15 = vector.load %arg2[%c2, %c0_16, %c0_17] : memref<4x32x64xf32, #tpu.memory_space<vmem>>, vector<1x32x64xf32>
    %16 = vector.shape_cast %15 : vector<1x32x64xf32> to vector<32x64xf32>
    %cst_18 = arith.constant dense<0.000000e+00> : vector<32x192xf32>
    %17 = tpu.matmul %16, %1, %cst_18 {dimension_numbers = #tpu.dot_dimension_numbers<[1], [0], [0], [1], [0, 0, 1, 1], [], []>} : vector<32x64xf32>, vector<64x192xf32>, vector<32x192xf32> -> vector<32x192xf32>
    %c2_19 = arith.constant 2 : index
    %c0_20 = arith.constant 0 : index
    %c0_21 = arith.constant 0 : index
    %18 = vector.load %arg3[%c2_19, %c0_20, %c0_21] : memref<4x192x256xf32, #tpu.memory_space<vmem>>, vector<1x192x256xf32>
    %19 = vector.shape_cast %18 : vector<1x192x256xf32> to vector<192x256xf32>
    %cst_22 = arith.constant dense<0.000000e+00> : vector<32x256xf32>
    %20 = tpu.matmul %17, %19, %cst_22 {dimension_numbers = #tpu.dot_dimension_numbers<[1], [0], [0], [1], [0, 0, 1, 1], [], []>} : vector<32x192xf32>, vector<192x256xf32>, vector<32x256xf32> -> vector<32x256xf32>
    %21 = arith.addf %14, %20 : vector<32x256xf32>
    %c3 = arith.constant 3 : index
    %c0_23 = arith.constant 0 : index
    %c0_24 = arith.constant 0 : index
    %22 = vector.load %arg2[%c3, %c0_23, %c0_24] : memref<4x32x64xf32, #tpu.memory_space<vmem>>, vector<1x32x64xf32>
    %23 = vector.shape_cast %22 : vector<1x32x64xf32> to vector<32x64xf32>
    %cst_25 = arith.constant dense<0.000000e+00> : vector<32x192xf32>
    %24 = tpu.matmul %23, %1, %cst_25 {dimension_numbers = #tpu.dot_dimension_numbers<[1], [0], [0], [1], [0, 0, 1, 1], [], []>} : vector<32x64xf32>, vector<64x192xf32>, vector<32x192xf32> -> vector<32x192xf32>
    %c3_26 = arith.constant 3 : index
    %c0_27 = arith.constant 0 : index
    %c0_28 = arith.constant 0 : index
    %25 = vector.load %arg3[%c3_26, %c0_27, %c0_28] : memref<4x192x256xf32, #tpu.memory_space<vmem>>, vector<1x192x256xf32>
    %26 = vector.shape_cast %25 : vector<1x192x256xf32> to vector<192x256xf32>
    %cst_29 = arith.constant dense<0.000000e+00> : vector<32x256xf32>
    %27 = tpu.matmul %24, %26, %cst_29 {dimension_numbers = #tpu.dot_dimension_numbers<[1], [0], [0], [1], [0, 0, 1, 1], [], []>} : vector<32x192xf32>, vector<192x256xf32>, vector<32x256xf32> -> vector<32x256xf32>
    %28 = arith.addf %21, %27 : vector<32x256xf32>
    %c0_30 = arith.constant 0 : index
    %c0_31 = arith.constant 0 : index
    %29 = vector.load %arg4[%c0_30, %c0_31] : memref<1x256xf32, #tpu.memory_space<vmem>>, vector<1x256xf32>
    %30 = vector.broadcast %29 : vector<1x256xf32> to vector<32x256xf32>
    %31 = arith.addf %28, %30 : vector<32x256xf32>
    %cst_32 = arith.constant 2.000000e-01 : f32
    %32 = vector.broadcast %cst_32 : f32 to vector<32x256xf32>
    %33 = arith.mulf %32, %31 : vector<32x256xf32>
    %34 = arith.maximumf %31, %33 : vector<32x256xf32>
    %c0_33 = arith.constant 0 : index
    %c0_34 = arith.constant 0 : index
    %c0_35 = arith.constant 0 : index
    %35 = vector.load %arg5[%c0_33, %c0_34, %c0_35] : memref<4x16x32xf32, #tpu.memory_space<vmem>>, vector<1x16x32xf32>
    %36 = vector.shape_cast %35 : vector<1x16x32xf32> to vector<16x32xf32>
    %cst_36 = arith.constant dense<0.000000e+00> : vector<16x256xf32>
    %37 = tpu.matmul %36, %34, %cst_36 {dimension_numbers = #tpu.dot_dimension_numbers<[1], [0], [0], [1], [0, 0, 1, 1], [], []>} : vector<16x32xf32>, vector<32x256xf32>, vector<16x256xf32> -> vector<16x256xf32>
    %c0_37 = arith.constant 0 : index
    %c0_38 = arith.constant 0 : index
    %c0_39 = arith.constant 0 : index
    %38 = vector.load %arg6[%c0_37, %c0_38, %c0_39] : memref<4x256x256xf32, #tpu.memory_space<vmem>>, vector<1x256x256xf32>
    %39 = vector.shape_cast %38 : vector<1x256x256xf32> to vector<256x256xf32>
    %cst_40 = arith.constant dense<0.000000e+00> : vector<16x256xf32>
    %40 = tpu.matmul %37, %39, %cst_40 {dimension_numbers = #tpu.dot_dimension_numbers<[1], [0], [0], [1], [0, 0, 1, 1], [], []>} : vector<16x256xf32>, vector<256x256xf32>, vector<16x256xf32> -> vector<16x256xf32>
    %c1_41 = arith.constant 1 : index
    %c0_42 = arith.constant 0 : index
    %c0_43 = arith.constant 0 : index
    %41 = vector.load %arg5[%c1_41, %c0_42, %c0_43] : memref<4x16x32xf32, #tpu.memory_space<vmem>>, vector<1x16x32xf32>
    %42 = vector.shape_cast %41 : vector<1x16x32xf32> to vector<16x32xf32>
    %cst_44 = arith.constant dense<0.000000e+00> : vector<16x256xf32>
    %43 = tpu.matmul %42, %34, %cst_44 {dimension_numbers = #tpu.dot_dimension_numbers<[1], [0], [0], [1], [0, 0, 1, 1], [], []>} : vector<16x32xf32>, vector<32x256xf32>, vector<16x256xf32> -> vector<16x256xf32>
    %c1_45 = arith.constant 1 : index
    %c0_46 = arith.constant 0 : index
    %c0_47 = arith.constant 0 : index
    %44 = vector.load %arg6[%c1_45, %c0_46, %c0_47] : memref<4x256x256xf32, #tpu.memory_space<vmem>>, vector<1x256x256xf32>
    %45 = vector.shape_cast %44 : vector<1x256x256xf32> to vector<256x256xf32>
    %cst_48 = arith.constant dense<0.000000e+00> : vector<16x256xf32>
    %46 = tpu.matmul %43, %45, %cst_48 {dimension_numbers = #tpu.dot_dimension_numbers<[1], [0], [0], [1], [0, 0, 1, 1], [], []>} : vector<16x256xf32>, vector<256x256xf32>, vector<16x256xf32> -> vector<16x256xf32>
    %47 = arith.addf %40, %46 : vector<16x256xf32>
    %c2_49 = arith.constant 2 : index
    %c0_50 = arith.constant 0 : index
    %c0_51 = arith.constant 0 : index
    %48 = vector.load %arg5[%c2_49, %c0_50, %c0_51] : memref<4x16x32xf32, #tpu.memory_space<vmem>>, vector<1x16x32xf32>
    %49 = vector.shape_cast %48 : vector<1x16x32xf32> to vector<16x32xf32>
    %cst_52 = arith.constant dense<0.000000e+00> : vector<16x256xf32>
    %50 = tpu.matmul %49, %34, %cst_52 {dimension_numbers = #tpu.dot_dimension_numbers<[1], [0], [0], [1], [0, 0, 1, 1], [], []>} : vector<16x32xf32>, vector<32x256xf32>, vector<16x256xf32> -> vector<16x256xf32>
    %c2_53 = arith.constant 2 : index
    %c0_54 = arith.constant 0 : index
    %c0_55 = arith.constant 0 : index
    %51 = vector.load %arg6[%c2_53, %c0_54, %c0_55] : memref<4x256x256xf32, #tpu.memory_space<vmem>>, vector<1x256x256xf32>
    %52 = vector.shape_cast %51 : vector<1x256x256xf32> to vector<256x256xf32>
    %cst_56 = arith.constant dense<0.000000e+00> : vector<16x256xf32>
    %53 = tpu.matmul %50, %52, %cst_56 {dimension_numbers = #tpu.dot_dimension_numbers<[1], [0], [0], [1], [0, 0, 1, 1], [], []>} : vector<16x256xf32>, vector<256x256xf32>, vector<16x256xf32> -> vector<16x256xf32>
    %54 = arith.addf %47, %53 : vector<16x256xf32>
    %c3_57 = arith.constant 3 : index
    %c0_58 = arith.constant 0 : index
    %c0_59 = arith.constant 0 : index
    %55 = vector.load %arg5[%c3_57, %c0_58, %c0_59] : memref<4x16x32xf32, #tpu.memory_space<vmem>>, vector<1x16x32xf32>
    %56 = vector.shape_cast %55 : vector<1x16x32xf32> to vector<16x32xf32>
    %cst_60 = arith.constant dense<0.000000e+00> : vector<16x256xf32>
    %57 = tpu.matmul %56, %34, %cst_60 {dimension_numbers = #tpu.dot_dimension_numbers<[1], [0], [0], [1], [0, 0, 1, 1], [], []>} : vector<16x32xf32>, vector<32x256xf32>, vector<16x256xf32> -> vector<16x256xf32>
    %c3_61 = arith.constant 3 : index
    %c0_62 = arith.constant 0 : index
    %c0_63 = arith.constant 0 : index
    %58 = vector.load %arg6[%c3_61, %c0_62, %c0_63] : memref<4x256x256xf32, #tpu.memory_space<vmem>>, vector<1x256x256xf32>
    %59 = vector.shape_cast %58 : vector<1x256x256xf32> to vector<256x256xf32>
    %cst_64 = arith.constant dense<0.000000e+00> : vector<16x256xf32>
    %60 = tpu.matmul %57, %59, %cst_64 {dimension_numbers = #tpu.dot_dimension_numbers<[1], [0], [0], [1], [0, 0, 1, 1], [], []>} : vector<16x256xf32>, vector<256x256xf32>, vector<16x256xf32> -> vector<16x256xf32>
    %61 = arith.addf %54, %60 : vector<16x256xf32>
    %cst_65 = arith.constant dense<0.000000e+00> : vector<256xf32>
    %62 = vector.multi_reduction <add>, %61, %cst_65 [0] : vector<16x256xf32> to vector<256xf32>
    %63 = vector.shape_cast %62 : vector<256xf32> to vector<1x256xf32>
    %64 = arith.mulf %61, %61 : vector<16x256xf32>
    %cst_66 = arith.constant dense<0.000000e+00> : vector<256xf32>
    %65 = vector.multi_reduction <add>, %64, %cst_66 [0] : vector<16x256xf32> to vector<256xf32>
    %66 = vector.shape_cast %65 : vector<256xf32> to vector<1x256xf32>
    %c0_67 = arith.constant 0 : index
    %c0_68 = arith.constant 0 : index
    %67 = vector.load %arg7[%c0_67, %c0_68] : memref<256x16xf32, #tpu.memory_space<vmem>>, vector<256x16xf32>
    %cst_69 = arith.constant dense<0.000000e+00> : vector<1x16xf32>
    %68 = tpu.matmul %63, %67, %cst_69 {dimension_numbers = #tpu.dot_dimension_numbers<[1], [0], [0], [1], [0, 0, 1, 1], [], []>} : vector<1x256xf32>, vector<256x16xf32>, vector<1x16xf32> -> vector<1x16xf32>
    %cst_70 = arith.constant 3.906250e-03 : f32
    %69 = vector.broadcast %cst_70 : f32 to vector<1x16xf32>
    %70 = arith.mulf %68, %69 : vector<1x16xf32>
    %c0_71 = arith.constant 0 : index
    %c0_72 = arith.constant 0 : index
    %71 = vector.load %arg7[%c0_71, %c0_72] : memref<256x16xf32, #tpu.memory_space<vmem>>, vector<256x16xf32>
    %cst_73 = arith.constant dense<0.000000e+00> : vector<1x16xf32>
    %72 = tpu.matmul %66, %71, %cst_73 {dimension_numbers = #tpu.dot_dimension_numbers<[1], [0], [0], [1], [0, 0, 1, 1], [], []>} : vector<1x256xf32>, vector<256x16xf32>, vector<1x16xf32> -> vector<1x16xf32>
    %cst_74 = arith.constant 3.906250e-03 : f32
    %73 = vector.broadcast %cst_74 : f32 to vector<1x16xf32>
    %74 = arith.mulf %72, %73 : vector<1x16xf32>
    %75 = arith.mulf %70, %70 : vector<1x16xf32>
    %76 = arith.subf %74, %75 : vector<1x16xf32>
    %c0_75 = arith.constant 0 : index
    %c0_76 = arith.constant 0 : index
    %77 = vector.load %arg9[%c0_75, %c0_76] : memref<1x16xf32, #tpu.memory_space<vmem>>, vector<1x16xf32>
    %cst_77 = arith.constant 9.99999974E-6 : f32
    %78 = vector.broadcast %cst_77 : f32 to vector<1x16xf32>
    %79 = arith.addf %76, %78 : vector<1x16xf32>
    %80 = math.rsqrt %79 : vector<1x16xf32>
    %81 = arith.mulf %77, %80 : vector<1x16xf32>
    %c0_78 = arith.constant 0 : index
    %c0_79 = arith.constant 0 : index
    %82 = vector.load %arg10[%c0_78, %c0_79] : memref<1x16xf32, #tpu.memory_space<vmem>>, vector<1x16xf32>
    %83 = arith.mulf %70, %81 : vector<1x16xf32>
    %84 = arith.subf %82, %83 : vector<1x16xf32>
    %c0_80 = arith.constant 0 : index
    %c0_81 = arith.constant 0 : index
    %85 = vector.load %arg8[%c0_80, %c0_81] : memref<16x256xf32, #tpu.memory_space<vmem>>, vector<16x256xf32>
    %cst_82 = arith.constant dense<0.000000e+00> : vector<1x256xf32>
    %86 = tpu.matmul %81, %85, %cst_82 {dimension_numbers = #tpu.dot_dimension_numbers<[1], [0], [0], [1], [0, 0, 1, 1], [], []>} : vector<1x16xf32>, vector<16x256xf32>, vector<1x256xf32> -> vector<1x256xf32>
    %c0_83 = arith.constant 0 : index
    %c0_84 = arith.constant 0 : index
    %87 = vector.load %arg8[%c0_83, %c0_84] : memref<16x256xf32, #tpu.memory_space<vmem>>, vector<16x256xf32>
    %cst_85 = arith.constant dense<0.000000e+00> : vector<1x256xf32>
    %88 = tpu.matmul %84, %87, %cst_85 {dimension_numbers = #tpu.dot_dimension_numbers<[1], [0], [0], [1], [0, 0, 1, 1], [], []>} : vector<1x16xf32>, vector<16x256xf32>, vector<1x256xf32> -> vector<1x256xf32>
    %89 = vector.broadcast %86 : vector<1x256xf32> to vector<16x256xf32>
    %90 = arith.mulf %61, %89 : vector<16x256xf32>
    %91 = vector.broadcast %88 : vector<1x256xf32> to vector<16x256xf32>
    %92 = arith.addf %90, %91 : vector<16x256xf32>
    %cst_86 = arith.constant 2.000000e-01 : f32
    %93 = vector.broadcast %cst_86 : f32 to vector<16x256xf32>
    %94 = arith.mulf %93, %92 : vector<16x256xf32>
    %95 = arith.maximumf %92, %94 : vector<16x256xf32>
    %c0_87 = arith.constant 0 : index
    %c0_88 = arith.constant 0 : index
    %c0_89 = arith.constant 0 : index
    %96 = vector.load %arg11[%c0_87, %c0_88, %c0_89] : memref<4x8x16xf32, #tpu.memory_space<vmem>>, vector<1x8x16xf32>
    %97 = vector.shape_cast %96 : vector<1x8x16xf32> to vector<8x16xf32>
    %cst_90 = arith.constant dense<0.000000e+00> : vector<8x256xf32>
    %98 = tpu.matmul %97, %95, %cst_90 {dimension_numbers = #tpu.dot_dimension_numbers<[1], [0], [0], [1], [0, 0, 1, 1], [], []>} : vector<8x16xf32>, vector<16x256xf32>, vector<8x256xf32> -> vector<8x256xf32>
    %c0_91 = arith.constant 0 : index
    %c0_92 = arith.constant 0 : index
    %c0_93 = arith.constant 0 : index
    %99 = vector.load %arg12[%c0_91, %c0_92, %c0_93] : memref<4x256x256xf32, #tpu.memory_space<vmem>>, vector<1x256x256xf32>
    %100 = vector.shape_cast %99 : vector<1x256x256xf32> to vector<256x256xf32>
    %cst_94 = arith.constant dense<0.000000e+00> : vector<8x256xf32>
    %101 = tpu.matmul %98, %100, %cst_94 {dimension_numbers = #tpu.dot_dimension_numbers<[1], [0], [0], [1], [0, 0, 1, 1], [], []>} : vector<8x256xf32>, vector<256x256xf32>, vector<8x256xf32> -> vector<8x256xf32>
    %c1_95 = arith.constant 1 : index
    %c0_96 = arith.constant 0 : index
    %c0_97 = arith.constant 0 : index
    %102 = vector.load %arg11[%c1_95, %c0_96, %c0_97] : memref<4x8x16xf32, #tpu.memory_space<vmem>>, vector<1x8x16xf32>
    %103 = vector.shape_cast %102 : vector<1x8x16xf32> to vector<8x16xf32>
    %cst_98 = arith.constant dense<0.000000e+00> : vector<8x256xf32>
    %104 = tpu.matmul %103, %95, %cst_98 {dimension_numbers = #tpu.dot_dimension_numbers<[1], [0], [0], [1], [0, 0, 1, 1], [], []>} : vector<8x16xf32>, vector<16x256xf32>, vector<8x256xf32> -> vector<8x256xf32>
    %c1_99 = arith.constant 1 : index
    %c0_100 = arith.constant 0 : index
    %c0_101 = arith.constant 0 : index
    %105 = vector.load %arg12[%c1_99, %c0_100, %c0_101] : memref<4x256x256xf32, #tpu.memory_space<vmem>>, vector<1x256x256xf32>
    %106 = vector.shape_cast %105 : vector<1x256x256xf32> to vector<256x256xf32>
    %cst_102 = arith.constant dense<0.000000e+00> : vector<8x256xf32>
    %107 = tpu.matmul %104, %106, %cst_102 {dimension_numbers = #tpu.dot_dimension_numbers<[1], [0], [0], [1], [0, 0, 1, 1], [], []>} : vector<8x256xf32>, vector<256x256xf32>, vector<8x256xf32> -> vector<8x256xf32>
    %108 = arith.addf %101, %107 : vector<8x256xf32>
    %c2_103 = arith.constant 2 : index
    %c0_104 = arith.constant 0 : index
    %c0_105 = arith.constant 0 : index
    %109 = vector.load %arg11[%c2_103, %c0_104, %c0_105] : memref<4x8x16xf32, #tpu.memory_space<vmem>>, vector<1x8x16xf32>
    %110 = vector.shape_cast %109 : vector<1x8x16xf32> to vector<8x16xf32>
    %cst_106 = arith.constant dense<0.000000e+00> : vector<8x256xf32>
    %111 = tpu.matmul %110, %95, %cst_106 {dimension_numbers = #tpu.dot_dimension_numbers<[1], [0], [0], [1], [0, 0, 1, 1], [], []>} : vector<8x16xf32>, vector<16x256xf32>, vector<8x256xf32> -> vector<8x256xf32>
    %c2_107 = arith.constant 2 : index
    %c0_108 = arith.constant 0 : index
    %c0_109 = arith.constant 0 : index
    %112 = vector.load %arg12[%c2_107, %c0_108, %c0_109] : memref<4x256x256xf32, #tpu.memory_space<vmem>>, vector<1x256x256xf32>
    %113 = vector.shape_cast %112 : vector<1x256x256xf32> to vector<256x256xf32>
    %cst_110 = arith.constant dense<0.000000e+00> : vector<8x256xf32>
    %114 = tpu.matmul %111, %113, %cst_110 {dimension_numbers = #tpu.dot_dimension_numbers<[1], [0], [0], [1], [0, 0, 1, 1], [], []>} : vector<8x256xf32>, vector<256x256xf32>, vector<8x256xf32> -> vector<8x256xf32>
    %115 = arith.addf %108, %114 : vector<8x256xf32>
    %c3_111 = arith.constant 3 : index
    %c0_112 = arith.constant 0 : index
    %c0_113 = arith.constant 0 : index
    %116 = vector.load %arg11[%c3_111, %c0_112, %c0_113] : memref<4x8x16xf32, #tpu.memory_space<vmem>>, vector<1x8x16xf32>
    %117 = vector.shape_cast %116 : vector<1x8x16xf32> to vector<8x16xf32>
    %cst_114 = arith.constant dense<0.000000e+00> : vector<8x256xf32>
    %118 = tpu.matmul %117, %95, %cst_114 {dimension_numbers = #tpu.dot_dimension_numbers<[1], [0], [0], [1], [0, 0, 1, 1], [], []>} : vector<8x16xf32>, vector<16x256xf32>, vector<8x256xf32> -> vector<8x256xf32>
    %c3_115 = arith.constant 3 : index
    %c0_116 = arith.constant 0 : index
    %c0_117 = arith.constant 0 : index
    %119 = vector.load %arg12[%c3_115, %c0_116, %c0_117] : memref<4x256x256xf32, #tpu.memory_space<vmem>>, vector<1x256x256xf32>
    %120 = vector.shape_cast %119 : vector<1x256x256xf32> to vector<256x256xf32>
    %cst_118 = arith.constant dense<0.000000e+00> : vector<8x256xf32>
    %121 = tpu.matmul %118, %120, %cst_118 {dimension_numbers = #tpu.dot_dimension_numbers<[1], [0], [0], [1], [0, 0, 1, 1], [], []>} : vector<8x256xf32>, vector<256x256xf32>, vector<8x256xf32> -> vector<8x256xf32>
    %122 = arith.addf %115, %121 : vector<8x256xf32>
    %cst_119 = arith.constant dense<0.000000e+00> : vector<256xf32>
    %123 = vector.multi_reduction <add>, %122, %cst_119 [0] : vector<8x256xf32> to vector<256xf32>
    %124 = vector.shape_cast %123 : vector<256xf32> to vector<1x256xf32>
    %125 = arith.mulf %122, %122 : vector<8x256xf32>
    %cst_120 = arith.constant dense<0.000000e+00> : vector<256xf32>
    %126 = vector.multi_reduction <add>, %125, %cst_120 [0] : vector<8x256xf32> to vector<256xf32>
    %127 = vector.shape_cast %126 : vector<256xf32> to vector<1x256xf32>
    %c0_121 = arith.constant 0 : index
    %c0_122 = arith.constant 0 : index
    %128 = vector.load %arg13[%c0_121, %c0_122] : memref<256x32xf32, #tpu.memory_space<vmem>>, vector<256x32xf32>
    %cst_123 = arith.constant dense<0.000000e+00> : vector<1x32xf32>
    %129 = tpu.matmul %124, %128, %cst_123 {dimension_numbers = #tpu.dot_dimension_numbers<[1], [0], [0], [1], [0, 0, 1, 1], [], []>} : vector<1x256xf32>, vector<256x32xf32>, vector<1x32xf32> -> vector<1x32xf32>
    %cst_124 = arith.constant 1.562500e-02 : f32
    %130 = vector.broadcast %cst_124 : f32 to vector<1x32xf32>
    %131 = arith.mulf %129, %130 : vector<1x32xf32>
    %c0_125 = arith.constant 0 : index
    %c0_126 = arith.constant 0 : index
    %132 = vector.load %arg13[%c0_125, %c0_126] : memref<256x32xf32, #tpu.memory_space<vmem>>, vector<256x32xf32>
    %cst_127 = arith.constant dense<0.000000e+00> : vector<1x32xf32>
    %133 = tpu.matmul %127, %132, %cst_127 {dimension_numbers = #tpu.dot_dimension_numbers<[1], [0], [0], [1], [0, 0, 1, 1], [], []>} : vector<1x256xf32>, vector<256x32xf32>, vector<1x32xf32> -> vector<1x32xf32>
    %cst_128 = arith.constant 1.562500e-02 : f32
    %134 = vector.broadcast %cst_128 : f32 to vector<1x32xf32>
    %135 = arith.mulf %133, %134 : vector<1x32xf32>
    %136 = arith.mulf %131, %131 : vector<1x32xf32>
    %137 = arith.subf %135, %136 : vector<1x32xf32>
    %c0_129 = arith.constant 0 : index
    %c0_130 = arith.constant 0 : index
    %138 = vector.load %arg15[%c0_129, %c0_130] : memref<1x32xf32, #tpu.memory_space<vmem>>, vector<1x32xf32>
    %cst_131 = arith.constant 9.99999974E-6 : f32
    %139 = vector.broadcast %cst_131 : f32 to vector<1x32xf32>
    %140 = arith.addf %137, %139 : vector<1x32xf32>
    %141 = math.rsqrt %140 : vector<1x32xf32>
    %142 = arith.mulf %138, %141 : vector<1x32xf32>
    %c0_132 = arith.constant 0 : index
    %c0_133 = arith.constant 0 : index
    %143 = vector.load %arg16[%c0_132, %c0_133] : memref<1x32xf32, #tpu.memory_space<vmem>>, vector<1x32xf32>
    %144 = arith.mulf %131, %142 : vector<1x32xf32>
    %145 = arith.subf %143, %144 : vector<1x32xf32>
    %c0_134 = arith.constant 0 : index
    %c0_135 = arith.constant 0 : index
    %146 = vector.load %arg14[%c0_134, %c0_135] : memref<32x256xf32, #tpu.memory_space<vmem>>, vector<32x256xf32>
    %cst_136 = arith.constant dense<0.000000e+00> : vector<1x256xf32>
    %147 = tpu.matmul %142, %146, %cst_136 {dimension_numbers = #tpu.dot_dimension_numbers<[1], [0], [0], [1], [0, 0, 1, 1], [], []>} : vector<1x32xf32>, vector<32x256xf32>, vector<1x256xf32> -> vector<1x256xf32>
    %c0_137 = arith.constant 0 : index
    %c0_138 = arith.constant 0 : index
    %148 = vector.load %arg14[%c0_137, %c0_138] : memref<32x256xf32, #tpu.memory_space<vmem>>, vector<32x256xf32>
    %cst_139 = arith.constant dense<0.000000e+00> : vector<1x256xf32>
    %149 = tpu.matmul %145, %148, %cst_139 {dimension_numbers = #tpu.dot_dimension_numbers<[1], [0], [0], [1], [0, 0, 1, 1], [], []>} : vector<1x32xf32>, vector<32x256xf32>, vector<1x256xf32> -> vector<1x256xf32>
    %150 = vector.broadcast %147 : vector<1x256xf32> to vector<8x256xf32>
    %151 = arith.mulf %122, %150 : vector<8x256xf32>
    %152 = vector.broadcast %149 : vector<1x256xf32> to vector<8x256xf32>
    %153 = arith.addf %151, %152 : vector<8x256xf32>
    %cst_140 = arith.constant 2.000000e-01 : f32
    %154 = vector.broadcast %cst_140 : f32 to vector<8x256xf32>
    %155 = arith.mulf %154, %153 : vector<8x256xf32>
    %156 = arith.maximumf %153, %155 : vector<8x256xf32>
    %c0_141 = arith.constant 0 : index
    %c0_142 = arith.constant 0 : index
    %c0_143 = arith.constant 0 : index
    %157 = vector.load %arg17[%c0_141, %c0_142, %c0_143] : memref<4x4x8xf32, #tpu.memory_space<vmem>>, vector<1x4x8xf32>
    %158 = vector.shape_cast %157 : vector<1x4x8xf32> to vector<4x8xf32>
    %cst_144 = arith.constant dense<0.000000e+00> : vector<4x256xf32>
    %159 = tpu.matmul %158, %156, %cst_144 {dimension_numbers = #tpu.dot_dimension_numbers<[1], [0], [0], [1], [0, 0, 1, 1], [], []>} : vector<4x8xf32>, vector<8x256xf32>, vector<4x256xf32> -> vector<4x256xf32>
    %c0_145 = arith.constant 0 : index
    %c0_146 = arith.constant 0 : index
    %c0_147 = arith.constant 0 : index
    %160 = vector.load %arg18[%c0_145, %c0_146, %c0_147] : memref<4x256x256xf32, #tpu.memory_space<vmem>>, vector<1x256x256xf32>
    %161 = vector.shape_cast %160 : vector<1x256x256xf32> to vector<256x256xf32>
    %cst_148 = arith.constant dense<0.000000e+00> : vector<4x256xf32>
    %162 = tpu.matmul %159, %161, %cst_148 {dimension_numbers = #tpu.dot_dimension_numbers<[1], [0], [0], [1], [0, 0, 1, 1], [], []>} : vector<4x256xf32>, vector<256x256xf32>, vector<4x256xf32> -> vector<4x256xf32>
    %c1_149 = arith.constant 1 : index
    %c0_150 = arith.constant 0 : index
    %c0_151 = arith.constant 0 : index
    %163 = vector.load %arg17[%c1_149, %c0_150, %c0_151] : memref<4x4x8xf32, #tpu.memory_space<vmem>>, vector<1x4x8xf32>
    %164 = vector.shape_cast %163 : vector<1x4x8xf32> to vector<4x8xf32>
    %cst_152 = arith.constant dense<0.000000e+00> : vector<4x256xf32>
    %165 = tpu.matmul %164, %156, %cst_152 {dimension_numbers = #tpu.dot_dimension_numbers<[1], [0], [0], [1], [0, 0, 1, 1], [], []>} : vector<4x8xf32>, vector<8x256xf32>, vector<4x256xf32> -> vector<4x256xf32>
    %c1_153 = arith.constant 1 : index
    %c0_154 = arith.constant 0 : index
    %c0_155 = arith.constant 0 : index
    %166 = vector.load %arg18[%c1_153, %c0_154, %c0_155] : memref<4x256x256xf32, #tpu.memory_space<vmem>>, vector<1x256x256xf32>
    %167 = vector.shape_cast %166 : vector<1x256x256xf32> to vector<256x256xf32>
    %cst_156 = arith.constant dense<0.000000e+00> : vector<4x256xf32>
    %168 = tpu.matmul %165, %167, %cst_156 {dimension_numbers = #tpu.dot_dimension_numbers<[1], [0], [0], [1], [0, 0, 1, 1], [], []>} : vector<4x256xf32>, vector<256x256xf32>, vector<4x256xf32> -> vector<4x256xf32>
    %169 = arith.addf %162, %168 : vector<4x256xf32>
    %c2_157 = arith.constant 2 : index
    %c0_158 = arith.constant 0 : index
    %c0_159 = arith.constant 0 : index
    %170 = vector.load %arg17[%c2_157, %c0_158, %c0_159] : memref<4x4x8xf32, #tpu.memory_space<vmem>>, vector<1x4x8xf32>
    %171 = vector.shape_cast %170 : vector<1x4x8xf32> to vector<4x8xf32>
    %cst_160 = arith.constant dense<0.000000e+00> : vector<4x256xf32>
    %172 = tpu.matmul %171, %156, %cst_160 {dimension_numbers = #tpu.dot_dimension_numbers<[1], [0], [0], [1], [0, 0, 1, 1], [], []>} : vector<4x8xf32>, vector<8x256xf32>, vector<4x256xf32> -> vector<4x256xf32>
    %c2_161 = arith.constant 2 : index
    %c0_162 = arith.constant 0 : index
    %c0_163 = arith.constant 0 : index
    %173 = vector.load %arg18[%c2_161, %c0_162, %c0_163] : memref<4x256x256xf32, #tpu.memory_space<vmem>>, vector<1x256x256xf32>
    %174 = vector.shape_cast %173 : vector<1x256x256xf32> to vector<256x256xf32>
    %cst_164 = arith.constant dense<0.000000e+00> : vector<4x256xf32>
    %175 = tpu.matmul %172, %174, %cst_164 {dimension_numbers = #tpu.dot_dimension_numbers<[1], [0], [0], [1], [0, 0, 1, 1], [], []>} : vector<4x256xf32>, vector<256x256xf32>, vector<4x256xf32> -> vector<4x256xf32>
    %176 = arith.addf %169, %175 : vector<4x256xf32>
    %c3_165 = arith.constant 3 : index
    %c0_166 = arith.constant 0 : index
    %c0_167 = arith.constant 0 : index
    %177 = vector.load %arg17[%c3_165, %c0_166, %c0_167] : memref<4x4x8xf32, #tpu.memory_space<vmem>>, vector<1x4x8xf32>
    %178 = vector.shape_cast %177 : vector<1x4x8xf32> to vector<4x8xf32>
    %cst_168 = arith.constant dense<0.000000e+00> : vector<4x256xf32>
    %179 = tpu.matmul %178, %156, %cst_168 {dimension_numbers = #tpu.dot_dimension_numbers<[1], [0], [0], [1], [0, 0, 1, 1], [], []>} : vector<4x8xf32>, vector<8x256xf32>, vector<4x256xf32> -> vector<4x256xf32>
    %c3_169 = arith.constant 3 : index
    %c0_170 = arith.constant 0 : index
    %c0_171 = arith.constant 0 : index
    %180 = vector.load %arg18[%c3_169, %c0_170, %c0_171] : memref<4x256x256xf32, #tpu.memory_space<vmem>>, vector<1x256x256xf32>
    %181 = vector.shape_cast %180 : vector<1x256x256xf32> to vector<256x256xf32>
    %cst_172 = arith.constant dense<0.000000e+00> : vector<4x256xf32>
    %182 = tpu.matmul %179, %181, %cst_172 {dimension_numbers = #tpu.dot_dimension_numbers<[1], [0], [0], [1], [0, 0, 1, 1], [], []>} : vector<4x256xf32>, vector<256x256xf32>, vector<4x256xf32> -> vector<4x256xf32>
    %183 = arith.addf %176, %182 : vector<4x256xf32>
    %cst_173 = arith.constant dense<0.000000e+00> : vector<256xf32>
    %184 = vector.multi_reduction <add>, %183, %cst_173 [0] : vector<4x256xf32> to vector<256xf32>
    %185 = vector.shape_cast %184 : vector<256xf32> to vector<1x256xf32>
    %186 = arith.mulf %183, %183 : vector<4x256xf32>
    %cst_174 = arith.constant dense<0.000000e+00> : vector<256xf32>
    %187 = vector.multi_reduction <add>, %186, %cst_174 [0] : vector<4x256xf32> to vector<256xf32>
    %188 = vector.shape_cast %187 : vector<256xf32> to vector<1x256xf32>
    %c0_175 = arith.constant 0 : index
    %c0_176 = arith.constant 0 : index
    %189 = vector.load %arg19[%c0_175, %c0_176] : memref<256x64xf32, #tpu.memory_space<vmem>>, vector<256x64xf32>
    %cst_177 = arith.constant dense<0.000000e+00> : vector<1x64xf32>
    %190 = tpu.matmul %185, %189, %cst_177 {dimension_numbers = #tpu.dot_dimension_numbers<[1], [0], [0], [1], [0, 0, 1, 1], [], []>} : vector<1x256xf32>, vector<256x64xf32>, vector<1x64xf32> -> vector<1x64xf32>
    %cst_178 = arith.constant 6.250000e-02 : f32
    %191 = vector.broadcast %cst_178 : f32 to vector<1x64xf32>
    %192 = arith.mulf %190, %191 : vector<1x64xf32>
    %c0_179 = arith.constant 0 : index
    %c0_180 = arith.constant 0 : index
    %193 = vector.load %arg19[%c0_179, %c0_180] : memref<256x64xf32, #tpu.memory_space<vmem>>, vector<256x64xf32>
    %cst_181 = arith.constant dense<0.000000e+00> : vector<1x64xf32>
    %194 = tpu.matmul %188, %193, %cst_181 {dimension_numbers = #tpu.dot_dimension_numbers<[1], [0], [0], [1], [0, 0, 1, 1], [], []>} : vector<1x256xf32>, vector<256x64xf32>, vector<1x64xf32> -> vector<1x64xf32>
    %cst_182 = arith.constant 6.250000e-02 : f32
    %195 = vector.broadcast %cst_182 : f32 to vector<1x64xf32>
    %196 = arith.mulf %194, %195 : vector<1x64xf32>
    %197 = arith.mulf %192, %192 : vector<1x64xf32>
    %198 = arith.subf %196, %197 : vector<1x64xf32>
    %c0_183 = arith.constant 0 : index
    %c0_184 = arith.constant 0 : index
    %199 = vector.load %arg21[%c0_183, %c0_184] : memref<1x64xf32, #tpu.memory_space<vmem>>, vector<1x64xf32>
    %cst_185 = arith.constant 9.99999974E-6 : f32
    %200 = vector.broadcast %cst_185 : f32 to vector<1x64xf32>
    %201 = arith.addf %198, %200 : vector<1x64xf32>
    %202 = math.rsqrt %201 : vector<1x64xf32>
    %203 = arith.mulf %199, %202 : vector<1x64xf32>
    %c0_186 = arith.constant 0 : index
    %c0_187 = arith.constant 0 : index
    %204 = vector.load %arg22[%c0_186, %c0_187] : memref<1x64xf32, #tpu.memory_space<vmem>>, vector<1x64xf32>
    %205 = arith.mulf %192, %203 : vector<1x64xf32>
    %206 = arith.subf %204, %205 : vector<1x64xf32>
    %c0_188 = arith.constant 0 : index
    %c0_189 = arith.constant 0 : index
    %207 = vector.load %arg20[%c0_188, %c0_189] : memref<64x256xf32, #tpu.memory_space<vmem>>, vector<64x256xf32>
    %cst_190 = arith.constant dense<0.000000e+00> : vector<1x256xf32>
    %208 = tpu.matmul %203, %207, %cst_190 {dimension_numbers = #tpu.dot_dimension_numbers<[1], [0], [0], [1], [0, 0, 1, 1], [], []>} : vector<1x64xf32>, vector<64x256xf32>, vector<1x256xf32> -> vector<1x256xf32>
    %c0_191 = arith.constant 0 : index
    %c0_192 = arith.constant 0 : index
    %209 = vector.load %arg20[%c0_191, %c0_192] : memref<64x256xf32, #tpu.memory_space<vmem>>, vector<64x256xf32>
    %cst_193 = arith.constant dense<0.000000e+00> : vector<1x256xf32>
    %210 = tpu.matmul %206, %209, %cst_193 {dimension_numbers = #tpu.dot_dimension_numbers<[1], [0], [0], [1], [0, 0, 1, 1], [], []>} : vector<1x64xf32>, vector<64x256xf32>, vector<1x256xf32> -> vector<1x256xf32>
    %211 = vector.broadcast %208 : vector<1x256xf32> to vector<4x256xf32>
    %212 = arith.mulf %183, %211 : vector<4x256xf32>
    %213 = vector.broadcast %210 : vector<1x256xf32> to vector<4x256xf32>
    %214 = arith.addf %212, %213 : vector<4x256xf32>
    %cst_194 = arith.constant 2.000000e-01 : f32
    %215 = vector.broadcast %cst_194 : f32 to vector<4x256xf32>
    %216 = arith.mulf %215, %214 : vector<4x256xf32>
    %217 = arith.maximumf %214, %216 : vector<4x256xf32>
    %c0_195 = arith.constant 0 : index
    %c0_196 = arith.constant 0 : index
    %218 = vector.load %arg23[%c0_195, %c0_196] : memref<4x256xf32, #tpu.memory_space<vmem>>, vector<4x256xf32>
    %219 = arith.mulf %217, %218 : vector<4x256xf32>
    %cst_197 = arith.constant dense<0.000000e+00> : vector<4xf32>
    %220 = vector.multi_reduction <add>, %219, %cst_197 [1] : vector<4x256xf32> to vector<4xf32>
    %221 = vector.shape_cast %220 : vector<4xf32> to vector<4x1xf32>
    %cst_198 = arith.constant dense<0.000000e+00> : vector<1xf32>
    %222 = vector.multi_reduction <add>, %221, %cst_198 [0] : vector<4x1xf32> to vector<1xf32>
    %223 = vector.shape_cast %222 : vector<1xf32> to vector<1x1xf32>
    %c0_199 = arith.constant 0 : index
    %c0_200 = arith.constant 0 : index
    %224 = vector.load %arg24[%c0_199, %c0_200] : memref<1x1xf32, #tpu.memory_space<vmem>>, vector<1x1xf32>
    %225 = arith.addf %223, %224 : vector<1x1xf32>
    %c0_201 = arith.constant 0 : index
    %c0_202 = arith.constant 0 : index
    %c0_203 = arith.constant 0 : index
    %226 = vector.load %arg25[%c0_201, %c0_202, %c0_203] : memref<1x1x1xf32, #tpu.memory_space<vmem>>, vector<1x1x1xf32>
    %227 = vector.shape_cast %226 : vector<1x1x1xf32> to vector<1x1xf32>
    %228 = vector.shape_cast %225 : vector<1x1xf32> to vector<1x1x1xf32>
    tpu.vector_store %arg25[%c0_201, %c0_202, %c0_203], %228 {strides = array<i32>} : memref<1x1x1xf32, #tpu.memory_space<vmem>>, vector<1x1x1xf32>,
    return
  }
  func.func @transform_0(%arg0: i32) -> (i32, i32, i32) {
    %c0_i32 = arith.constant 0 : i32
    %c0_i32_0 = arith.constant 0 : i32
    %c0_i32_1 = arith.constant 0 : i32
    return %arg0, %c0_i32, %c0_i32_0 : i32, i32, i32
  }
  func.func @transform_1(%arg0: i32) -> (i32, i32, i32) {
    %c0_i32 = arith.constant 0 : i32
    %c0_i32_0 = arith.constant 0 : i32
    %c0_i32_1 = arith.constant 0 : i32
    %c0_i32_2 = arith.constant 0 : i32
    return %c0_i32, %c0_i32_0, %c0_i32_1 : i32, i32, i32
  }
  func.func @transform_2(%arg0: i32) -> (i32, i32, i32) {
    %c0_i32 = arith.constant 0 : i32
    %c0_i32_0 = arith.constant 0 : i32
    %c0_i32_1 = arith.constant 0 : i32
    %c0_i32_2 = arith.constant 0 : i32
    return %c0_i32, %c0_i32_0, %c0_i32_1 : i32, i32, i32
  }
  func.func @transform_3(%arg0: i32) -> (i32, i32) {
    %c0_i32 = arith.constant 0 : i32
    %c0_i32_0 = arith.constant 0 : i32
    %c0_i32_1 = arith.constant 0 : i32
    return %c0_i32, %c0_i32_0 : i32, i32
  }
  func.func @transform_4(%arg0: i32) -> (i32, i32, i32) {
    %c0_i32 = arith.constant 0 : i32
    %c0_i32_0 = arith.constant 0 : i32
    %c0_i32_1 = arith.constant 0 : i32
    %c0_i32_2 = arith.constant 0 : i32
    return %c0_i32, %c0_i32_0, %c0_i32_1 : i32, i32, i32
  }
  func.func @transform_5(%arg0: i32) -> (i32, i32, i32) {
    %c0_i32 = arith.constant 0 : i32
    %c0_i32_0 = arith.constant 0 : i32
    %c0_i32_1 = arith.constant 0 : i32
    %c0_i32_2 = arith.constant 0 : i32
    return %c0_i32, %c0_i32_0, %c0_i32_1 : i32, i32, i32
  }
  func.func @transform_6(%arg0: i32) -> (i32, i32) {
    %c0_i32 = arith.constant 0 : i32
    %c0_i32_0 = arith.constant 0 : i32
    %c0_i32_1 = arith.constant 0 : i32
    return %c0_i32, %c0_i32_0 : i32, i32
  }
  func.func @transform_7(%arg0: i32) -> (i32, i32) {
    %c0_i32 = arith.constant 0 : i32
    %c0_i32_0 = arith.constant 0 : i32
    %c0_i32_1 = arith.constant 0 : i32
    return %c0_i32, %c0_i32_0 : i32, i32
  }
  func.func @transform_8(%arg0: i32) -> (i32, i32) {
    %c0_i32 = arith.constant 0 : i32
    %c0_i32_0 = arith.constant 0 : i32
    %c0_i32_1 = arith.constant 0 : i32
    return %c0_i32, %c0_i32_0 : i32, i32
  }
  func.func @transform_9(%arg0: i32) -> (i32, i32) {
    %c0_i32 = arith.constant 0 : i32
    %c0_i32_0 = arith.constant 0 : i32
    %c0_i32_1 = arith.constant 0 : i32
    return %c0_i32, %c0_i32_0 : i32, i32
  }
  func.func @transform_10(%arg0: i32) -> (i32, i32, i32) {
    %c0_i32 = arith.constant 0 : i32
    %c0_i32_0 = arith.constant 0 : i32
    %c0_i32_1 = arith.constant 0 : i32
    %c0_i32_2 = arith.constant 0 : i32
    return %c0_i32, %c0_i32_0, %c0_i32_1 : i32, i32, i32
  }
  func.func @transform_11(%arg0: i32) -> (i32, i32, i32) {
    %c0_i32 = arith.constant 0 : i32
    %c0_i32_0 = arith.constant 0 : i32
    %c0_i32_1 = arith.constant 0 : i32
    %c0_i32_2 = arith.constant 0 : i32
    return %c0_i32, %c0_i32_0, %c0_i32_1 : i32, i32, i32
  }
  func.func @transform_12(%arg0: i32) -> (i32, i32) {
    %c0_i32 = arith.constant 0 : i32
    %c0_i32_0 = arith.constant 0 : i32
    %c0_i32_1 = arith.constant 0 : i32
    return %c0_i32, %c0_i32_0 : i32, i32
  }
  func.func @transform_13(%arg0: i32) -> (i32, i32) {
    %c0_i32 = arith.constant 0 : i32
    %c0_i32_0 = arith.constant 0 : i32
    %c0_i32_1 = arith.constant 0 : i32
    return %c0_i32, %c0_i32_0 : i32, i32
  }
  func.func @transform_14(%arg0: i32) -> (i32, i32) {
    %c0_i32 = arith.constant 0 : i32
    %c0_i32_0 = arith.constant 0 : i32
    %c0_i32_1 = arith.constant 0 : i32
    return %c0_i32, %c0_i32_0 : i32, i32
  }
  func.func @transform_15(%arg0: i32) -> (i32, i32) {
    %c0_i32 = arith.constant 0 : i32
    %c0_i32_0 = arith.constant 0 : i32
    %c0_i32_1 = arith.constant 0 : i32
    return %c0_i32, %c0_i32_0 : i32, i32
  }
  func.func @transform_16(%arg0: i32) -> (i32, i32, i32) {
    %c0_i32 = arith.constant 0 : i32
    %c0_i32_0 = arith.constant 0 : i32
    %c0_i32_1 = arith.constant 0 : i32
    %c0_i32_2 = arith.constant 0 : i32
    return %c0_i32, %c0_i32_0, %c0_i32_1 : i32, i32, i32
  }
  func.func @transform_17(%arg0: i32) -> (i32, i32, i32) {
    %c0_i32 = arith.constant 0 : i32
    %c0_i32_0 = arith.constant 0 : i32
    %c0_i32_1 = arith.constant 0 : i32
    %c0_i32_2 = arith.constant 0 : i32
    return %c0_i32, %c0_i32_0, %c0_i32_1 : i32, i32, i32
  }
  func.func @transform_18(%arg0: i32) -> (i32, i32) {
    %c0_i32 = arith.constant 0 : i32
    %c0_i32_0 = arith.constant 0 : i32
    %c0_i32_1 = arith.constant 0 : i32
    return %c0_i32, %c0_i32_0 : i32, i32
  }
  func.func @transform_19(%arg0: i32) -> (i32, i32) {
    %c0_i32 = arith.constant 0 : i32
    %c0_i32_0 = arith.constant 0 : i32
    %c0_i32_1 = arith.constant 0 : i32
    return %c0_i32, %c0_i32_0 : i32, i32
  }
  func.func @transform_20(%arg0: i32) -> (i32, i32) {
    %c0_i32 = arith.constant 0 : i32
    %c0_i32_0 = arith.constant 0 : i32
    %c0_i32_1 = arith.constant 0 : i32
    return %c0_i32, %c0_i32_0 : i32, i32
  }
  func.func @transform_21(%arg0: i32) -> (i32, i32) {
    %c0_i32 = arith.constant 0 : i32
    %c0_i32_0 = arith.constant 0 : i32
    %c0_i32_1 = arith.constant 0 : i32
    return %c0_i32, %c0_i32_0 : i32, i32
  }
  func.func @transform_22(%arg0: i32) -> (i32, i32) {
    %c0_i32 = arith.constant 0 : i32
    %c0_i32_0 = arith.constant 0 : i32
    %c0_i32_1 = arith.constant 0 : i32
    return %c0_i32, %c0_i32_0 : i32, i32
  }
  func.func @transform_23(%arg0: i32) -> (i32, i32) {
    %c0_i32 = arith.constant 0 : i32
    %c0_i32_0 = arith.constant 0 : i32
    %c0_i32_1 = arith.constant 0 : i32
    return %c0_i32, %c0_i32_0 : i32, i32
  }
  func.func @transform_24(%arg0: i32) -> (i32, i32, i32) {
    %c0_i32 = arith.constant 0 : i32
    %c0_i32_0 = arith.constant 0 : i32
    %c0_i32_1 = arith.constant 0 : i32
    return %arg0, %c0_i32, %c0_i32_0 : i32, i32, i32
  }
}

</mosaic_0001>

<bundles_post_ra>
// kernel: critic_forward.1
= control target key start
LH: loop header
LB: loop body
LE: loop exit
PB: predicated region body
PF: predicated region fallthrough
CT: control target
= control target key end

     0   :  { %s8246_s27 = smov 0   ;;  %s12097_s0 = inlined_call_operand.vmem [shape: f32[2,64,192], index: 0, kind: input, shape index: {}]   ;;  %s12098_s1 = inlined_call_operand.vmem [shape: f32[4,32,64], index: 1, kind: input, shape index: {}]   ;;  %s12099_s2 = inlined_call_operand.vmem [shape: f32[4,192,256], index: 2, kind: input, shape index: {}]   ;;  %s12100_s3 = inlined_call_operand.vmem [shape: f32[1,256], index: 3, kind: input, shape index: {}]   ;;  %s12101_s4 = inlined_call_operand.vmem [shape: f32[4,16,32], index: 4, kind: input, shape index: {}]   ;;  %s12102_s5 = inlined_call_operand.vmem [shape: f32[4,256,256], index: 5, kind: input, shape index: {}]   ;;  %s12103_s6 = inlined_call_operand.vmem [shape: f32[256,16], index: 6, kind: input, shape index: {}]   ;;  %s12104_s7 = inlined_call_operand.vmem [shape: f32[16,256], index: 7, kind: input, shape index: {}]   ;;  %s12105_s8 = inlined_call_operand.vmem [shape: f32[1,16], index: 8, kind: input, shape index: {}]   ;;  %s12106_s9 = inlined_call_operand.vmem [shape: f32[1,16], index: 9, kind: input, shape index: {}]   ;;  %s12107_s10 = inlined_call_operand.vmem [shape: f32[4,8,16], index: 10, kind: input, shape index: {}]   ;;  %s12108_s11 = inlined_call_operand.vmem [shape: f32[4,256,256], index: 11, kind: input, shape index: {}]   ;;  %s12109_s12 = inlined_call_operand.vmem [shape: f32[256,32], index: 12, kind: input, shape index: {}]   ;;  %s12110_s13 = inlined_call_operand.vmem [shape: f32[32,256], index: 13, kind: input, shape index: {}]   ;;  %s12111_s14 = inlined_call_operand.vmem [shape: f32[1,32], index: 14, kind: input, shape index: {}]   ;;  %s12112_s15 = inlined_call_operand.vmem [shape: f32[1,32], index: 15, kind: input, shape index: {}]   ;;  %s12113_s16 = inlined_call_operand.vmem [shape: f32[4,4,8], index: 16, kind: input, shape index: {}]   ;;  %s12114_s17 = inlined_call_operand.vmem [shape: f32[4,256,256], index: 17, kind: input, shape index: {}]   ;;  %s12115_s18 = inlined_call_operand.vmem [shape: f32[256,64], index: 18, kind: input, shape index: {}]   ;;  %s12116_s19 = inlined_call_operand.vmem [shape: f32[64,256], index: 19, kind: input, shape index: {}]   ;;  %s12117_s20 = inlined_call_operand.vmem [shape: f32[1,64], index: 20, kind: input, shape index: {}]   ;;  %s12118_s21 = inlined_call_operand.vmem [shape: f32[1,64], index: 21, kind: input, shape index: {}]   ;;  %s12119_s22 = inlined_call_operand.vmem [shape: f32[4,256], index: 22, kind: input, shape index: {}]   ;;  %s12120_s23 = inlined_call_operand.<no memory space> [shape: f32[1,1], index: 23, kind: input, shape index: {}]   ;;  %s12121_s24 = inlined_call_operand.vmem [shape: f32[2,1,1], index: 24, kind: output, shape index: {}]  }
   0x1   :  { %12131 = sst [smem:[#allocation3_spill]] %s12097_s0  ;;  %v29_v0 = vstv %s12120_s23 }
   0x2   :  { %12132 = sst [smem:[#allocation4_spill]] %s12098_s1  ;;  %30 = vst [vmem:[#allocation2] sm:$0x1] %v29_v0 }
   0x3   :  { %12133 = sst [smem:[#allocation5_spill]] %s12099_s2 }
   0x4   :  { %12134 = sst [smem:[#allocation6_spill]] %s12100_s3 }
   0x5   :  { %12135 = sst [smem:[#allocation7_spill]] %s12101_s4 }
   0x6   :  { %12136 = sst [smem:[#allocation8_spill]] %s12102_s5 }
   0x7   :  { %12137 = sst [smem:[#allocation9_spill]] %s12103_s6 }
   0x8   :  { %12138 = sst [smem:[#allocation10_spill]] %s12104_s7 }
   0x9   :  { %12139 = sst [smem:[#allocation11_spill]] %s12105_s8 }
   0xa LB: > { %s5707_s28 = sadd.s32 4294967295, %s8115_s27   ;;  %p5711_p0 = scmp.ge.s32.totalorder %s8115_s27, 1  ;;  %s8115_s27 = sphi %s8246_s27, %s36_s27  }
   0xb   : > { %p664_p1 = scmp.lt.s32.totalorder %s8115_s27, 3 }
   0xd   : > { %p665_p2 = pnand %p5711_p0, %p664_p1 }
   0xe   : > { %p728_p3 = scmp.lt.s32.totalorder (!%p665_p2), %s5707_s28, 1  ;;  %v8117_v1 = vmov (!%p665_p2), 0.0   ;;  %s12140_s29 = sld [smem:[#allocation3_spill]] (!%p665_p2)  ;;  %vm756_vm0 = vcmask (!%p665_p2), 523264   ;;  %vm1829_vm1 = vcmask (!%p665_p2), 261120   ;;  %vm2965_vm2 = vcmask (!%p665_p2), 130048  }
   0xf   : > { %668 = sbr.rel (%p665_p2) target bundleno = 4392 (0x1128), region = 116  ;;  %833 = vmatprep.mubr.f32.mxu0 (!%p665_p2), %v8117_v1  ;;  %1344 = vmatprep.mubr.f32.mxu1 (!%p665_p2), %v8117_v1  ;;  %s12141_s3 = sld [smem:[#allocation4_spill]] (!%p665_p2)  ;;  %vm4386_vm3 = vcmask (!%p665_p2), 64512   ;;  %vm5236_vm4 = vcmask (!%p665_p2), 1043456   ;;  %vm5658_vm5 = vcmask (!%p665_p2), 0  }
  0x10   : > { %s12142_s30 = sld [smem:[#allocation5_spill]] (!%p665_p2)  ;;  %s12143_s2 = sld [smem:[#allocation6_spill]] (!%p665_p2) }
  0x11   : > { %s12144_s7 = sld [smem:[#allocation7_spill]] (!%p665_p2)  ;;  %s12145_s4 = sld [smem:[#allocation8_spill]] (!%p665_p2) }
  0x12   : > { %s12146_s26 = sld [smem:[#allocation9_spill]] (!%p665_p2)  ;;  %s12147_s1 = sld [smem:[#allocation10_spill]] (!%p665_p2) }
  0x13   : > { %s12148_s8 = sld [smem:[#allocation11_spill]] (!%p665_p2) }
  0x15   : > { %v752_v26 = vld [vmem:[%s12141_s3] sm:$0xff] (!%p665_p2)  ;;  %v753_v28 = vld [vmem:[%s12141_s3 + $0x8] sm:$0xff] (!%p665_p2)  ;;  %v754_v30 = vld [vmem:[%s12141_s3 + $0x10] sm:$0xff] (!%p665_p2) }
  0x16   : > { %s12150_s28 = smov (!%p728_p3, %s5707_s28), 1  ;;  %v5782_v27 = vld [vmem:[%s12141_s3 + $0x40] sm:$0xff]  ;;  %v5783_v29 = vld [vmem:[%s12141_s3 + $0x48] sm:$0xff]  ;;  %v5784_v31 = vld [vmem:[%s12141_s3 + $0x50] sm:$0xff] }
  0x17   : > { %s6514_s23 = sshll.u32 %s12150_s28, 7  ;;  %v5727_v32 = vld [vmem:[%s12142_s30 + $0x188] sm:$0xff]  ;;  %v5729_v33 = vld [vmem:[%s12142_s30 + $0x198] sm:$0xff]  ;;  %v5726_v37 = vld [vmem:[%s12142_s30 + $0x180] sm:$0xff]  ;;  %s735_s6 = scalar_lea.vmem %s12121_s24, %s12150_s28 }
  0x18   : > { %s8262_s0 = scalar_lea.vmem %s12140_s29, %s6514_s23  ;;  %v755_v34 = vld [vmem:[%s12141_s3 + $0x18] sm:$0xff]  ;;  %v6757_v36 = vpack.c.bf16 %v5729_v33, %v5727_v32  ;;  %v5728_v38 = vld [vmem:[%s12142_s30 + $0x190] sm:$0xff]  ;;  %v5731_v39 = vld [vmem:[%s12142_s30 + $0x1a8] sm:$0xff] }
  0x19   : > { %v737_v2 = vld [vmem:[%s8262_s0 + $0x8] sm:$0xff]  ;;  %v739_v3 = vld [vmem:[%s8262_s0 + $0x18] sm:$0xff]  ;;  %v736_v4 = vld [vmem:[%s8262_s0] sm:$0xff]  ;;  %v6759_v43 = vpack.c.bf16 %v5728_v38, %v5726_v37 }
  0x1a   : > { %v6725_v5 = vpack.c.bf16 %v739_v3, %v737_v2  ;;  %v738_v6 = vld [vmem:[%s8262_s0 + $0x10] sm:$0xff]  ;;  %v741_v7 = vld [vmem:[%s8262_s0 + $0x28] sm:$0xff]  ;;  %v743_v8 = vld [vmem:[%s8262_s0 + $0x38] sm:$0xff] }
  0x1b   : > { %v6727_v9 = vpack.c.bf16 %v738_v6, %v736_v4  ;;  %v6729_v10 = vpack.c.bf16 %v743_v8, %v741_v7  ;;  %v740_v11 = vld [vmem:[%s8262_s0 + $0x20] sm:$0xff]  ;;  %v742_v12 = vld [vmem:[%s8262_s0 + $0x30] sm:$0xff]  ;;  %v745_v13 = vld [vmem:[%s8262_s0 + $0x48] sm:$0xff] }
  0x1c   : > { %6726 = vmatprep.subr.bf16.mxu0 %v6725_v5  ;;  %v747_v14 = vld [vmem:[%s8262_s0 + $0x58] sm:$0xff]  ;;  %6854 = vmatprep.subr.bf16.mxu1 %v6725_v5  ;;  %v6731_v15 = vpack.c.bf16 %v742_v12, %v740_v11  ;;  %v744_v17 = vld [vmem:[%s8262_s0 + $0x40] sm:$0xff]  ;;  %v746_v18 = vld [vmem:[%s8262_s0 + $0x50] sm:$0xff] }
  0x1d   : > { %6728 = vmatpush1.bf16.msra.mxu0 %v6727_v9  ;;  %6856 = vmatpush1.bf16.msra.mxu1 %v6727_v9  ;;  %v6733_v16 = vpack.c.bf16 %v747_v14, %v745_v13  ;;  %v749_v19 = vld [vmem:[%s8262_s0 + $0x68] sm:$0xff]  ;;  %v751_v20 = vld [vmem:[%s8262_s0 + $0x78] sm:$0xff]  ;;  %v6735_v21 = vpack.c.bf16 %v746_v18, %v744_v17  ;;  %v748_v23 = vld [vmem:[%s8262_s0 + $0x60] sm:$0xff] }
  0x1e   : > { %6730 = vmatprep.subr.bf16.mxu0 %v6729_v10  ;;  %6858 = vmatprep.subr.bf16.mxu1 %v6729_v10  ;;  %v6737_v22 = vpack.c.bf16 %v751_v20, %v749_v19  ;;  %v750_v24 = vld [vmem:[%s8262_s0 + $0x70] sm:$0xff]  ;;  %v5785_v35 = vld [vmem:[%s12141_s3 + $0x58] sm:$0xff]  ;;  %v5718_v41 = vld [vmem:[%s12141_s3 + $0x20] sm:$0xff] }
  0x1f   : > { %v6739_v25 = vpack.c.bf16 %v750_v24, %v748_v23  ;;  %v5733_v40 = vld [vmem:[%s12142_s30 + $0x1b8] sm:$0xff]  ;;  %v5842_v42 = vld [vmem:[%s12141_s3 + $0x60] sm:$0xff]  ;;  %v5732_v46 = vld [vmem:[%s12142_s30 + $0x1b0] sm:$0xff] }
  0x20   : > { %v6761_v44 = vpack.c.bf16 %v5733_v40, %v5731_v39  ;;  %v5730_v45 = vld [vmem:[%s12142_s30 + $0x1a0] sm:$0xff]  ;;  %v5735_v47 = vld [vmem:[%s12142_s30 + $0x1c8] sm:$0xff]  ;;  %v5737_v48 = vld [vmem:[%s12142_s30 + $0x1d8] sm:$0xff] }
  0x21   : > { %6732 = vmatpush1.bf16.msra.mxu0 %v6731_v15  ;;  %6860 = vmatpush1.bf16.msra.mxu1 %v6731_v15  ;;  %v5719_v49 = vld [vmem:[%s12141_s3 + $0x28] sm:$0xff]  ;;  %v6763_v51 = vpack.c.bf16 %v5732_v46, %v5730_v45  ;;  %v6765_v52 = vpack.c.bf16 %v5737_v48, %v5735_v47  ;;  %v5734_v53 = vld [vmem:[%s12142_s30 + $0x1c0] sm:$0xff]  ;;  %v5736_v54 = vld [vmem:[%s12142_s30 + $0x1d0] sm:$0xff] }
  0x22   : > { %6734 = vmatprep.subr.bf16.mxu0 %v6733_v16  ;;  %6862 = vmatprep.subr.bf16.mxu1 %v6733_v16  ;;  %v5843_v50 = vld [vmem:[%s12141_s3 + $0x68] sm:$0xff]  ;;  %v5741_v56 = vld [vmem:[%s12142_s30 + $0x1f8] sm:$0xff]  ;;  %v5720_v57 = vld [vmem:[%s12141_s3 + $0x30] sm:$0xff]  ;;  %v6767_v59 = vpack.c.bf16 %v5736_v54, %v5734_v53 }
  0x23   : > { %v5739_v55 = vld [vmem:[%s12142_s30 + $0x1e8] sm:$0xff]  ;;  %v5844_v58 = vld [vmem:[%s12141_s3 + $0x70] sm:$0xff]  ;;  %v5738_v61 = vld [vmem:[%s12142_s30 + $0x1e0] sm:$0xff] }
  0x24   : > { %v6769_v60 = vpack.c.bf16 %v5741_v56, %v5739_v55  ;;  %v5740_v62 = vld [vmem:[%s12142_s30 + $0x1f0] sm:$0xff]  ;;  %v5743_v63 = vld [vmem:[%s12142_s30 + $0x208] sm:$0xff]  ;;  %v5745_v0 = vld [vmem:[%s12142_s30 + $0x218] sm:$0xff] }
  0x25   : > { %6736 = vmatpush1.bf16.msra.mxu0 %v6735_v21  ;;  %6864 = vmatpush1.bf16.msra.mxu1 %v6735_v21  ;;  %v5721_v2 = vld [vmem:[%s12141_s3 + $0x38] sm:$0xff]  ;;  %v6771_v4 = vpack.c.bf16 %v5740_v62, %v5738_v61  ;;  %v5742_v6 = vld [vmem:[%s12142_s30 + $0x200] sm:$0xff]  ;;  %v5744_v7 = vld [vmem:[%s12142_s30 + $0x210] sm:$0xff] }
  0x26   : > { %6738 = vmatprep.subr.bf16.mxu0 %v6737_v22  ;;  %6866 = vmatprep.subr.bf16.mxu1 %v6737_v22  ;;  %v5845_v3 = vld [vmem:[%s12141_s3 + $0x78] sm:$0xff]  ;;  %v5747_v8 = vld [vmem:[%s12142_s30 + $0x228] sm:$0xff]  ;;  %v5746_v12 = vld [vmem:[%s12142_s30 + $0x220] sm:$0xff] }
  0x27   : > { %v5748_v13 = vld [vmem:[%s12142_s30 + $0x230] sm:$0xff]  ;;  %v5751_v14 = vld [vmem:[%s12142_s30 + $0x248] sm:$0xff]  ;;  %v5750_v18 = vld [vmem:[%s12142_s30 + $0x240] sm:$0xff] }
  0x28   : > { %v5752_v19 = vld [vmem:[%s12142_s30 + $0x250] sm:$0xff]  ;;  %v5755_v20 = vld [vmem:[%s12142_s30 + $0x268] sm:$0xff]  ;;  %v5754_v24 = vld [vmem:[%s12142_s30 + $0x260] sm:$0xff] }
  0x29   : > { %6740 = vmatpush1.bf16.msra.mxu0 %v6739_v25  ;;  %6868 = vmatpush1.bf16.msra.mxu1 %v6739_v25  ;;  %v5763_v33 = vld [vmem:[%s12142_s30 + $0x2a8] sm:$0xff]  ;;  %v5764_v37 = vld [vmem:[%s12142_s30 + $0x2b0] sm:$0xff]  ;;  %v5769_v40 = vld [vmem:[%s12142_s30 + $0x2d8] sm:$0xff] }
  0x2a   : > { %6742 = vmatprep.subr.bf16.mxu0 %v6725_v5  ;;  %6918 = vmatprep.subr.bf16.mxu1 %v6725_v5  ;;  %v6773_v5 = vpack.c.bf16 %v5745_v0, %v5743_v63  ;;  %v5767_v39 = vld [vmem:[%s12142_s30 + $0x2c8] sm:$0xff]  ;;  %v5773_v46 = vld [vmem:[%s12142_s30 + $0x2f8] sm:$0xff]  ;;  %v5770_v48 = vld [vmem:[%s12142_s30 + $0x2e0] sm:$0xff] }
  0x2b   : > { %v5771_v45 = vld [vmem:[%s12142_s30 + $0x2e8] sm:$0xff]  ;;  %v858_v0 = vld [vmem:[%s12142_s30] sm:$0xff] }
  0x2c   : > { %5714 = vmatmul.mubr.msk.f32.vlgmr.msra.gmra.mrb[0].mxu0 %vm756_vm0, %v752_v26  ;;  %5786 = vmatmul.mubr.msk.f32.vlgmr.msra.gmra.mrb[0].mxu1 %vm756_vm0, %v5782_v27  ;;  %v5759_v27 = vld [vmem:[%s12142_s30 + $0x288] sm:$0xff]  ;;  %v6801_v47 = vpack.c.bf16 %v5773_v46, %v5771_v45 }
  0x2d   : > { %6744 = vmatpush1.bf16.msra.mxu0 %v6727_v9  ;;  %839 = vmatprep.mubr.f32.mxu0 %v8117_v1 }
  0x2e   : > { %6746 = vmatprep.subr.bf16.mxu0 %v6729_v10  ;;  %6920 = vmatpush1.bf16.msra.mxu1 %v6727_v9  ;;  %v5749_v9 = vld [vmem:[%s12142_s30 + $0x238] sm:$0xff] }
  0x2f   : > { %1350 = vmatprep.mubr.f32.mxu1 %v8117_v1  ;;  %6922 = vmatprep.subr.bf16.mxu1 %v6729_v10  ;;  %v6775_v10 = vpack.c.bf16 %v5744_v7, %v5742_v6  ;;  %v6777_v11 = vpack.c.bf16 %v5749_v9, %v5747_v8 }
  0x30   : > { %5715 = vmatmul.mubr.msk.f32.gmra.mrb[2].mxu0 %vm756_vm0, %v753_v28  ;;  %5787 = vmatmul.mubr.msk.f32.gmra.mrb[2].mxu1 %vm756_vm0, %v5783_v29  ;;  %v5761_v28 = vld [vmem:[%s12142_s30 + $0x298] sm:$0xff] }
  0x31   : > { %6748 = vmatpush1.bf16.msra.mxu0 %v6731_v15  ;;  %845 = vmatprep.mubr.f32.mxu0 %v8117_v1  ;;  %v6789_v29 = vpack.c.bf16 %v5761_v28, %v5759_v27 }
  0x32   : > { %6750 = vmatprep.subr.bf16.mxu0 %v6733_v16  ;;  %6924 = vmatpush1.bf16.msra.mxu1 %v6731_v15  ;;  %v5753_v15 = vld [vmem:[%s12142_s30 + $0x258] sm:$0xff] }
  0x33   : > { %1356 = vmatprep.mubr.f32.mxu1 %v8117_v1  ;;  %6926 = vmatprep.subr.bf16.mxu1 %v6733_v16  ;;  %v6779_v16 = vpack.c.bf16 %v5748_v13, %v5746_v12  ;;  %v6781_v17 = vpack.c.bf16 %v5753_v15, %v5751_v14  ;;  %v867_v13 = vld [vmem:[%s12142_s30 + $0x48] sm:$0xff]  ;;  %v869_v14 = vld [vmem:[%s12142_s30 + $0x58] sm:$0xff] }
  0x34   : > { %5716 = vmatmul.mubr.msk.f32.gmra.mrb[4].mxu0 %vm756_vm0, %v754_v30  ;;  %5788 = vmatmul.mubr.msk.f32.gmra.mrb[4].mxu1 %vm756_vm0, %v5784_v31  ;;  %v5758_v30 = vld [vmem:[%s12142_s30 + $0x280] sm:$0xff]  ;;  %v5760_v31 = vld [vmem:[%s12142_s30 + $0x290] sm:$0xff] }
  0x35   : > { %6752 = vmatpush1.bf16.msra.mxu0 %v6735_v21  ;;  %851 = vmatprep.mubr.f32.mxu0 %v8117_v1  ;;  %v6791_v32 = vpack.c.bf16 %v5760_v31, %v5758_v30  ;;  %v870_v30 = vld [vmem:[%s12142_s30 + $0x60] sm:$0xff]  ;;  %v872_v31 = vld [vmem:[%s12142_s30 + $0x70] sm:$0xff] }
  0x36   : > { %6754 = vmatprep.subr.bf16.mxu0 %v6737_v22  ;;  %6928 = vmatpush1.bf16.msra.mxu1 %v6735_v21  ;;  %v5757_v21 = vld [vmem:[%s12142_s30 + $0x278] sm:$0xff] }
  0x37   : > { %1362 = vmatprep.mubr.f32.mxu1 %v8117_v1  ;;  %6930 = vmatprep.subr.bf16.mxu1 %v6737_v22  ;;  %v6783_v22 = vpack.c.bf16 %v5752_v19, %v5750_v18  ;;  %v6785_v23 = vpack.c.bf16 %v5757_v21, %v5755_v20  ;;  %v6813_v19 = vpack.c.bf16 %v869_v14, %v867_v13  ;;  %v866_v20 = vld [vmem:[%s12142_s30 + $0x40] sm:$0xff]  ;;  %v868_v21 = vld [vmem:[%s12142_s30 + $0x50] sm:$0xff]  ;;  %v891_v14 = vld [vmem:[%s12142_s30 + $0x108] sm:$0xff] }
  0x38   : > { %5717 = vmatmul.mubr.msk.f32.gmra.mrb[6].mxu0 %vm756_vm0, %v755_v34  ;;  %5789 = vmatmul.mubr.msk.f32.gmra.mrb[6].mxu1 %vm756_vm0, %v5785_v35  ;;  %v5765_v34 = vld [vmem:[%s12142_s30 + $0x2b8] sm:$0xff]  ;;  %v888_v13 = vld [vmem:[%s12142_s30 + $0xf0] sm:$0xff] }
  0x39   : > { %6756 = vmatpush1.bf16.msra.mxu0 %v6739_v25  ;;  %987 = vmatprep.mubr.f32.mxu0 %v8117_v1  ;;  %v6793_v35 = vpack.c.bf16 %v5765_v34, %v5763_v33  ;;  %v875_v33 = vld [vmem:[%s12142_s30 + $0x88] sm:$0xff]  ;;  %v877_v34 = vld [vmem:[%s12142_s30 + $0x98] sm:$0xff] }
  0x3a   : > { %6932 = vmatpush1.bf16.msra.mxu1 %v6739_v25  ;;  %1608 = vmatprep.mubr.f32.mxu1 %v8117_v1  ;;  %v5756_v25 = vld [vmem:[%s12142_s30 + $0x270] sm:$0xff] }
  0x3b   : > { %6758 = vmatprep.subr.bf16.mxu0 %v6757_v36  ;;  %v6787_v26 = vpack.c.bf16 %v5756_v25, %v5754_v24  ;;  %v5762_v36 = vld [vmem:[%s12142_s30 + $0x2a0] sm:$0xff]  ;;  %v873_v24 = vld [vmem:[%s12142_s30 + $0x78] sm:$0xff] }
  0x3c   : > { %5722 = vmatmul.mubr.msk.f32.vlgmr.msra.gmra.mrb[8].mxu0 %vm756_vm0, %v5718_v41  ;;  %v6795_v38 = vpack.c.bf16 %v5764_v37, %v5762_v36  ;;  %v6797_v41 = vpack.c.bf16 %v5769_v40, %v5767_v39  ;;  %v6819_v36 = vpack.c.bf16 %v872_v31, %v870_v30  ;;  %v6821_v39 = vpack.c.bf16 %v877_v34, %v875_v33  ;;  %v874_v40 = vld [vmem:[%s12142_s30 + $0x80] sm:$0xff]  ;;  %v899_v30 = vld [vmem:[%s12142_s30 + $0x148] sm:$0xff]  ;;  %v901_v31 = vld [vmem:[%s12142_s30 + $0x158] sm:$0xff] }
  0x3d   : > { %993 = vmatprep.mubr.f32.mxu0 %v8117_v1  ;;  %5846 = vmatmul.mubr.msk.f32.vlgmr.msra.gmra.mrb[8].mxu1 %vm756_vm0, %v5842_v42  ;;  %v5766_v42 = vld [vmem:[%s12142_s30 + $0x2c0] sm:$0xff]  ;;  %v6845_v34 = vpack.c.bf16 %v901_v31, %v899_v30  ;;  %v5812_v31 = vld [vmem:[%s12142_s30 + $0x3b0] sm:$0xff] }
  0x3e   : > { %1614 = vmatprep.mubr.f32.mxu1 %v8117_v1  ;;  %6760 = vmatpush1.bf16.msra.mxu0 %v6759_v43  ;;  %v5768_v43 = vld [vmem:[%s12142_s30 + $0x2d0] sm:$0xff]  ;;  %v5810_v30 = vld [vmem:[%s12142_s30 + $0x3a0] sm:$0xff] }
  0x3f   : > { %6762 = vmatprep.subr.bf16.mxu0 %v6761_v44  ;;  %v6799_v44 = vpack.c.bf16 %v5768_v43, %v5766_v42  ;;  %v879_v43 = vld [vmem:[%s12142_s30 + $0xa8] sm:$0xff] }
  0x40   : > { %5723 = vmatmul.mubr.msk.f32.gmra.mrb[10].mxu0 %vm756_vm0, %v5719_v49  ;;  %v5772_v49 = vld [vmem:[%s12142_s30 + $0x2f0] sm:$0xff] }
  0x41   : > { %999 = vmatprep.mubr.f32.mxu0 %v8117_v1  ;;  %5847 = vmatmul.mubr.msk.f32.gmra.mrb[10].mxu1 %vm756_vm0, %v5843_v50  ;;  %v6803_v50 = vpack.c.bf16 %v5772_v49, %v5770_v48  ;;  %v878_v48 = vld [vmem:[%s12142_s30 + $0xa0] sm:$0xff]  ;;  %v880_v49 = vld [vmem:[%s12142_s30 + $0xb0] sm:$0xff] }
  0x42   : > { %1620 = vmatprep.mubr.f32.mxu1 %v8117_v1  ;;  %6764 = vmatpush1.bf16.msra.mxu0 %v6763_v51  ;;  %v859_v51 = vld [vmem:[%s12142_s30 + $0x8] sm:$0xff] }
  0x43   : > { %6766 = vmatprep.subr.bf16.mxu0 %v6765_v52  ;;  %v861_v52 = vld [vmem:[%s12142_s30 + $0x18] sm:$0xff] }
  0x44   : > { %5724 = vmatmul.mubr.msk.f32.gmra.mrb[12].mxu0 %vm756_vm0, %v5720_v57  ;;  %v6805_v53 = vpack.c.bf16 %v861_v52, %v859_v51  ;;  %v885_v51 = vld [vmem:[%s12142_s30 + $0xd8] sm:$0xff] }
  0x45   : > { %1005 = vmatprep.mubr.f32.mxu0 %v8117_v1  ;;  %5848 = vmatmul.mubr.msk.f32.gmra.mrb[12].mxu1 %vm756_vm0, %v5844_v58 }
  0x46   : > { %1626 = vmatprep.mubr.f32.mxu1 %v8117_v1  ;;  %6768 = vmatpush1.bf16.msra.mxu0 %v6767_v59 }
  0x47   : > { %6770 = vmatprep.subr.bf16.mxu0 %v6769_v60 }
  0x48   : > { %5725 = vmatmul.mubr.msk.f32.gmra.mrb[14].mxu0 %vm756_vm0, %v5721_v2  ;;  %v860_v2 = vld [vmem:[%s12142_s30 + $0x10] sm:$0xff] }
  0x49   : > { %5849 = vmatmul.mubr.msk.f32.gmra.mrb[14].mxu1 %vm756_vm0, %v5845_v3  ;;  %v863_v3 = vld [vmem:[%s12142_s30 + $0x28] sm:$0xff]  ;;  %v6807_v6 = vpack.c.bf16 %v860_v2, %v858_v0  ;;  %v882_v2 = vld [vmem:[%s12142_s30 + $0xc0] sm:$0xff] }
  0x4a   : > { %6772 = vmatpush1.bf16.msra.mxu0 %v6771_v4  ;;  %1900 = vmatprep.mubr.f32.mxu1 %v8117_v1  ;;  %v865_v4 = vld [vmem:[%s12142_s30 + $0x38] sm:$0xff] }
  0x4b   : > { %6774 = vmatprep.subr.bf16.mxu0 %v6773_v5  ;;  %v6809_v9 = vpack.c.bf16 %v865_v4, %v863_v3  ;;  %v884_v3 = vld [vmem:[%s12142_s30 + $0xd0] sm:$0xff]  ;;  %v887_v4 = vld [vmem:[%s12142_s30 + $0xe8] sm:$0xff] }
  0x4e   : > { %6776 = vmatpush1.bf16.msra.mxu0 %v6775_v10  ;;  %v862_v10 = vld [vmem:[%s12142_s30 + $0x20] sm:$0xff] }
  0x4f   : > { %6778 = vmatprep.subr.bf16.mxu0 %v6777_v11  ;;  %v864_v11 = vld [vmem:[%s12142_s30 + $0x30] sm:$0xff] }
  0x52   : > { %6780 = vmatpush1.bf16.msra.mxu0 %v6779_v16  ;;  %v6811_v16 = vpack.c.bf16 %v864_v11, %v862_v10  ;;  %v886_v11 = vld [vmem:[%s12142_s30 + $0xe0] sm:$0xff] }
  0x53   : > { %6782 = vmatprep.subr.bf16.mxu0 %v6781_v17 }
  0x56   : > { %6784 = vmatpush1.bf16.msra.mxu0 %v6783_v22 }
  0x57   : > { %6786 = vmatprep.subr.bf16.mxu0 %v6785_v23  ;;  %v871_v23 = vld [vmem:[%s12142_s30 + $0x68] sm:$0xff] }
  0x5a   : > { %6788 = vmatpush1.bf16.msra.mxu0 %v6787_v26  ;;  %v6815_v26 = vpack.c.bf16 %v868_v21, %v866_v20  ;;  %v890_v20 = vld [vmem:[%s12142_s30 + $0x100] sm:$0xff]  ;;  %v892_v21 = vld [vmem:[%s12142_s30 + $0x110] sm:$0xff] }
  0x5b   : > { %6790 = vmatprep.subr.bf16.mxu0 %v6789_v29  ;;  %v6817_v29 = vpack.c.bf16 %v873_v24, %v871_v23  ;;  %v895_v23 = vld [vmem:[%s12142_s30 + $0x128] sm:$0xff]  ;;  %v897_v24 = vld [vmem:[%s12142_s30 + $0x138] sm:$0xff] }
  0x5e   : > { %6792 = vmatpush1.bf16.msra.mxu0 %v6791_v32 }
  0x5f   : > { %6794 = vmatprep.subr.bf16.mxu0 %v6793_v35 }
  0x62   : > { %6796 = vmatpush1.bf16.msra.mxu0 %v6795_v38 }
  0x63   : > { %6798 = vmatprep.subr.bf16.mxu0 %v6797_v41  ;;  %v876_v41 = vld [vmem:[%s12142_s30 + $0x90] sm:$0xff] }
  0x64   : > { %v6823_v45 = vpack.c.bf16 %v876_v41, %v874_v40 }
  0x66   : > { %6800 = vmatpush1.bf16.msra.mxu0 %v6799_v44  ;;  %v881_v44 = vld [vmem:[%s12142_s30 + $0xb8] sm:$0xff] }
  0x67   : > { %6802 = vmatprep.subr.bf16.mxu0 %v6801_v47  ;;  %v6825_v47 = vpack.c.bf16 %v881_v44, %v879_v43  ;;  %v902_v43 = vld [vmem:[%s12142_s30 + $0x160] sm:$0xff]  ;;  %v904_v44 = vld [vmem:[%s12142_s30 + $0x170] sm:$0xff] }
  0x6a   : > { %6804 = vmatpush1.bf16.msra.mxu0 %v6803_v50  ;;  %v883_v50 = vld [vmem:[%s12142_s30 + $0xc8] sm:$0xff] }
  0x6b   : > { %6806 = vmatprep.subr.bf16.mxu0 %v6805_v53  ;;  %v6827_v53 = vpack.c.bf16 %v880_v49, %v878_v48  ;;  %v6829_v0 = vpack.c.bf16 %v885_v51, %v883_v50  ;;  %v6851_v48 = vpack.c.bf16 %v904_v44, %v902_v43  ;;  %v5790_v50 = vld [vmem:[%s12142_s30 + $0x300] sm:$0xff]  ;;  %v5792_v51 = vld [vmem:[%s12142_s30 + $0x310] sm:$0xff] }
  0x6c   : > { %v5818_v43 = vld [vmem:[%s12142_s30 + $0x3e0] sm:$0xff]  ;;  %v5820_v44 = vld [vmem:[%s12142_s30 + $0x3f0] sm:$0xff] }
  0xff   : > { %v8509_v54 = vpop.f32.mrb[0].mxu0  ;;  %v8511_v55 = vpop.f32.mrb[0].mxu1 }
 0x100   : > { %v8513_v56 = vpop.f32.mrb[1].mxu0  ;;  %v8515_v57 = vpop.f32.mrb[1].mxu1 }
 0x103   : > { %v8517_v58 = vpop.f32.mrb[2].mxu0  ;;  %v8541_v7 = vpop.f32.mrb[2].mxu1 }
 0x104   : > { %v8519_v59 = vpop.f32.mrb[3].mxu0  ;;  %v8549_v12 = vpop.f32.mrb[3].mxu1 }
 0x107   : > { %v8521_v60 = vpop.f32.mrb[4].mxu0  ;;  %v8558_v17 = vpop.f32.mrb[4].mxu1 }
 0x108   : > { %v8523_v61 = vpop.f32.mrb[5].mxu0  ;;  %v8566_v22 = vpop.f32.mrb[5].mxu1 }
 0x10b   : > { %v8525_v62 = vpop.f32.mrb[6].mxu0  ;;  %v8575_v27 = vpop.f32.mrb[6].mxu1 }
 0x10c   : > { %v8527_v63 = vpop.f32.mrb[7].mxu0  ;;  %v8583_v32 = vpop.f32.mrb[7].mxu1 }
 0x10f   : > { %v989_v5 = vpop.f32.mrb[8].mxu0 }
 0x110   : > { %v991_v8 = vpop.f32.mrb[9].mxu0  ;;  %v8592_v37 = vpop.f32.mrb[8].mxu1 }
 0x111   : > { %5774 = vmatprep.mubr.msk.f32.mxu0 %vm756_vm0, %v991_v8  ;;  %v8600_v42 = vpop.f32.mrb[9].mxu1  ;;  %v6831_v8 = vpack.c.bf16 %v884_v3, %v882_v2  ;;  %v6871_v2 = vpack.c.bf16 %v5792_v51, %v5790_v50  ;;  %v5822_v50 = vld [vmem:[%s12142_s30 + $0x400] sm:$0xff]  ;;  %v5824_v51 = vld [vmem:[%s12142_s30 + $0x410] sm:$0xff] }
 0x112   : > { %1138 = vmatmul.mubr.f32.vlgmr.msra.gmra.mrb[16].mxu0 %v989_v5  ;;  %v889_v5 = vld [vmem:[%s12142_s30 + $0xf8] sm:$0xff] }
 0x113   : > { %6808 = vmatpush1.bf16.msra.mxu0 %v6807_v6  ;;  %v995_v15 = vpop.f32.mrb[10].mxu0  ;;  %v6833_v10 = vpack.c.bf16 %v889_v5, %v887_v4  ;;  %v5794_v4 = vld [vmem:[%s12142_s30 + $0x320] sm:$0xff]  ;;  %v5796_v5 = vld [vmem:[%s12142_s30 + $0x330] sm:$0xff] }
 0x114   : > { %v997_v18 = vpop.f32.mrb[11].mxu0  ;;  %6810 = vmatprep.subr.bf16.mxu0 %v6809_v9  ;;  %v8611_v46 = vpop.f32.mrb[10].mxu1 }
 0x115   : > { %5775 = vmatprep.mubr.msk.f32.mxu0 %vm756_vm0, %v997_v18  ;;  %v8625_v52 = vpop.f32.mrb[11].mxu1  ;;  %v6835_v18 = vpack.c.bf16 %v888_v13, %v886_v11  ;;  %v6875_v11 = vpack.c.bf16 %v5796_v5, %v5794_v4  ;;  %v5826_v4 = vld [vmem:[%s12142_s30 + $0x420] sm:$0xff]  ;;  %v5828_v5 = vld [vmem:[%s12142_s30 + $0x430] sm:$0xff] }
 0x116   : > { %1144 = vmatmul.mubr.f32.gmra.mrb[18].mxu0 %v995_v15  ;;  %v893_v15 = vld [vmem:[%s12142_s30 + $0x118] sm:$0xff] }
 0x117   : > { %6812 = vmatpush1.bf16.msra.mxu0 %v6811_v16  ;;  %v1001_v25 = vpop.f32.mrb[12].mxu0 }
 0x118   : > { %v1003_v28 = vpop.f32.mrb[13].mxu0  ;;  %6814 = vmatprep.subr.bf16.mxu0 %v6813_v19  ;;  %v6837_v19 = vpack.c.bf16 %v893_v15, %v891_v14  ;;  %v5798_v14 = vld [vmem:[%s12142_s30 + $0x340] sm:$0xff]  ;;  %v5800_v15 = vld [vmem:[%s12142_s30 + $0x350] sm:$0xff] }
 0x119   : > { %5776 = vmatprep.mubr.msk.f32.mxu0 %vm756_vm0, %v1003_v28  ;;  %v894_v28 = vld [vmem:[%s12142_s30 + $0x120] sm:$0xff] }
 0x11a   : > { %1150 = vmatmul.mubr.f32.gmra.mrb[20].mxu0 %v1001_v25  ;;  %v6839_v25 = vpack.c.bf16 %v892_v21, %v890_v20  ;;  %v5802_v20 = vld [vmem:[%s12142_s30 + $0x360] sm:$0xff]  ;;  %v5804_v21 = vld [vmem:[%s12142_s30 + $0x370] sm:$0xff] }
 0x11b   : > { %6816 = vmatpush1.bf16.msra.mxu0 %v6815_v26  ;;  %v1007_v35 = vpop.f32.mrb[14].mxu0  ;;  %v6841_v26 = vpack.c.bf16 %v897_v24, %v895_v23  ;;  %v5807_v23 = vld [vmem:[%s12142_s30 + $0x388] sm:$0xff] }
 0x11c   : > { %v1009_v38 = vpop.f32.mrb[15].mxu0  ;;  %6818 = vmatprep.subr.bf16.mxu0 %v6817_v29  ;;  %v896_v29 = vld [vmem:[%s12142_s30 + $0x130] sm:$0xff] }
 0x11d   : > { %5777 = vmatprep.mubr.msk.f32.mxu0 %vm756_vm0, %v1009_v38  ;;  %v6843_v33 = vpack.c.bf16 %v896_v29, %v894_v28  ;;  %v903_v38 = vld [vmem:[%s12142_s30 + $0x168] sm:$0xff] }
 0x11e   : > { %1156 = vmatmul.mubr.f32.gmra.mrb[22].mxu0 %v1007_v35  ;;  %v898_v35 = vld [vmem:[%s12142_s30 + $0x140] sm:$0xff]  ;;  %v5811_v28 = vld [vmem:[%s12142_s30 + $0x3a8] sm:$0xff] }
 0x11f   : > { %6820 = vmatpush1.bf16.msra.mxu0 %v6819_v36  ;;  %5778 = vmatprep.mubr.msk.f32.mxu0 %vm756_vm0, %v8513_v56  ;;  %v8627_v56 = vpop.f32.mrb[12].mxu1  ;;  %v900_v36 = vld [vmem:[%s12142_s30 + $0x150] sm:$0xff] }
 0x120   : > { %6822 = vmatprep.subr.bf16.mxu0 %v6821_v39  ;;  %v8641_v6 = vpop.f32.mrb[13].mxu1  ;;  %v905_v39 = vld [vmem:[%s12142_s30 + $0x178] sm:$0xff]  ;;  %v6847_v40 = vpack.c.bf16 %v900_v36, %v898_v35  ;;  %v5814_v35 = vld [vmem:[%s12142_s30 + $0x3c0] sm:$0xff]  ;;  %v5816_v36 = vld [vmem:[%s12142_s30 + $0x3d0] sm:$0xff] }
 0x121   : > { %v8643_v9 = vpop.f32.mrb[14].mxu1  ;;  %v6849_v41 = vpack.c.bf16 %v905_v39, %v903_v38  ;;  %v5819_v38 = vld [vmem:[%s12142_s30 + $0x3e8] sm:$0xff]  ;;  %v5821_v39 = vld [vmem:[%s12142_s30 + $0x3f8] sm:$0xff] }
 0x122   : > { %v8657_v16 = vpop.f32.mrb[15].mxu1 }
 0x123   : > { %6824 = vmatpush1.bf16.msra.mxu0 %v6823_v45  ;;  %v5791_v45 = vld [vmem:[%s12142_s30 + $0x308] sm:$0xff] }
 0x124   : > { %6826 = vmatprep.subr.bf16.mxu0 %v6825_v47  ;;  %v5793_v47 = vld [vmem:[%s12142_s30 + $0x318] sm:$0xff] }
 0x125   : > { %v6869_v49 = vpack.c.bf16 %v5793_v47, %v5791_v45  ;;  %v5823_v45 = vld [vmem:[%s12142_s30 + $0x408] sm:$0xff]  ;;  %v5825_v47 = vld [vmem:[%s12142_s30 + $0x418] sm:$0xff] }
 0x127   : > { %6828 = vmatpush1.bf16.msra.mxu0 %v6827_v53  ;;  %v5795_v53 = vld [vmem:[%s12142_s30 + $0x328] sm:$0xff] }
 0x128   : > { %6830 = vmatprep.subr.bf16.mxu0 %v6829_v0  ;;  %v5797_v0 = vld [vmem:[%s12142_s30 + $0x338] sm:$0xff] }
 0x129   : > { %v6873_v3 = vpack.c.bf16 %v5797_v0, %v5795_v53  ;;  %v5827_v53 = vld [vmem:[%s12142_s30 + $0x428] sm:$0xff]  ;;  %v5829_v0 = vld [vmem:[%s12142_s30 + $0x438] sm:$0xff] }
 0x12b   : > { %6832 = vmatpush1.bf16.msra.mxu0 %v6831_v8  ;;  %v5799_v8 = vld [vmem:[%s12142_s30 + $0x348] sm:$0xff] }
 0x12c   : > { %6834 = vmatprep.subr.bf16.mxu0 %v6833_v10  ;;  %v5801_v10 = vld [vmem:[%s12142_s30 + $0x358] sm:$0xff] }
 0x12d   : > { %v6877_v13 = vpack.c.bf16 %v5801_v10, %v5799_v8  ;;  %v5831_v8 = vld [vmem:[%s12142_s30 + $0x448] sm:$0xff]  ;;  %v5833_v10 = vld [vmem:[%s12142_s30 + $0x458] sm:$0xff] }
 0x12f   : > { %6836 = vmatpush1.bf16.msra.mxu0 %v6835_v18  ;;  %v5803_v18 = vld [vmem:[%s12142_s30 + $0x368] sm:$0xff] }
 0x130   : > { %6838 = vmatprep.subr.bf16.mxu0 %v6837_v19 }
 0x133   : > { %6840 = vmatpush1.bf16.msra.mxu0 %v6839_v25  ;;  %v5806_v25 = vld [vmem:[%s12142_s30 + $0x380] sm:$0xff] }
 0x134   : > { %6842 = vmatprep.subr.bf16.mxu0 %v6841_v26  ;;  %v5808_v26 = vld [vmem:[%s12142_s30 + $0x390] sm:$0xff] }
 0x137   : > { %6844 = vmatpush1.bf16.msra.mxu0 %v6843_v33  ;;  %v5815_v33 = vld [vmem:[%s12142_s30 + $0x3c8] sm:$0xff] }
 0x138   : > { %6846 = vmatprep.subr.bf16.mxu0 %v6845_v34 }
 0x13b   : > { %6848 = vmatpush1.bf16.msra.mxu0 %v6847_v40  ;;  %v6895_v40 = vpack.c.bf16 %v5816_v36, %v5814_v35  ;;  %v5858_v35 = vld [vmem:[%s12142_s30 + $0x4c0] sm:$0xff]  ;;  %v5860_v36 = vld [vmem:[%s12142_s30 + $0x4d0] sm:$0xff] }
 0x13c   : > { %6850 = vmatprep.subr.bf16.mxu0 %v6849_v41  ;;  %v6897_v41 = vpack.c.bf16 %v5821_v39, %v5819_v38  ;;  %v5863_v38 = vld [vmem:[%s12142_s30 + $0x4e8] sm:$0xff] }
 0x13f   : > { %6852 = vmatpush1.bf16.msra.mxu0 %v6851_v48  ;;  %v6899_v48 = vpack.c.bf16 %v5820_v44, %v5818_v43  ;;  %v5867_v43 = vld [vmem:[%s12142_s30 + $0x508] sm:$0xff] }
 0x140   : > { %6870 = vmatprep.subr.bf16.mxu0 %v6869_v49  ;;  %v6901_v49 = vpack.c.bf16 %v5825_v47, %v5823_v45  ;;  %v5866_v45 = vld [vmem:[%s12142_s30 + $0x500] sm:$0xff]  ;;  %v5868_v47 = vld [vmem:[%s12142_s30 + $0x510] sm:$0xff] }
 0x142   : > { %1239 = vmatmul.mubr.f32.vlgmr.msra.gmra.mrb[16].mxu0 %v8509_v54  ;;  %v5805_v54 = vld [vmem:[%s12142_s30 + $0x378] sm:$0xff] }
 0x143   : > { %5779 = vmatprep.mubr.msk.f32.mxu0 %vm756_vm0, %v8519_v59  ;;  %6872 = vmatpush1.bf16.msra.mxu0 %v6871_v2  ;;  %v6879_v59 = vpack.c.bf16 %v5800_v15, %v5798_v14  ;;  %v6881_v19 = vpack.c.bf16 %v5805_v54, %v5803_v18  ;;  %v6903_v2 = vpack.c.bf16 %v5824_v51, %v5822_v50  ;;  %v5830_v14 = vld [vmem:[%s12142_s30 + $0x440] sm:$0xff]  ;;  %v5832_v15 = vld [vmem:[%s12142_s30 + $0x450] sm:$0xff]  ;;  %v5835_v18 = vld [vmem:[%s12142_s30 + $0x468] sm:$0xff] }
 0x144   : > { %6874 = vmatprep.subr.bf16.mxu0 %v6873_v3  ;;  %v6905_v3 = vpack.c.bf16 %v5829_v0, %v5827_v53  ;;  %v5837_v54 = vld [vmem:[%s12142_s30 + $0x478] sm:$0xff]  ;;  %v5870_v50 = vld [vmem:[%s12142_s30 + $0x520] sm:$0xff]  ;;  %v5872_v51 = vld [vmem:[%s12142_s30 + $0x530] sm:$0xff] }
 0x145   : > { %v5875_v53 = vld [vmem:[%s12142_s30 + $0x548] sm:$0xff] }
 0x146   : > { %1245 = vmatmul.mubr.f32.gmra.mrb[18].mxu0 %v8517_v58  ;;  %v5809_v58 = vld [vmem:[%s12142_s30 + $0x398] sm:$0xff] }
 0x147   : > { %5780 = vmatprep.mubr.msk.f32.mxu0 %vm756_vm0, %v8523_v61  ;;  %6876 = vmatpush1.bf16.msra.mxu0 %v6875_v11  ;;  %v6883_v61 = vpack.c.bf16 %v5804_v21, %v5802_v20  ;;  %v6885_v24 = vpack.c.bf16 %v5809_v58, %v5807_v23  ;;  %v6907_v11 = vpack.c.bf16 %v5828_v5, %v5826_v4  ;;  %v5834_v20 = vld [vmem:[%s12142_s30 + $0x460] sm:$0xff]  ;;  %v5836_v21 = vld [vmem:[%s12142_s30 + $0x470] sm:$0xff]  ;;  %v5851_v23 = vld [vmem:[%s12142_s30 + $0x488] sm:$0xff] }
 0x148   : > { %6878 = vmatprep.subr.bf16.mxu0 %v6877_v13  ;;  %v6909_v13 = vpack.c.bf16 %v5833_v10, %v5831_v8  ;;  %v5853_v58 = vld [vmem:[%s12142_s30 + $0x498] sm:$0xff]  ;;  %v5879_v4 = vld [vmem:[%s12142_s30 + $0x568] sm:$0xff] }
 0x149   : > { %v5881_v5 = vld [vmem:[%s12142_s30 + $0x578] sm:$0xff] }
 0x14a   : > { %1251 = vmatmul.mubr.f32.gmra.mrb[20].mxu0 %v8521_v60  ;;  %v5813_v60 = vld [vmem:[%s12142_s30 + $0x3b8] sm:$0xff]  ;;  %v6961_v10 = vpack.c.bf16 %v5881_v5, %v5879_v4 }
 0x14b   : > { %5781 = vmatprep.mubr.msk.f32.mxu0 %vm756_vm0, %v8527_v63  ;;  %6880 = vmatpush1.bf16.msra.mxu0 %v6879_v59  ;;  %v6887_v63 = vpack.c.bf16 %v5808_v26, %v5806_v25  ;;  %v6889_v29 = vpack.c.bf16 %v5813_v60, %v5811_v28  ;;  %v6911_v59 = vpack.c.bf16 %v5832_v15, %v5830_v14  ;;  %v5850_v25 = vld [vmem:[%s12142_s30 + $0x480] sm:$0xff]  ;;  %v5852_v26 = vld [vmem:[%s12142_s30 + $0x490] sm:$0xff]  ;;  %v5855_v28 = vld [vmem:[%s12142_s30 + $0x4a8] sm:$0xff] }
 0x14c   : > { %6882 = vmatprep.subr.bf16.mxu0 %v6881_v19  ;;  %v6913_v19 = vpack.c.bf16 %v5837_v54, %v5835_v18  ;;  %v5857_v60 = vld [vmem:[%s12142_s30 + $0x4b8] sm:$0xff]  ;;  %v5883_v14 = vld [vmem:[%s12142_s30 + $0x588] sm:$0xff] }
 0x14d   : > { %v5885_v15 = vld [vmem:[%s12142_s30 + $0x598] sm:$0xff] }
 0x14e   : > { %1257 = vmatmul.mubr.f32.gmra.mrb[22].mxu0 %v8525_v62  ;;  %v5817_v62 = vld [vmem:[%s12142_s30 + $0x3d8] sm:$0xff]  ;;  %v6965_v54 = vpack.c.bf16 %v5885_v15, %v5883_v14 }
 0x14f   : > { %6884 = vmatpush1.bf16.msra.mxu0 %v6883_v61  ;;  %5838 = vmatprep.mubr.msk.f32.mxu0 %vm756_vm0, %v8515_v57  ;;  %v6891_v57 = vpack.c.bf16 %v5812_v31, %v5810_v30  ;;  %v6893_v34 = vpack.c.bf16 %v5817_v62, %v5815_v33  ;;  %v6915_v61 = vpack.c.bf16 %v5836_v21, %v5834_v20  ;;  %v5854_v30 = vld [vmem:[%s12142_s30 + $0x4a0] sm:$0xff]  ;;  %v5856_v31 = vld [vmem:[%s12142_s30 + $0x4b0] sm:$0xff]  ;;  %v5859_v33 = vld [vmem:[%s12142_s30 + $0x4c8] sm:$0xff] }
 0x150   : > { %6886 = vmatprep.subr.bf16.mxu0 %v6885_v24  ;;  %v6933_v24 = vpack.c.bf16 %v5853_v58, %v5851_v23  ;;  %v5861_v62 = vld [vmem:[%s12142_s30 + $0x4d8] sm:$0xff]  ;;  %v5887_v20 = vld [vmem:[%s12142_s30 + $0x5a8] sm:$0xff] }
 0x151   : > { %v5889_v21 = vld [vmem:[%s12142_s30 + $0x5b8] sm:$0xff] }
 0x152   : > { %v6969_v58 = vpack.c.bf16 %v5889_v21, %v5887_v20  ;;  %v5909_v20 = vld [vmem:[%s12145_s4 + $0x208] sm:$0xff]  ;;  %v5911_v21 = vld [vmem:[%s12145_s4 + $0x218] sm:$0xff] }
 0x153   : > { %6888 = vmatpush1.bf16.msra.mxu0 %v6887_v63  ;;  %v6935_v63 = vpack.c.bf16 %v5852_v26, %v5850_v25  ;;  %v5891_v25 = vld [vmem:[%s12142_s30 + $0x5c8] sm:$0xff]  ;;  %v5893_v26 = vld [vmem:[%s12142_s30 + $0x5d8] sm:$0xff] }
 0x154   : > { %6890 = vmatprep.subr.bf16.mxu0 %v6889_v29  ;;  %v6937_v29 = vpack.c.bf16 %v5857_v60, %v5855_v28  ;;  %v6973_v60 = vpack.c.bf16 %v5893_v26, %v5891_v25  ;;  %v5913_v25 = vld [vmem:[%s12145_s4 + $0x228] sm:$0xff]  ;;  %v5915_v26 = vld [vmem:[%s12145_s4 + $0x238] sm:$0xff] }
 0x157   : > { %6892 = vmatpush1.bf16.msra.mxu0 %v6891_v57  ;;  %v6939_v57 = vpack.c.bf16 %v5856_v31, %v5854_v30  ;;  %v5895_v30 = vld [vmem:[%s12142_s30 + $0x5e8] sm:$0xff]  ;;  %v5897_v31 = vld [vmem:[%s12142_s30 + $0x5f8] sm:$0xff] }
 0x158   : > { %6894 = vmatprep.subr.bf16.mxu0 %v6893_v34  ;;  %v6941_v34 = vpack.c.bf16 %v5861_v62, %v5859_v33  ;;  %v6977_v62 = vpack.c.bf16 %v5897_v31, %v5895_v30  ;;  %v5914_v30 = vld [vmem:[%s12145_s4 + $0x230] sm:$0xff]  ;;  %v5917_v31 = vld [vmem:[%s12145_s4 + $0x248] sm:$0xff] }
 0x15b   : > { %6896 = vmatpush1.bf16.msra.mxu0 %v6895_v40  ;;  %v5862_v40 = vld [vmem:[%s12142_s30 + $0x4e0] sm:$0xff] }
 0x15c   : > { %6898 = vmatprep.subr.bf16.mxu0 %v6897_v41  ;;  %v5864_v41 = vld [vmem:[%s12142_s30 + $0x4f0] sm:$0xff] }
 0x15f   : > { %6900 = vmatpush1.bf16.msra.mxu0 %v6899_v48  ;;  %v5871_v48 = vld [vmem:[%s12142_s30 + $0x528] sm:$0xff] }
 0x160   : > { %6902 = vmatprep.subr.bf16.mxu0 %v6901_v49 }
 0x163   : > { %6904 = vmatpush1.bf16.msra.mxu0 %v6903_v2  ;;  %v5874_v2 = vld [vmem:[%s12142_s30 + $0x540] sm:$0xff] }
 0x164   : > { %6906 = vmatprep.subr.bf16.mxu0 %v6905_v3  ;;  %v5876_v3 = vld [vmem:[%s12142_s30 + $0x550] sm:$0xff] }
 0x165   : > { %v6959_v8 = vpack.c.bf16 %v5876_v3, %v5874_v2 }
 0x167   : > { %6908 = vmatpush1.bf16.msra.mxu0 %v6907_v11  ;;  %v5878_v11 = vld [vmem:[%s12142_s30 + $0x560] sm:$0xff] }
 0x168   : > { %6910 = vmatprep.subr.bf16.mxu0 %v6909_v13  ;;  %v5880_v13 = vld [vmem:[%s12142_s30 + $0x570] sm:$0xff] }
 0x169   : > { %v6963_v18 = vpack.c.bf16 %v5880_v13, %v5878_v11 }
 0x16b   : > { %6912 = vmatpush1.bf16.msra.mxu0 %v6911_v59  ;;  %v5882_v59 = vld [vmem:[%s12142_s30 + $0x580] sm:$0xff] }
 0x16c   : > { %6914 = vmatprep.subr.bf16.mxu0 %v6913_v19  ;;  %v5884_v19 = vld [vmem:[%s12142_s30 + $0x590] sm:$0xff] }
 0x16d   : > { %v6967_v23 = vpack.c.bf16 %v5884_v19, %v5882_v59  ;;  %v1827_v19 = vld [vmem:[%s12144_s7] sm:$0xff] }
 0x16f   : > { %6916 = vmatpush1.bf16.msra.mxu0 %v6915_v61  ;;  %v5886_v61 = vld [vmem:[%s12142_s30 + $0x5a0] sm:$0xff] }
 0x170   : > { %6934 = vmatprep.subr.bf16.mxu0 %v6933_v24  ;;  %v5888_v24 = vld [vmem:[%s12142_s30 + $0x5b0] sm:$0xff] }
 0x171   : > { %v6971_v28 = vpack.c.bf16 %v5888_v24, %v5886_v61  ;;  %v5908_v61 = vld [vmem:[%s12145_s4 + $0x200] sm:$0xff]  ;;  %v5910_v24 = vld [vmem:[%s12145_s4 + $0x210] sm:$0xff] }
 0x172   : > { %1495 = vmatmul.mubr.f32.vlgmr.msra.gmra.mrb[16].mxu0 %v8511_v55  ;;  %v5865_v55 = vld [vmem:[%s12142_s30 + $0x4f8] sm:$0xff] }
 0x173   : > { %6936 = vmatpush1.bf16.msra.mxu0 %v6935_v63  ;;  %5839 = vmatprep.mubr.msk.f32.mxu0 %vm756_vm0, %v8549_v12  ;;  %v6943_v12 = vpack.c.bf16 %v5860_v36, %v5858_v35  ;;  %v6945_v39 = vpack.c.bf16 %v5865_v55, %v5863_v38  ;;  %v5890_v63 = vld [vmem:[%s12142_s30 + $0x5c0] sm:$0xff]  ;;  %v1793_v36 = vlaneseq }
 0x174   : > { %6938 = vmatprep.subr.bf16.mxu0 %v6937_v29  ;;  %v5892_v29 = vld [vmem:[%s12142_s30 + $0x5d0] sm:$0xff] }
 0x175   : > { %v6975_v33 = vpack.c.bf16 %v5892_v29, %v5890_v63  ;;  %v1794_v38 = vshrl.u32 %v1793_v36, 7  ;;  %v7001_v63 = vpack.c.bf16 %v5915_v26, %v5913_v25  ;;  %v5912_v29 = vld [vmem:[%s12145_s4 + $0x220] sm:$0xff]  ;;  %v5918_v36 = vld [vmem:[%s12145_s4 + $0x250] sm:$0xff] }
 0x176   : > { %1501 = vmatmul.mubr.f32.gmra.mrb[18].mxu0 %v8541_v7  ;;  %v5869_v7 = vld [vmem:[%s12142_s30 + $0x518] sm:$0xff] }
 0x177   : > { %6940 = vmatpush1.bf16.msra.mxu0 %v6939_v57  ;;  %5840 = vmatprep.mubr.msk.f32.mxu0 %vm756_vm0, %v8566_v22  ;;  %v6947_v22 = vpack.c.bf16 %v5864_v41, %v5862_v40  ;;  %v6949_v44 = vpack.c.bf16 %v5869_v7, %v5867_v43  ;;  %v5894_v57 = vld [vmem:[%s12142_s30 + $0x5e0] sm:$0xff] }
 0x178   : > { %6942 = vmatprep.subr.bf16.mxu0 %v6941_v34  ;;  %v5896_v34 = vld [vmem:[%s12142_s30 + $0x5f0] sm:$0xff] }
 0x179   : > { %v6979_v35 = vpack.c.bf16 %v5896_v34, %v5894_v57  ;;  %v7003_v57 = vpack.c.bf16 %v5914_v30, %v5912_v29  ;;  %v5955_v29 = vld [vmem:[%s12145_s4 + $0x378] sm:$0xff] }
 0x17a   : > { %1507 = vmatmul.mubr.f32.gmra.mrb[20].mxu0 %v8558_v17  ;;  %v5873_v17 = vld [vmem:[%s12142_s30 + $0x538] sm:$0xff] }
 0x17b   : > { %6944 = vmatpush1.bf16.msra.mxu0 %v6943_v12  ;;  %5841 = vmatprep.mubr.msk.f32.mxu0 %vm756_vm0, %v8583_v32  ;;  %v6951_v32 = vpack.c.bf16 %v5868_v47, %v5866_v45  ;;  %v6953_v49 = vpack.c.bf16 %v5873_v17, %v5871_v48 }
 0x17c   : > { %6946 = vmatprep.subr.bf16.mxu0 %v6945_v39 }
 0x17e   : > { %1513 = vmatmul.mubr.f32.gmra.mrb[22].mxu0 %v8575_v27  ;;  %v5877_v27 = vld [vmem:[%s12142_s30 + $0x558] sm:$0xff] }
 0x17f   : > { %6948 = vmatpush1.bf16.msra.mxu0 %v6947_v22  ;;  %5898 = vmatprep.mubr.msk.f32.mxu0 %vm756_vm0, %v8600_v42  ;;  %v6955_v42 = vpack.c.bf16 %v5872_v51, %v5870_v50  ;;  %v6957_v0 = vpack.c.bf16 %v5877_v27, %v5875_v53 }
 0x180   : > { %6950 = vmatprep.subr.bf16.mxu0 %v6949_v44 }
 0x183   : > { %6952 = vmatpush1.bf16.msra.mxu0 %v6951_v32 }
 0x184   : > { %6954 = vmatprep.subr.bf16.mxu0 %v6953_v49 }
 0x187   : > { %6956 = vmatpush1.bf16.msra.mxu0 %v6955_v42 }
 0x188   : > { %6958 = vmatprep.subr.bf16.mxu0 %v6957_v0 }
 0x18b   : > { %6960 = vmatpush1.bf16.msra.mxu0 %v6959_v8 }
 0x18c   : > { %6962 = vmatprep.subr.bf16.mxu0 %v6961_v10 }
 0x18f   : > { %6964 = vmatpush1.bf16.msra.mxu0 %v6963_v18 }
 0x190   : > { %6966 = vmatprep.subr.bf16.mxu0 %v6965_v54 }
 0x193   : > { %6968 = vmatpush1.bf16.msra.mxu0 %v6967_v23  ;;  %v1828_v23 = vld [vmem:[%s12144_s7 + $0x8] sm:$0xff] }
 0x194   : > { %6970 = vmatprep.subr.bf16.mxu0 %v6969_v58  ;;  %v6997_v58 = vpack.c.bf16 %v5911_v21, %v5909_v20 }
 0x197   : > { %6972 = vmatpush1.bf16.msra.mxu0 %v6971_v28  ;;  %v5904_v28 = vld [vmem:[%s12144_s7 + $0x10] sm:$0xff] }
 0x198   : > { %6974 = vmatprep.subr.bf16.mxu0 %v6973_v60  ;;  %v6999_v60 = vpack.c.bf16 %v5910_v24, %v5908_v61  ;;  %v5949_v61 = vld [vmem:[%s12145_s4 + $0x348] sm:$0xff]  ;;  %v5951_v24 = vld [vmem:[%s12145_s4 + $0x358] sm:$0xff] }
 0x199   : > { %v7037_v26 = vpack.c.bf16 %v5951_v24, %v5949_v61 }
 0x19b   : > { %6976 = vmatpush1.bf16.msra.mxu0 %v6975_v33  ;;  %v5919_v33 = vld [vmem:[%s12145_s4 + $0x258] sm:$0xff] }
 0x19c   : > { %6978 = vmatprep.subr.bf16.mxu0 %v6977_v62  ;;  %v5905_v62 = vld [vmem:[%s12144_s7 + $0x18] sm:$0xff]  ;;  %v7005_v34 = vpack.c.bf16 %v5919_v33, %v5917_v31  ;;  %v5952_v33 = vld [vmem:[%s12145_s4 + $0x360] sm:$0xff] }
 0x19f   : > { %6980 = vmatpush1.bf16.msra.mxu0 %v6979_v35  ;;  %v5916_v35 = vld [vmem:[%s12145_s4 + $0x240] sm:$0xff] }
 0x1a2   : > { %1759 = vmatmul.mubr.f32.vlgmr.msra.gmra.mrb[16].mxu0 %v8592_v37  ;;  %v9024_v37 = vsub.s32 0, %v1794_v38 }
 0x1a3   : > { %5899 = vmatprep.mubr.msk.f32.mxu0 %vm756_vm0, %v8625_v52  ;;  %v1799_v52 = vsub.s32 1, %v1794_v38  ;;  %v5921_v38 = vld [vmem:[%s12145_s4 + $0x268] sm:$0xff] }
 0x1a6   : > { %1765 = vmatmul.mubr.f32.gmra.mrb[18].mxu0 %v8611_v46  ;;  %v1791_v46 = vld [vmem:[%s12143_s2] sm:$0x3] }
 0x1a7   : > { %5900 = vmatprep.mubr.msk.f32.mxu0 %vm756_vm0, %v8641_v6  ;;  %v1796_v6 = vrot.slane %v1791_v46, %v9024_v37  ;;  %v1800_v55 = vrot.slane %v1791_v46, %v1799_v52  ;;  %v5923_v46 = vld [vmem:[%s12145_s4 + $0x278] sm:$0xff]  ;;  %v7007_v52 = vpack.c.bf16 %v5918_v36, %v5916_v35 }
 0x1aa   : > { %1771 = vmatmul.mubr.f32.gmra.mrb[20].mxu0 %v8627_v56 }
 0x1ab   : > { %5901 = vmatprep.mubr.msk.f32.mxu0 %vm756_vm0, %v8657_v16 }
 0x1ae   : > { %1777 = vmatmul.mubr.f32.gmra.mrb[22].mxu0 %v8643_v9 }
 0x1af   : > { %2587 = vmatprep.mubr.f32.mxu0 %v8117_v1 }
 0x275   : > { %v1760_v56 = vpop.f32.mrb[16].mxu0 }
 0x276   : > { %v1803_v12 = vadd.f32 %v1796_v6, %v1760_v56  ;;  %v1762_v39 = vpop.f32.mrb[17].mxu0  ;;  %v5922_v56 = vld [vmem:[%s12145_s4 + $0x270] sm:$0xff] }
 0x277   : > { %v1804_v16 = vadd.f32 %v1800_v55, %v1762_v39  ;;  %v5927_v39 = vld [vmem:[%s12145_s4 + $0x298] sm:$0xff] }
 0x278   : > { %v1811_v9 = vmul.f32 0.2, %v1803_v12 }
 0x279   : > { %v1766_v40 = vpop.f32.mrb[18].mxu0  ;;  %v1812_v7 = vmul.f32 0.2, %v1804_v16 }
 0x27a   : > { %v1805_v41 = vadd.f32 %v1796_v6, %v1766_v40  ;;  %v1768_v43 = vpop.f32.mrb[19].mxu0  ;;  %v1819_v48 = vmax.f32 %v1803_v12, %v1811_v9  ;;  %v5925_v12 = vld [vmem:[%s12145_s4 + $0x288] sm:$0xff]  ;;  %v5924_v9 = vld [vmem:[%s12145_s4 + $0x280] sm:$0xff] }
 0x27b   : > { %v1806_v22 = vadd.f32 %v1800_v55, %v1768_v43  ;;  %v1820_v50 = vmax.f32 %v1804_v16, %v1812_v7  ;;  %v7013_v40 = vpack.c.bf16 %v5927_v39, %v5925_v12  ;;  %v5929_v43 = vld [vmem:[%s12145_s4 + $0x2a8] sm:$0xff]  ;;  %v5931_v7 = vld [vmem:[%s12145_s4 + $0x2b8] sm:$0xff]  ;;  %v5960_v12 = vld [vmem:[%s12145_s4 + $0x3a0] sm:$0xff] }
 0x27c   : > { %v1813_v44 = vmul.f32 0.2, %v1805_v41  ;;  %v5962_v39 = vld [vmem:[%s12145_s4 + $0x3b0] sm:$0xff] }
 0x27d   : > { %v1814_v45 = vmul.f32 0.2, %v1806_v22  ;;  %v1772_v47 = vpop.f32.mrb[20].mxu0 }
 0x27e   : > { %v1821_v17 = vmax.f32 %v1805_v41, %v1813_v44  ;;  %v1807_v32 = vadd.f32 %v1796_v6, %v1772_v47  ;;  %v1774_v49 = vpop.f32.mrb[21].mxu0  ;;  %v5926_v41 = vld [vmem:[%s12145_s4 + $0x290] sm:$0xff]  ;;  %v7017_v44 = vpack.c.bf16 %v5931_v7, %v5929_v43  ;;  %v5964_v43 = vld [vmem:[%s12145_s4 + $0x3c0] sm:$0xff] }
 0x27f   : > { %v1822_v51 = vmax.f32 %v1806_v22, %v1814_v45  ;;  %v1808_v53 = vadd.f32 %v1800_v55, %v1774_v49  ;;  %v7015_v22 = vpack.c.bf16 %v5926_v41, %v5924_v9  ;;  %v5928_v45 = vld [vmem:[%s12145_s4 + $0x2a0] sm:$0xff]  ;;  %v5930_v47 = vld [vmem:[%s12145_s4 + $0x2b0] sm:$0xff]  ;;  %v5967_v9 = vld [vmem:[%s12145_s4 + $0x3d8] sm:$0xff] }
 0x280   : > { %v9030_v27 = vpack.c.bf16 %v1821_v17, %v1819_v48  ;;  %v1815_v2 = vmul.f32 0.2, %v1807_v32  ;;  %v5933_v48 = vld [vmem:[%s12145_s4 + $0x2c8] sm:$0xff]  ;;  %v5935_v17 = vld [vmem:[%s12145_s4 + $0x2d8] sm:$0xff]  ;;  %v5966_v7 = vld [vmem:[%s12145_s4 + $0x3d0] sm:$0xff] }
 0x281   : > { %v9032_v42 = vpack.c.bf16 %v1822_v51, %v1820_v50  ;;  %v1778_v0 = vpop.f32.mrb[22].mxu0  ;;  %v1816_v5 = vmul.f32 0.2, %v1808_v53  ;;  %v7021_v49 = vpack.c.bf16 %v5935_v17, %v5933_v48  ;;  %v5932_v50 = vld [vmem:[%s12145_s4 + $0x2c0] sm:$0xff]  ;;  %v5934_v51 = vld [vmem:[%s12145_s4 + $0x2d0] sm:$0xff] }
 0x282   : > { %v1809_v3 = vadd.f32 %v1796_v6, %v1778_v0  ;;  %v1780_v4 = vpop.f32.mrb[23].mxu0  ;;  %v1823_v13 = vmax.f32 %v1807_v32, %v1815_v2  ;;  %v7009_v6 = vpack.c.bf16 %v5923_v46, %v5921_v38  ;;  %v7019_v32 = vpack.c.bf16 %v5930_v47, %v5928_v45  ;;  %v5939_v0 = vld [vmem:[%s12145_s4 + $0x2f8] sm:$0xff]  ;;  %v5956_v38 = vld [vmem:[%s12145_s4 + $0x380] sm:$0xff]  ;;  %v5958_v46 = vld [vmem:[%s12145_s4 + $0x390] sm:$0xff] }
 0x283   : > { %v1810_v8 = vadd.f32 %v1800_v55, %v1780_v4  ;;  %6982 = vmatprep.subr.bf16.mxu1 %v9032_v42  ;;  %7198 = vmatprep.subr.bf16.mxu0 %v9032_v42  ;;  %v1824_v15 = vmax.f32 %v1808_v53, %v1816_v5  ;;  %v5920_v55 = vld [vmem:[%s12145_s4 + $0x260] sm:$0xff]  ;;  %v5937_v53 = vld [vmem:[%s12145_s4 + $0x2e8] sm:$0xff]  ;;  %v7023_v2 = vpack.c.bf16 %v5934_v51, %v5932_v50  ;;  %v5938_v5 = vld [vmem:[%s12145_s4 + $0x2f0] sm:$0xff] }
 0x284   : > { %v1817_v10 = vmul.f32 0.2, %v1809_v3  ;;  %6984 = vmatpush1.bf16.msra.mxu1 %v9030_v27  ;;  %7200 = vmatpush1.bf16.msra.mxu0 %v9030_v27  ;;  %v7011_v16 = vpack.c.bf16 %v5922_v56, %v5920_v55  ;;  %v5936_v4 = vld [vmem:[%s12145_s4 + $0x2e0] sm:$0xff]  ;;  %v7047_v55 = vpack.c.bf16 %v5958_v46, %v5956_v38  ;;  %v5971_v45 = vld [vmem:[%s12145_s4 + $0x3f8] sm:$0xff]  ;;  %v5970_v17 = vld [vmem:[%s12145_s4 + $0x3f0] sm:$0xff] }
 0x285   : > { %v1818_v11 = vmul.f32 0.2, %v1810_v8  ;;  %v5968_v48 = vld [vmem:[%s12145_s4 + $0x3e0] sm:$0xff]  ;;  %v1916_v50 = vld [vmem:[%s12145_s4 + $0x18] sm:$0xff]  ;;  %v1931_v46 = vld [vmem:[%s12145_s4 + $0x90] sm:$0xff] }
 0x286   : > { %v1825_v14 = vmax.f32 %v1809_v3, %v1817_v10  ;;  %v7025_v3 = vpack.c.bf16 %v5939_v0, %v5937_v53  ;;  %v5943_v10 = vld [vmem:[%s12145_s4 + $0x318] sm:$0xff]  ;;  %v6040_v53 = vld [vmem:[%s12144_s7 + $0x30] sm:$0xff]  ;;  %v1929_v38 = vld [vmem:[%s12145_s4 + $0x80] sm:$0xff] }
 0x287   : > { %v1826_v18 = vmax.f32 %v1810_v8, %v1818_v11  ;;  %v5941_v8 = vld [vmem:[%s12145_s4 + $0x308] sm:$0xff]  ;;  %v7027_v11 = vpack.c.bf16 %v5938_v5, %v5936_v4  ;;  %v6041_v0 = vld [vmem:[%s12144_s7 + $0x38] sm:$0xff] }
 0x288   : > { %v9038_v54 = vpack.c.bf16 %v1825_v14, %v1823_v13  ;;  %v7029_v13 = vpack.c.bf16 %v5943_v10, %v5941_v8  ;;  %v5940_v14 = vld [vmem:[%s12145_s4 + $0x300] sm:$0xff]  ;;  %v1915_v10 = vld [vmem:[%s12145_s4 + $0x10] sm:$0xff] }
 0x289   : > { %v9040_v59 = vpack.c.bf16 %v1826_v18, %v1824_v15  ;;  %v5942_v15 = vld [vmem:[%s12145_s4 + $0x310] sm:$0xff]  ;;  %v5945_v18 = vld [vmem:[%s12145_s4 + $0x328] sm:$0xff]  ;;  %v1913_v8 = vld [vmem:[%s12145_s4] sm:$0xff] }
 0x28a   : > { %v7031_v20 = vpack.c.bf16 %v5942_v15, %v5940_v14  ;;  %v7063_v15 = vpack.c.bf16 %v1915_v10, %v1913_v8  ;;  %v1952_v8 = vld [vmem:[%s12145_s4 + $0x138] sm:$0xff] }
 0x28b   : > { %6986 = vmatprep.subr.bf16.mxu1 %v9040_v59  ;;  %7202 = vmatprep.subr.bf16.mxu0 %v9040_v59 }
 0x28c   : > { %6988 = vmatpush1.bf16.msra.mxu1 %v9038_v54  ;;  %7204 = vmatpush1.bf16.msra.mxu0 %v9038_v54 }
 0x28d   : > { %6990 = vmatprep.subr.bf16.mxu1 %v9032_v42 }
 0x28f   : > { %5902 = vmatmul.mubr.msk.f32.vlgmr.msra.gmra.mrb[16].mxu1 %vm1829_vm1, %v1827_v19  ;;  %v5947_v19 = vld [vmem:[%s12145_s4 + $0x338] sm:$0xff]  ;;  %6042 = vmatmul.mubr.msk.f32.vlgmr.msra.gmra.mrb[24].mxu0 %vm1829_vm1, %v6040_v53  ;;  %v1945_v53 = vld [vmem:[%s12145_s4 + $0x100] sm:$0xff] }
 0x290   : > { %6992 = vmatpush1.bf16.msra.mxu1 %v9030_v27  ;;  %1906 = vmatprep.mubr.f32.mxu1 %v8117_v1  ;;  %v7033_v21 = vpack.c.bf16 %v5947_v19, %v5945_v18 }
 0x291   : > { %6994 = vmatprep.subr.bf16.mxu1 %v9040_v59  ;;  %2593 = vmatprep.mubr.f32.mxu0 %v8117_v1 }
 0x293   : > { %5903 = vmatmul.mubr.msk.f32.gmra.mrb[18].mxu1 %vm1829_vm1, %v1828_v23  ;;  %v5944_v23 = vld [vmem:[%s12145_s4 + $0x320] sm:$0xff]  ;;  %6043 = vmatmul.mubr.msk.f32.gmra.mrb[26].mxu0 %vm1829_vm1, %v6041_v0  ;;  %v1947_v0 = vld [vmem:[%s12145_s4 + $0x110] sm:$0xff] }
 0x294   : > { %6996 = vmatpush1.bf16.msra.mxu1 %v9038_v54  ;;  %2050 = vmatprep.mubr.f32.mxu1 %v8117_v1  ;;  %v7095_v10 = vpack.c.bf16 %v1947_v0, %v1945_v53  ;;  %v5984_v53 = vld [vmem:[%s12145_s4 + $0x440] sm:$0xff]  ;;  %v5986_v0 = vld [vmem:[%s12145_s4 + $0x450] sm:$0xff] }
 0x295   : > { %6998 = vmatprep.subr.bf16.mxu1 %v6997_v58  ;;  %v5946_v58 = vld [vmem:[%s12145_s4 + $0x330] sm:$0xff] }
 0x296   : > { %v7035_v25 = vpack.c.bf16 %v5946_v58, %v5944_v23  ;;  %v1922_v23 = vld [vmem:[%s12145_s4 + $0x48] sm:$0xff]  ;;  %v1924_v58 = vld [vmem:[%s12145_s4 + $0x58] sm:$0xff] }
 0x297   : > { %5906 = vmatmul.mubr.msk.f32.vlgmr.msra.gmra.mrb[20].mxu1 %vm1829_vm1, %v5904_v28  ;;  %v5948_v28 = vld [vmem:[%s12145_s4 + $0x340] sm:$0xff] }
 0x298   : > { %2056 = vmatprep.mubr.f32.mxu1 %v8117_v1  ;;  %7000 = vmatpush1.bf16.msra.mxu1 %v6999_v60  ;;  %v5950_v60 = vld [vmem:[%s12145_s4 + $0x350] sm:$0xff] }
 0x299   : > { %7002 = vmatprep.subr.bf16.mxu1 %v7001_v63  ;;  %v5953_v63 = vld [vmem:[%s12145_s4 + $0x368] sm:$0xff]  ;;  %v7039_v30 = vpack.c.bf16 %v5950_v60, %v5948_v28  ;;  %v1921_v28 = vld [vmem:[%s12145_s4 + $0x40] sm:$0xff]  ;;  %v1923_v60 = vld [vmem:[%s12145_s4 + $0x50] sm:$0xff] }
 0x29a   : > { %v7041_v31 = vpack.c.bf16 %v5955_v29, %v5953_v63  ;;  %v1926_v63 = vld [vmem:[%s12145_s4 + $0x68] sm:$0xff]  ;;  %v1928_v29 = vld [vmem:[%s12145_s4 + $0x78] sm:$0xff] }
 0x29b   : > { %5907 = vmatmul.mubr.msk.f32.gmra.mrb[22].mxu1 %vm1829_vm1, %v5905_v62  ;;  %v5954_v62 = vld [vmem:[%s12145_s4 + $0x370] sm:$0xff] }
 0x29c   : > { %7004 = vmatpush1.bf16.msra.mxu1 %v7003_v57  ;;  %v5957_v57 = vld [vmem:[%s12145_s4 + $0x388] sm:$0xff]  ;;  %v7043_v35 = vpack.c.bf16 %v5954_v62, %v5952_v33  ;;  %v1925_v33 = vld [vmem:[%s12145_s4 + $0x60] sm:$0xff]  ;;  %v1927_v62 = vld [vmem:[%s12145_s4 + $0x70] sm:$0xff] }
 0x29d   : > { %7006 = vmatprep.subr.bf16.mxu1 %v7005_v34  ;;  %v5959_v34 = vld [vmem:[%s12145_s4 + $0x398] sm:$0xff] }
 0x29e   : > { %v7045_v36 = vpack.c.bf16 %v5959_v34, %v5957_v57  ;;  %v1930_v57 = vld [vmem:[%s12145_s4 + $0x88] sm:$0xff]  ;;  %v1932_v34 = vld [vmem:[%s12145_s4 + $0x98] sm:$0xff] }
 0x2a0   : > { %7008 = vmatpush1.bf16.msra.mxu1 %v7007_v52  ;;  %v5961_v52 = vld [vmem:[%s12145_s4 + $0x3a8] sm:$0xff] }
 0x2a1   : > { %7010 = vmatprep.subr.bf16.mxu1 %v7009_v6  ;;  %v5963_v6 = vld [vmem:[%s12145_s4 + $0x3b8] sm:$0xff] }
 0x2a2   : > { %v7049_v56 = vpack.c.bf16 %v5963_v6, %v5961_v52  ;;  %v1934_v52 = vld [vmem:[%s12145_s4 + $0xa8] sm:$0xff]  ;;  %v1936_v6 = vld [vmem:[%s12145_s4 + $0xb8] sm:$0xff] }
 0x2a4   : > { %7012 = vmatpush1.bf16.msra.mxu1 %v7011_v16  ;;  %v7051_v16 = vpack.c.bf16 %v5962_v39, %v5960_v12  ;;  %v1933_v12 = vld [vmem:[%s12145_s4 + $0xa0] sm:$0xff]  ;;  %v1935_v39 = vld [vmem:[%s12145_s4 + $0xb0] sm:$0xff] }
 0x2a5   : > { %7014 = vmatprep.subr.bf16.mxu1 %v7013_v40  ;;  %v5965_v40 = vld [vmem:[%s12145_s4 + $0x3c8] sm:$0xff] }
 0x2a6   : > { %v7053_v41 = vpack.c.bf16 %v5967_v9, %v5965_v40  ;;  %v1940_v40 = vld [vmem:[%s12145_s4 + $0xd8] sm:$0xff]  ;;  %v7083_v9 = vpack.c.bf16 %v1935_v39, %v1933_v12  ;;  %v1971_v12 = vld [vmem:[%s12145_s4 + $0x1d0] sm:$0xff]  ;;  %v1974_v39 = vld [vmem:[%s12145_s4 + $0x1e8] sm:$0xff] }
 0x2a8   : > { %7016 = vmatpush1.bf16.msra.mxu1 %v7015_v22  ;;  %v7055_v22 = vpack.c.bf16 %v5966_v7, %v5964_v43  ;;  %v1937_v43 = vld [vmem:[%s12145_s4 + $0xc0] sm:$0xff]  ;;  %v1939_v7 = vld [vmem:[%s12145_s4 + $0xd0] sm:$0xff] }
 0x2a9   : > { %7018 = vmatprep.subr.bf16.mxu1 %v7017_v44  ;;  %v5969_v44 = vld [vmem:[%s12145_s4 + $0x3e8] sm:$0xff] }
 0x2aa   : > { %v7057_v47 = vpack.c.bf16 %v5971_v45, %v5969_v44  ;;  %v1944_v44 = vld [vmem:[%s12145_s4 + $0xf8] sm:$0xff]  ;;  %v7087_v45 = vpack.c.bf16 %v1939_v7, %v1937_v43  ;;  %v1975_v43 = vld [vmem:[%s12145_s4 + $0x1f0] sm:$0xff] }
 0x2ac   : > { %7020 = vmatpush1.bf16.msra.mxu1 %v7019_v32  ;;  %v7059_v32 = vpack.c.bf16 %v5970_v17, %v5968_v48  ;;  %v1941_v48 = vld [vmem:[%s12145_s4 + $0xe0] sm:$0xff]  ;;  %v1943_v17 = vld [vmem:[%s12145_s4 + $0xf0] sm:$0xff] }
 0x2ad   : > { %7022 = vmatprep.subr.bf16.mxu1 %v7021_v49  ;;  %v1914_v49 = vld [vmem:[%s12145_s4 + $0x8] sm:$0xff] }
 0x2ae   : > { %v7061_v51 = vpack.c.bf16 %v1916_v50, %v1914_v49  ;;  %v1948_v49 = vld [vmem:[%s12145_s4 + $0x118] sm:$0xff]  ;;  %v7091_v50 = vpack.c.bf16 %v1943_v17, %v1941_v48  ;;  %v5981_v48 = vld [vmem:[%s12145_s4 + $0x428] sm:$0xff]  ;;  %v5980_v17 = vld [vmem:[%s12145_s4 + $0x420] sm:$0xff] }
 0x2b0   : > { %7024 = vmatpush1.bf16.msra.mxu1 %v7023_v2 }
 0x2b1   : > { %7026 = vmatprep.subr.bf16.mxu1 %v7025_v3 }
 0x2b4   : > { %7028 = vmatpush1.bf16.msra.mxu1 %v7027_v11  ;;  %v1918_v11 = vld [vmem:[%s12145_s4 + $0x28] sm:$0xff] }
 0x2b5   : > { %7030 = vmatprep.subr.bf16.mxu1 %v7029_v13  ;;  %v1920_v13 = vld [vmem:[%s12145_s4 + $0x38] sm:$0xff] }
 0x2b6   : > { %v7065_v19 = vpack.c.bf16 %v1920_v13, %v1918_v11  ;;  %v1949_v13 = vld [vmem:[%s12145_s4 + $0x120] sm:$0xff] }
 0x2b8   : > { %7032 = vmatpush1.bf16.msra.mxu1 %v7031_v20  ;;  %v1917_v20 = vld [vmem:[%s12145_s4 + $0x20] sm:$0xff] }
 0x2b9   : > { %7034 = vmatprep.subr.bf16.mxu1 %v7033_v21  ;;  %v1919_v21 = vld [vmem:[%s12145_s4 + $0x30] sm:$0xff] }
 0x2ba   : > { %v7067_v24 = vpack.c.bf16 %v1919_v21, %v1917_v20  ;;  %v1953_v21 = vld [vmem:[%s12145_s4 + $0x140] sm:$0xff] }
 0x2bc   : > { %7036 = vmatpush1.bf16.msra.mxu1 %v7035_v25 }
 0x2bd   : > { %7038 = vmatprep.subr.bf16.mxu1 %v7037_v26  ;;  %v7069_v26 = vpack.c.bf16 %v1924_v58, %v1922_v23  ;;  %v1955_v23 = vld [vmem:[%s12145_s4 + $0x150] sm:$0xff]  ;;  %v1958_v58 = vld [vmem:[%s12145_s4 + $0x168] sm:$0xff] }
 0x2c0   : > { %7040 = vmatpush1.bf16.msra.mxu1 %v7039_v30  ;;  %v7071_v30 = vpack.c.bf16 %v1923_v60, %v1921_v28  ;;  %v1959_v28 = vld [vmem:[%s12145_s4 + $0x170] sm:$0xff]  ;;  %v1962_v60 = vld [vmem:[%s12145_s4 + $0x188] sm:$0xff] }
 0x2c1   : > { %7042 = vmatprep.subr.bf16.mxu1 %v7041_v31  ;;  %v7073_v31 = vpack.c.bf16 %v1928_v29, %v1926_v63  ;;  %v1964_v63 = vld [vmem:[%s12145_s4 + $0x198] sm:$0xff] }
 0x2c4   : > { %7044 = vmatpush1.bf16.msra.mxu1 %v7043_v35  ;;  %v7075_v35 = vpack.c.bf16 %v1927_v62, %v1925_v33  ;;  %v1963_v33 = vld [vmem:[%s12145_s4 + $0x190] sm:$0xff]  ;;  %v1966_v62 = vld [vmem:[%s12145_s4 + $0x1a8] sm:$0xff] }
 0x2c5   : > { %7046 = vmatprep.subr.bf16.mxu1 %v7045_v36  ;;  %v7077_v36 = vpack.c.bf16 %v1932_v34, %v1930_v57  ;;  %v1968_v57 = vld [vmem:[%s12145_s4 + $0x1b8] sm:$0xff] }
 0x2c8   : > { %7048 = vmatpush1.bf16.msra.mxu1 %v7047_v55  ;;  %v7079_v55 = vpack.c.bf16 %v1931_v46, %v1929_v38  ;;  %v1967_v38 = vld [vmem:[%s12145_s4 + $0x1b0] sm:$0xff]  ;;  %v1970_v46 = vld [vmem:[%s12145_s4 + $0x1c8] sm:$0xff] }
 0x2c9   : > { %7050 = vmatprep.subr.bf16.mxu1 %v7049_v56  ;;  %v7081_v56 = vpack.c.bf16 %v1936_v6, %v1934_v52  ;;  %v1972_v52 = vld [vmem:[%s12145_s4 + $0x1d8] sm:$0xff] }
 0x2cc   : > { %7052 = vmatpush1.bf16.msra.mxu1 %v7051_v16  ;;  %v1938_v16 = vld [vmem:[%s12145_s4 + $0xc8] sm:$0xff] }
 0x2cd   : > { %7054 = vmatprep.subr.bf16.mxu1 %v7053_v41  ;;  %v7085_v41 = vpack.c.bf16 %v1940_v40, %v1938_v16  ;;  %v1976_v16 = vld [vmem:[%s12145_s4 + $0x1f8] sm:$0xff] }
 0x2d0   : > { %7056 = vmatpush1.bf16.msra.mxu1 %v7055_v22  ;;  %v1942_v22 = vld [vmem:[%s12145_s4 + $0xe8] sm:$0xff] }
 0x2d1   : > { %7058 = vmatprep.subr.bf16.mxu1 %v7057_v47  ;;  %v7089_v47 = vpack.c.bf16 %v1944_v44, %v1942_v22  ;;  %v5977_v22 = vld [vmem:[%s12145_s4 + $0x408] sm:$0xff]  ;;  %v5979_v44 = vld [vmem:[%s12145_s4 + $0x418] sm:$0xff] }
 0x2d4   : > { %7060 = vmatpush1.bf16.msra.mxu1 %v7059_v32  ;;  %v1946_v32 = vld [vmem:[%s12145_s4 + $0x108] sm:$0xff] }
 0x2d5   : > { %7062 = vmatprep.subr.bf16.mxu1 %v7061_v51  ;;  %v7093_v51 = vpack.c.bf16 %v1948_v49, %v1946_v32  ;;  %v5982_v32 = vld [vmem:[%s12145_s4 + $0x430] sm:$0xff]  ;;  %v5973_v49 = vld [vmem:[%s12144_s7 + $0x28] sm:$0xff] }
 0x362   : > { %v9276_v2 = vpop.f32.mrb[16].mxu1 }
 0x363   : > { %v1904_v3 = vpop.f32.mrb[17].mxu1 }
 0x366   : > { %v9278_v4 = vpop.f32.mrb[18].mxu1 }
 0x367   : > { %v9280_v5 = vpop.f32.mrb[19].mxu1 }
 0x36a   : > { %v2052_v14 = vpop.f32.mrb[20].mxu1 }
 0x36b   : > { %v2054_v18 = vpop.f32.mrb[21].mxu1 }
 0x36c   : > { %2192 = vmatprep.mubr.f32.mxu1 %v2054_v18  ;;  %v1956_v18 = vld [vmem:[%s12145_s4 + $0x158] sm:$0xff] }
 0x36d   : > { %2193 = vmatmul.mubr.f32.vlgmr.msra.gmra.mrb[24].mxu1 %v2052_v14  ;;  %v1951_v14 = vld [vmem:[%s12145_s4 + $0x130] sm:$0xff] }
 0x36e   : > { %7064 = vmatpush1.bf16.msra.mxu1 %v7063_v15  ;;  %v2058_v61 = vpop.f32.mrb[22].mxu1  ;;  %v1954_v15 = vld [vmem:[%s12145_s4 + $0x148] sm:$0xff] }
 0x36f   : > { %v2060_v25 = vpop.f32.mrb[23].mxu1  ;;  %7066 = vmatprep.subr.bf16.mxu1 %v7065_v19  ;;  %v7099_v19 = vpack.c.bf16 %v1951_v14, %v1949_v13  ;;  %v7101_v20 = vpack.c.bf16 %v1956_v18, %v1954_v15  ;;  %v5988_v13 = vld [vmem:[%s12145_s4 + $0x460] sm:$0xff]  ;;  %v5990_v14 = vld [vmem:[%s12145_s4 + $0x470] sm:$0xff]  ;;  %v5993_v15 = vld [vmem:[%s12145_s4 + $0x488] sm:$0xff] }
 0x370   : > { %2198 = vmatprep.mubr.f32.mxu1 %v2060_v25  ;;  %v5995_v18 = vld [vmem:[%s12145_s4 + $0x498] sm:$0xff] }
 0x371   : > { %2199 = vmatmul.mubr.f32.gmra.mrb[26].mxu1 %v2058_v61  ;;  %v1960_v61 = vld [vmem:[%s12145_s4 + $0x178] sm:$0xff] }
 0x372   : > { %7068 = vmatpush1.bf16.msra.mxu1 %v7067_v24  ;;  %2269 = vmatprep.mubr.f32.mxu1 %v1904_v3  ;;  %v1950_v3 = vld [vmem:[%s12145_s4 + $0x128] sm:$0xff]  ;;  %v7103_v24 = vpack.c.bf16 %v1955_v23, %v1953_v21  ;;  %v7105_v25 = vpack.c.bf16 %v1960_v61, %v1958_v58  ;;  %v5992_v21 = vld [vmem:[%s12145_s4 + $0x480] sm:$0xff]  ;;  %v5994_v23 = vld [vmem:[%s12145_s4 + $0x490] sm:$0xff] }
 0x373   : > { %7070 = vmatprep.subr.bf16.mxu1 %v7069_v26  ;;  %v7097_v11 = vpack.c.bf16 %v1952_v8, %v1950_v3  ;;  %v1957_v26 = vld [vmem:[%s12145_s4 + $0x160] sm:$0xff]  ;;  %v5989_v3 = vld [vmem:[%s12145_s4 + $0x468] sm:$0xff]  ;;  %v5991_v8 = vld [vmem:[%s12145_s4 + $0x478] sm:$0xff] }
 0x374   : > { %v7107_v29 = vpack.c.bf16 %v1959_v28, %v1957_v26  ;;  %v5997_v58 = vld [vmem:[%s12145_s4 + $0x4a8] sm:$0xff]  ;;  %v5999_v61 = vld [vmem:[%s12145_s4 + $0x4b8] sm:$0xff]  ;;  %v5996_v26 = vld [vmem:[%s12145_s4 + $0x4a0] sm:$0xff] }
 0x375   : > { %v5998_v28 = vld [vmem:[%s12145_s4 + $0x4b0] sm:$0xff] }
 0x376   : > { %7072 = vmatpush1.bf16.msra.mxu1 %v7071_v30  ;;  %v7109_v30 = vpack.c.bf16 %v1964_v63, %v1962_v60  ;;  %v6001_v60 = vld [vmem:[%s12145_s4 + $0x4c8] sm:$0xff]  ;;  %v6003_v63 = vld [vmem:[%s12145_s4 + $0x4d8] sm:$0xff] }
 0x377   : > { %7074 = vmatprep.subr.bf16.mxu1 %v7073_v31  ;;  %v1961_v31 = vld [vmem:[%s12145_s4 + $0x180] sm:$0xff] }
 0x378   : > { %v7111_v34 = vpack.c.bf16 %v1963_v33, %v1961_v31  ;;  %v6000_v31 = vld [vmem:[%s12145_s4 + $0x4c0] sm:$0xff]  ;;  %v6002_v33 = vld [vmem:[%s12145_s4 + $0x4d0] sm:$0xff] }
 0x37a   : > { %7076 = vmatpush1.bf16.msra.mxu1 %v7075_v35  ;;  %v7113_v35 = vpack.c.bf16 %v1968_v57, %v1966_v62  ;;  %v6005_v62 = vld [vmem:[%s12145_s4 + $0x4e8] sm:$0xff]  ;;  %v6007_v57 = vld [vmem:[%s12145_s4 + $0x4f8] sm:$0xff] }
 0x37b   : > { %7078 = vmatprep.subr.bf16.mxu1 %v7077_v36  ;;  %v1965_v36 = vld [vmem:[%s12145_s4 + $0x1a0] sm:$0xff] }
 0x37c   : > { %v7115_v6 = vpack.c.bf16 %v1967_v38, %v1965_v36  ;;  %v6004_v36 = vld [vmem:[%s12145_s4 + $0x4e0] sm:$0xff]  ;;  %v6006_v38 = vld [vmem:[%s12145_s4 + $0x4f0] sm:$0xff] }
 0x37e   : > { %7080 = vmatpush1.bf16.msra.mxu1 %v7079_v55  ;;  %v7117_v55 = vpack.c.bf16 %v1972_v52, %v1970_v46  ;;  %v6009_v46 = vld [vmem:[%s12145_s4 + $0x508] sm:$0xff]  ;;  %v6011_v52 = vld [vmem:[%s12145_s4 + $0x518] sm:$0xff] }
 0x37f   : > { %7082 = vmatprep.subr.bf16.mxu1 %v7081_v56  ;;  %v1969_v56 = vld [vmem:[%s12145_s4 + $0x1c0] sm:$0xff] }
 0x380   : > { %v7119_v40 = vpack.c.bf16 %v1971_v12, %v1969_v56  ;;  %v6008_v56 = vld [vmem:[%s12145_s4 + $0x500] sm:$0xff]  ;;  %v6010_v12 = vld [vmem:[%s12145_s4 + $0x510] sm:$0xff] }
 0x382   : > { %7084 = vmatpush1.bf16.msra.mxu1 %v7083_v9  ;;  %v7121_v9 = vpack.c.bf16 %v1976_v16, %v1974_v39  ;;  %v6013_v39 = vld [vmem:[%s12145_s4 + $0x528] sm:$0xff]  ;;  %v6015_v16 = vld [vmem:[%s12145_s4 + $0x538] sm:$0xff] }
 0x383   : > { %7086 = vmatprep.subr.bf16.mxu1 %v7085_v41  ;;  %v1973_v41 = vld [vmem:[%s12145_s4 + $0x1e0] sm:$0xff] }
 0x384   : > { %v7123_v7 = vpack.c.bf16 %v1975_v43, %v1973_v41  ;;  %v6012_v41 = vld [vmem:[%s12145_s4 + $0x520] sm:$0xff]  ;;  %v6014_v43 = vld [vmem:[%s12145_s4 + $0x530] sm:$0xff] }
 0x386   : > { %7088 = vmatpush1.bf16.msra.mxu1 %v7087_v45  ;;  %v7133_v45 = vpack.c.bf16 %v5979_v44, %v5977_v22  ;;  %v6019_v22 = vld [vmem:[%s12145_s4 + $0x558] sm:$0xff]  ;;  %v7171_v44 = vpack.c.bf16 %v6014_v43, %v6012_v41  ;;  %v2783_v41 = vld [vmem:[%s12146_s26 + $0x28] sm:$0xff] }
 0x387   : > { %7090 = vmatprep.subr.bf16.mxu1 %v7089_v47  ;;  %v5978_v47 = vld [vmem:[%s12145_s4 + $0x410] sm:$0xff] }
 0x38a   : > { %7092 = vmatpush1.bf16.msra.mxu1 %v7091_v50  ;;  %v7139_v50 = vpack.c.bf16 %v5982_v32, %v5980_v17  ;;  %v6022_v17 = vld [vmem:[%s12145_s4 + $0x570] sm:$0xff]  ;;  %v6025_v32 = vld [vmem:[%s12145_s4 + $0x588] sm:$0xff] }
 0x38b   : > { %7094 = vmatprep.subr.bf16.mxu1 %v7093_v51 }
 0x38e   : > { %7096 = vmatpush1.bf16.msra.mxu1 %v7095_v10  ;;  %v7143_v10 = vpack.c.bf16 %v5986_v0, %v5984_v53  ;;  %v6029_v53 = vld [vmem:[%s12145_s4 + $0x5a8] sm:$0xff]  ;;  %v6031_v0 = vld [vmem:[%s12145_s4 + $0x5b8] sm:$0xff] }
 0x38f   : > { %7098 = vmatprep.subr.bf16.mxu1 %v7097_v11  ;;  %v7145_v11 = vpack.c.bf16 %v5991_v8, %v5989_v3  ;;  %v7185_v8 = vpack.c.bf16 %v6031_v0, %v6029_v53  ;;  %v6057_v53 = vld [vmem:[%s12145_s4 + $0x668] sm:$0xff]  ;;  %v6059_v0 = vld [vmem:[%s12145_s4 + $0x678] sm:$0xff] }
 0x392   : > { %7100 = vmatpush1.bf16.msra.mxu1 %v7099_v19  ;;  %v7147_v19 = vpack.c.bf16 %v5990_v14, %v5988_v13  ;;  %v6033_v13 = vld [vmem:[%s12145_s4 + $0x5c8] sm:$0xff]  ;;  %v6035_v14 = vld [vmem:[%s12145_s4 + $0x5d8] sm:$0xff] }
 0x393   : > { %7102 = vmatprep.subr.bf16.mxu1 %v7101_v20  ;;  %v7149_v20 = vpack.c.bf16 %v5995_v18, %v5993_v15  ;;  %v7189_v18 = vpack.c.bf16 %v6035_v14, %v6033_v13  ;;  %v6061_v13 = vld [vmem:[%s12145_s4 + $0x688] sm:$0xff]  ;;  %v6063_v14 = vld [vmem:[%s12145_s4 + $0x698] sm:$0xff] }
 0x396   : > { %7104 = vmatpush1.bf16.msra.mxu1 %v7103_v24  ;;  %v7151_v24 = vpack.c.bf16 %v5994_v23, %v5992_v21  ;;  %v6037_v21 = vld [vmem:[%s12145_s4 + $0x5e8] sm:$0xff]  ;;  %v6039_v23 = vld [vmem:[%s12145_s4 + $0x5f8] sm:$0xff] }
 0x397   : > { %7106 = vmatprep.subr.bf16.mxu1 %v7105_v25  ;;  %v7153_v25 = vpack.c.bf16 %v5999_v61, %v5997_v58  ;;  %v7193_v61 = vpack.c.bf16 %v6039_v23, %v6037_v21  ;;  %v6065_v21 = vld [vmem:[%s12145_s4 + $0x6a8] sm:$0xff]  ;;  %v6067_v23 = vld [vmem:[%s12145_s4 + $0x6b8] sm:$0xff] }
 0x39a   : > { %7108 = vmatpush1.bf16.msra.mxu1 %v7107_v29  ;;  %v7155_v29 = vpack.c.bf16 %v5998_v28, %v5996_v26  ;;  %v6045_v28 = vld [vmem:[%s12145_s4 + $0x608] sm:$0xff] }
 0x39b   : > { %7110 = vmatprep.subr.bf16.mxu1 %v7109_v30  ;;  %v7157_v30 = vpack.c.bf16 %v6003_v63, %v6001_v60  ;;  %v6047_v60 = vld [vmem:[%s12145_s4 + $0x618] sm:$0xff] }
 0x39c   : > { %v7205_v63 = vpack.c.bf16 %v6047_v60, %v6045_v28  ;;  %v6071_v28 = vld [vmem:[%s12145_s4 + $0x6d8] sm:$0xff] }
 0x39e   : > { %7112 = vmatpush1.bf16.msra.mxu1 %v7111_v34  ;;  %v7159_v34 = vpack.c.bf16 %v6002_v33, %v6000_v31 }
 0x39f   : > { %7114 = vmatprep.subr.bf16.mxu1 %v7113_v35  ;;  %v7161_v35 = vpack.c.bf16 %v6007_v57, %v6005_v62  ;;  %v2794_v62 = vld [vmem:[%s12146_s26 + $0x80] sm:$0xff]  ;;  %v2795_v57 = vld [vmem:[%s12146_s26 + $0x88] sm:$0xff] }
 0x3a2   : > { %7116 = vmatpush1.bf16.msra.mxu1 %v7115_v6  ;;  %v7163_v6 = vpack.c.bf16 %v6006_v38, %v6004_v36  ;;  %v2779_v36 = vld [vmem:[%s12146_s26 + $0x8] sm:$0xff]  ;;  %v2796_v38 = vld [vmem:[%s12146_s26 + $0x90] sm:$0xff] }
 0x3a3   : > { %7118 = vmatprep.subr.bf16.mxu1 %v7117_v55  ;;  %v7165_v55 = vpack.c.bf16 %v6011_v52, %v6009_v46  ;;  %v2797_v46 = vld [vmem:[%s12146_s26 + $0x98] sm:$0xff] }
 0x3a6   : > { %7120 = vmatpush1.bf16.msra.mxu1 %v7119_v40  ;;  %v7167_v40 = vpack.c.bf16 %v6010_v12, %v6008_v56  ;;  %v2781_v56 = vld [vmem:[%s12146_s26 + $0x18] sm:$0xff]  ;;  %v2798_v12 = vld [vmem:[%s12146_s26 + $0xa0] sm:$0xff] }
 0x3a7   : > { %7122 = vmatprep.subr.bf16.mxu1 %v7121_v9  ;;  %v7169_v9 = vpack.c.bf16 %v6015_v16, %v6013_v39  ;;  %v2799_v39 = vld [vmem:[%s12146_s26 + $0xa8] sm:$0xff] }
 0x3aa   : > { %7124 = vmatpush1.bf16.msra.mxu1 %v7123_v7  ;;  %v6017_v7 = vld [vmem:[%s12145_s4 + $0x548] sm:$0xff] }
 0x3ab   : > { %7126 = vmatprep.subr.bf16.mxu1 %v9032_v42  ;;  %v5976_v42 = vld [vmem:[%s12145_s4 + $0x400] sm:$0xff] }
 0x3ad   : > { %2270 = vmatmul.mubr.f32.vlgmr.msra.gmra.mrb[24].mxu1 %v9276_v2  ;;  %v5983_v2 = vld [vmem:[%s12145_s4 + $0x438] sm:$0xff] }
 0x3ae   : > { %2275 = vmatprep.mubr.f32.mxu1 %v9280_v5  ;;  %7128 = vmatpush1.bf16.msra.mxu1 %v9030_v27  ;;  %v5972_v27 = vld [vmem:[%s12144_s7 + $0x20] sm:$0xff]  ;;  %v7137_v5 = vpack.c.bf16 %v5983_v2, %v5981_v48  ;;  %v6021_v48 = vld [vmem:[%s12145_s4 + $0x568] sm:$0xff]  ;;  %v6023_v2 = vld [vmem:[%s12145_s4 + $0x578] sm:$0xff] }
 0x3af   : > { %7130 = vmatprep.subr.bf16.mxu1 %v9040_v59  ;;  %v7135_v59 = vpack.c.bf16 %v5978_v47, %v5976_v42  ;;  %v6016_v42 = vld [vmem:[%s12145_s4 + $0x540] sm:$0xff]  ;;  %v6018_v47 = vld [vmem:[%s12145_s4 + $0x550] sm:$0xff] }
 0x3b1   : > { %2276 = vmatmul.mubr.f32.gmra.mrb[26].mxu1 %v9278_v4  ;;  %v5987_v4 = vld [vmem:[%s12145_s4 + $0x458] sm:$0xff] }
 0x3b2   : > { %7132 = vmatpush1.bf16.msra.mxu1 %v9038_v54  ;;  %2355 = vmatprep.mubr.f32.mxu1 %v8117_v1  ;;  %v5985_v54 = vld [vmem:[%s12145_s4 + $0x448] sm:$0xff] }
 0x3b3   : > { %7134 = vmatprep.subr.bf16.mxu1 %v7133_v45  ;;  %v7141_v51 = vpack.c.bf16 %v5987_v4, %v5985_v54  ;;  %v7173_v45 = vpack.c.bf16 %v6019_v22, %v6017_v7  ;;  %v6027_v54 = vld [vmem:[%s12145_s4 + $0x598] sm:$0xff]  ;;  %v6044_v7 = vld [vmem:[%s12145_s4 + $0x600] sm:$0xff]  ;;  %v6046_v22 = vld [vmem:[%s12145_s4 + $0x610] sm:$0xff] }
 0x3b5   : > { %5974 = vmatmul.mubr.msk.f32.vlgmr.msra.gmra.mrb[28].mxu1 %vm1829_vm1, %v5972_v27  ;;  %v7175_v27 = vpack.c.bf16 %v6018_v47, %v6016_v42  ;;  %v7207_v47 = vpack.c.bf16 %v6046_v22, %v6044_v7  ;;  %v6078_v7 = vld [vmem:[%s12145_s4 + $0x710] sm:$0xff]  ;;  %v6081_v22 = vld [vmem:[%s12145_s4 + $0x728] sm:$0xff] }
 0x3b6   : > { %2361 = vmatprep.mubr.f32.mxu1 %v8117_v1  ;;  %7136 = vmatpush1.bf16.msra.mxu1 %v7135_v59  ;;  %v7177_v59 = vpack.c.bf16 %v6023_v2, %v6021_v48 }
 0x3b7   : > { %7138 = vmatprep.subr.bf16.mxu1 %v7137_v5  ;;  %v6020_v5 = vld [vmem:[%s12145_s4 + $0x560] sm:$0xff] }
 0x3b8   : > { %v7179_v4 = vpack.c.bf16 %v6022_v17, %v6020_v5  ;;  %v6053_v5 = vld [vmem:[%s12145_s4 + $0x648] sm:$0xff]  ;;  %v6055_v17 = vld [vmem:[%s12145_s4 + $0x658] sm:$0xff] }
 0x3b9   : > { %5975 = vmatmul.mubr.msk.f32.gmra.mrb[30].mxu1 %vm1829_vm1, %v5973_v49  ;;  %v7181_v49 = vpack.c.bf16 %v6027_v54, %v6025_v32 }
 0x3ba   : > { %7140 = vmatpush1.bf16.msra.mxu1 %v7139_v50  ;;  %v6024_v50 = vld [vmem:[%s12145_s4 + $0x580] sm:$0xff] }
 0x3bb   : > { %7142 = vmatprep.subr.bf16.mxu1 %v7141_v51  ;;  %v6026_v51 = vld [vmem:[%s12145_s4 + $0x590] sm:$0xff] }
 0x3bc   : > { %v7183_v3 = vpack.c.bf16 %v6026_v51, %v6024_v50  ;;  %v6054_v50 = vld [vmem:[%s12145_s4 + $0x650] sm:$0xff] }
 0x3be   : > { %7144 = vmatpush1.bf16.msra.mxu1 %v7143_v10  ;;  %v6028_v10 = vld [vmem:[%s12145_s4 + $0x5a0] sm:$0xff] }
 0x3bf   : > { %7146 = vmatprep.subr.bf16.mxu1 %v7145_v11  ;;  %v6030_v11 = vld [vmem:[%s12145_s4 + $0x5b0] sm:$0xff] }
 0x3c0   : > { %v7187_v15 = vpack.c.bf16 %v6030_v11, %v6028_v10  ;;  %v6056_v10 = vld [vmem:[%s12145_s4 + $0x660] sm:$0xff]  ;;  %v6058_v11 = vld [vmem:[%s12145_s4 + $0x670] sm:$0xff] }
 0x3c2   : > { %7148 = vmatpush1.bf16.msra.mxu1 %v7147_v19  ;;  %v6032_v19 = vld [vmem:[%s12145_s4 + $0x5c0] sm:$0xff] }
 0x3c3   : > { %7150 = vmatprep.subr.bf16.mxu1 %v7149_v20  ;;  %v6034_v20 = vld [vmem:[%s12145_s4 + $0x5d0] sm:$0xff] }
 0x3c4   : > { %v7191_v58 = vpack.c.bf16 %v6034_v20, %v6032_v19  ;;  %v6060_v19 = vld [vmem:[%s12145_s4 + $0x680] sm:$0xff]  ;;  %v6062_v20 = vld [vmem:[%s12145_s4 + $0x690] sm:$0xff] }
 0x3c6   : > { %7152 = vmatpush1.bf16.msra.mxu1 %v7151_v24  ;;  %v6036_v24 = vld [vmem:[%s12145_s4 + $0x5e0] sm:$0xff] }
 0x3c7   : > { %7154 = vmatprep.subr.bf16.mxu1 %v7153_v25  ;;  %v6038_v25 = vld [vmem:[%s12145_s4 + $0x5f0] sm:$0xff] }
 0x3c8   : > { %v7195_v26 = vpack.c.bf16 %v6038_v25, %v6036_v24  ;;  %v6064_v24 = vld [vmem:[%s12145_s4 + $0x6a0] sm:$0xff]  ;;  %v6066_v25 = vld [vmem:[%s12145_s4 + $0x6b0] sm:$0xff] }
 0x3c9   : > { %v7227_v60 = vpack.c.bf16 %v6066_v25, %v6064_v24  ;;  %v6100_v25 = vld [vmem:[%s12145_s4 + $0x7c0] sm:$0xff] }
 0x3ca   : > { %7156 = vmatpush1.bf16.msra.mxu1 %v7155_v29  ;;  %v9683_v29 = vpop.f32.mrb[24].mxu0 }
 0x3cb   : > { %7158 = vmatprep.subr.bf16.mxu1 %v7157_v30  ;;  %v2591_v30 = vpop.f32.mrb[25].mxu0 }
 0x3cc   : > { %v9685_v31 = vpop.f32.mrb[26].mxu0 }
 0x3cd   : > { %v9687_v33 = vpop.f32.mrb[27].mxu0 }
 0x3ce   : > { %7160 = vmatpush1.bf16.msra.mxu1 %v7159_v34  ;;  %v2778_v34 = vld [vmem:[%s12146_s26] sm:$0xff] }
 0x3cf   : > { %7162 = vmatprep.subr.bf16.mxu1 %v7161_v35  ;;  %v9698_v35 = vpack.c.bf16 %v2795_v57, %v2794_v62  ;;  %v9709_v52 = vpack.c.bf16 %v2779_v36, %v2778_v34  ;;  %v6070_v62 = vld [vmem:[%s12145_s4 + $0x6d0] sm:$0xff]  ;;  %v6073_v57 = vld [vmem:[%s12145_s4 + $0x6e8] sm:$0xff]  ;;  %v6075_v34 = vld [vmem:[%s12145_s4 + $0x6f8] sm:$0xff] }
 0x3d1   : > { %7270 = vmatprep.subr.bf16.mxu0 %v9698_v35 }
 0x3d2   : > { %7164 = vmatpush1.bf16.msra.mxu1 %v7163_v6  ;;  %v9711_v6 = vpack.c.bf16 %v2797_v46, %v2796_v38  ;;  %7272 = vmatpush3.bf16.msra.mxu0 %v9709_v52  ;;  %v7233_v38 = vpack.c.bf16 %v6075_v34, %v6073_v57  ;;  %v6072_v46 = vld [vmem:[%s12145_s4 + $0x6e0] sm:$0xff]  ;;  %v6106_v57 = vld [vmem:[%s12145_s4 + $0x7f0] sm:$0xff] }
 0x3d3   : > { %7166 = vmatprep.subr.bf16.mxu1 %v7165_v55  ;;  %v2780_v55 = vld [vmem:[%s12146_s26 + $0x10] sm:$0xff] }
 0x3d4   : > { %v9727_v16 = vpack.c.bf16 %v2781_v56, %v2780_v55  ;;  %7274 = vmatprep.subr.bf16.mxu0 %v9711_v6  ;;  %v6074_v55 = vld [vmem:[%s12145_s4 + $0x6f0] sm:$0xff]  ;;  %v6077_v56 = vld [vmem:[%s12145_s4 + $0x708] sm:$0xff] }
 0x3d6   : > { %7168 = vmatpush1.bf16.msra.mxu1 %v7167_v40  ;;  %v9730_v40 = vpack.c.bf16 %v2799_v39, %v2798_v12  ;;  %7276 = vmatpush3.bf16.msra.mxu0 %v9727_v16  ;;  %v6079_v12 = vld [vmem:[%s12145_s4 + $0x718] sm:$0xff]  ;;  %v7235_v39 = vpack.c.bf16 %v6074_v55, %v6072_v46  ;;  %v2802_v55 = vld [vmem:[%s12146_s26 + $0xc0] sm:$0xff] }
 0x3d7   : > { %7170 = vmatprep.subr.bf16.mxu1 %v7169_v9  ;;  %v2782_v9 = vld [vmem:[%s12146_s26 + $0x20] sm:$0xff] }
 0x3d8   : > { %v9739_v43 = vpack.c.bf16 %v2783_v41, %v2782_v9  ;;  %7278 = vmatprep.subr.bf16.mxu0 %v9730_v40  ;;  %v7237_v9 = vpack.c.bf16 %v6079_v12, %v6077_v56  ;;  %v6076_v41 = vld [vmem:[%s12145_s4 + $0x700] sm:$0xff]  ;;  %v2803_v56 = vld [vmem:[%s12146_s26 + $0xc8] sm:$0xff] }
 0x3d9   : > { %v9957_v12 = vpack.c.bf16 %v2803_v56, %v2802_v55 }
 0x3da   : > { %7172 = vmatpush1.bf16.msra.mxu1 %v7171_v44  ;;  %7280 = vmatpush3.bf16.msra.mxu0 %v9739_v43  ;;  %v6049_v44 = vld [vmem:[%s12145_s4 + $0x628] sm:$0xff] }
 0x3db   : > { %7174 = vmatprep.subr.bf16.mxu1 %v7173_v45  ;;  %v6051_v45 = vld [vmem:[%s12145_s4 + $0x638] sm:$0xff] }
 0x3dc   : > { %v7209_v2 = vpack.c.bf16 %v6051_v45, %v6049_v44  ;;  %v6083_v44 = vld [vmem:[%s12145_s4 + $0x738] sm:$0xff]  ;;  %v7239_v45 = vpack.c.bf16 %v6078_v7, %v6076_v41  ;;  %v2804_v7 = vld [vmem:[%s12146_s26 + $0xd0] sm:$0xff] }
 0x3de   : > { %7176 = vmatpush1.bf16.msra.mxu1 %v7175_v27  ;;  %v6048_v27 = vld [vmem:[%s12145_s4 + $0x620] sm:$0xff] }
 0x3df   : > { %7178 = vmatprep.subr.bf16.mxu1 %v7177_v59  ;;  %v6050_v59 = vld [vmem:[%s12145_s4 + $0x630] sm:$0xff] }
 0x3e0   : > { %v7211_v32 = vpack.c.bf16 %v6050_v59, %v6048_v27  ;;  %v6087_v27 = vld [vmem:[%s12145_s4 + $0x758] sm:$0xff] }
 0x3e2   : > { %7180 = vmatpush1.bf16.msra.mxu1 %v7179_v4  ;;  %v7213_v4 = vpack.c.bf16 %v6055_v17, %v6053_v5  ;;  %v6084_v17 = vld [vmem:[%s12145_s4 + $0x740] sm:$0xff] }
 0x3e3   : > { %7182 = vmatprep.subr.bf16.mxu1 %v7181_v49  ;;  %v6052_v49 = vld [vmem:[%s12145_s4 + $0x640] sm:$0xff] }
 0x3e6   : > { %7184 = vmatpush1.bf16.msra.mxu1 %v7183_v3  ;;  %v7215_v3 = vpack.c.bf16 %v6054_v50, %v6052_v49 }
 0x3e7   : > { %7186 = vmatprep.subr.bf16.mxu1 %v7185_v8  ;;  %v7217_v8 = vpack.c.bf16 %v6059_v0, %v6057_v53  ;;  %v6090_v53 = vld [vmem:[%s12145_s4 + $0x770] sm:$0xff]  ;;  %v6093_v0 = vld [vmem:[%s12145_s4 + $0x788] sm:$0xff] }
 0x3ea   : > { %7188 = vmatpush1.bf16.msra.mxu1 %v7187_v15  ;;  %v7219_v15 = vpack.c.bf16 %v6058_v11, %v6056_v10  ;;  %v6092_v11 = vld [vmem:[%s12145_s4 + $0x780] sm:$0xff] }
 0x3eb   : > { %7190 = vmatprep.subr.bf16.mxu1 %v7189_v18  ;;  %v7221_v18 = vpack.c.bf16 %v6063_v14, %v6061_v13  ;;  %v6094_v13 = vld [vmem:[%s12145_s4 + $0x790] sm:$0xff]  ;;  %v6097_v14 = vld [vmem:[%s12145_s4 + $0x7a8] sm:$0xff] }
 0x3ee   : > { %7192 = vmatpush1.bf16.msra.mxu1 %v7191_v58  ;;  %v7223_v58 = vpack.c.bf16 %v6062_v20, %v6060_v19  ;;  %v6096_v20 = vld [vmem:[%s12145_s4 + $0x7a0] sm:$0xff] }
 0x3ef   : > { %7194 = vmatprep.subr.bf16.mxu1 %v7193_v61  ;;  %v7225_v61 = vpack.c.bf16 %v6067_v23, %v6065_v21  ;;  %v6098_v21 = vld [vmem:[%s12145_s4 + $0x7b0] sm:$0xff]  ;;  %v6101_v23 = vld [vmem:[%s12145_s4 + $0x7c8] sm:$0xff] }
 0x3f2   : > { %7196 = vmatpush1.bf16.msra.mxu1 %v7195_v26  ;;  %v6069_v26 = vld [vmem:[%s12145_s4 + $0x6c8] sm:$0xff] }
 0x3f3   : > { %7206 = vmatprep.subr.bf16.mxu1 %v7205_v63  ;;  %v7229_v63 = vpack.c.bf16 %v6071_v28, %v6069_v26  ;;  %v6102_v26 = vld [vmem:[%s12145_s4 + $0x7d0] sm:$0xff]  ;;  %v6105_v28 = vld [vmem:[%s12145_s4 + $0x7e8] sm:$0xff] }
 0x488   : > { %v2357_v42 = vpop.f32.mrb[28].mxu1 }
 0x489   : > { %v2359_v48 = vpop.f32.mrb[29].mxu1 }
 0x48a   : > { %2497 = vmatprep.mubr.f32.mxu1 %v2359_v48  ;;  %v6082_v48 = vld [vmem:[%s12145_s4 + $0x730] sm:$0xff] }
 0x48b   : > { %2498 = vmatmul.mubr.f32.vlgmr.msra.gmra.mrb[24].mxu1 %v2357_v42  ;;  %v7241_v42 = vpack.c.bf16 %v6083_v44, %v6081_v22  ;;  %v2805_v22 = vld [vmem:[%s12146_s26 + $0xd8] sm:$0xff] }
 0x48c   : > { %7208 = vmatpush1.bf16.msra.mxu1 %v7207_v47  ;;  %v2363_v54 = vpop.f32.mrb[30].mxu1  ;;  %v6080_v47 = vld [vmem:[%s12145_s4 + $0x720] sm:$0xff]  ;;  %v9975_v44 = vpack.c.bf16 %v2805_v22, %v2804_v7 }
 0x48d   : > { %7210 = vmatprep.subr.bf16.mxu1 %v7209_v2  ;;  %v2365_v51 = vpop.f32.mrb[31].mxu1  ;;  %v6085_v2 = vld [vmem:[%s12145_s4 + $0x748] sm:$0xff]  ;;  %v7243_v59 = vpack.c.bf16 %v6082_v48, %v6080_v47  ;;  %v2806_v48 = vld [vmem:[%s12146_s26 + $0xe0] sm:$0xff] }
 0x48e   : > { %2503 = vmatprep.mubr.f32.mxu1 %v2365_v51  ;;  %v7245_v5 = vpack.c.bf16 %v6087_v27, %v6085_v2  ;;  %v6088_v51 = vld [vmem:[%s12145_s4 + $0x760] sm:$0xff]  ;;  %v2807_v2 = vld [vmem:[%s12146_s26 + $0xe8] sm:$0xff] }
 0x48f   : > { %2504 = vmatmul.mubr.f32.gmra.mrb[26].mxu1 %v2363_v54  ;;  %v6089_v54 = vld [vmem:[%s12145_s4 + $0x768] sm:$0xff]  ;;  %v7293_v27 = vpack.c.bf16 %v2807_v2, %v2806_v48 }
 0x490   : > { %7212 = vmatpush1.bf16.msra.mxu1 %v7211_v32  ;;  %2729 = vmatprep.mubr.f32.mxu1 %v2591_v30  ;;  %v6068_v30 = vld [vmem:[%s12145_s4 + $0x6c0] sm:$0xff]  ;;  %v6086_v32 = vld [vmem:[%s12145_s4 + $0x750] sm:$0xff] }
 0x491   : > { %7214 = vmatprep.subr.bf16.mxu1 %v7213_v4  ;;  %v7231_v36 = vpack.c.bf16 %v6070_v62, %v6068_v30  ;;  %v6091_v4 = vld [vmem:[%s12145_s4 + $0x778] sm:$0xff]  ;;  %v7247_v49 = vpack.c.bf16 %v6086_v32, %v6084_v17  ;;  %v6104_v62 = vld [vmem:[%s12145_s4 + $0x7e0] sm:$0xff]  ;;  %v2808_v32 = vld [vmem:[%s12146_s26 + $0xf0] sm:$0xff] }
 0x492   : > { %v7249_v50 = vpack.c.bf16 %v6091_v4, %v6089_v54  ;;  %v7267_v34 = vpack.c.bf16 %v6106_v57, %v6104_v62  ;;  %v2809_v54 = vld [vmem:[%s12146_s26 + $0xf8] sm:$0xff] }
 0x493   : > { %v7297_v4 = vpack.c.bf16 %v2809_v54, %v2808_v32  ;;  %v2958_v32 = vld [vmem:[%s12106_s9] sm:$0x1] }
 0x494   : > { %7216 = vmatpush1.bf16.msra.mxu1 %v7215_v3  ;;  %v6095_v3 = vld [vmem:[%s12145_s4 + $0x798] sm:$0xff] }
 0x495   : > { %7218 = vmatprep.subr.bf16.mxu1 %v7217_v8  ;;  %v7251_v8 = vpack.c.bf16 %v6090_v53, %v6088_v51  ;;  %v7253_v10 = vpack.c.bf16 %v6095_v3, %v6093_v0 }
 0x498   : > { %7220 = vmatpush1.bf16.msra.mxu1 %v7219_v15  ;;  %v6099_v15 = vld [vmem:[%s12145_s4 + $0x7b8] sm:$0xff] }
 0x499   : > { %7222 = vmatprep.subr.bf16.mxu1 %v7221_v18  ;;  %v7255_v18 = vpack.c.bf16 %v6094_v13, %v6092_v11  ;;  %v7257_v19 = vpack.c.bf16 %v6099_v15, %v6097_v14 }
 0x49c   : > { %7224 = vmatpush1.bf16.msra.mxu1 %v7223_v58  ;;  %v6103_v58 = vld [vmem:[%s12145_s4 + $0x7d8] sm:$0xff] }
 0x49d   : > { %7226 = vmatprep.subr.bf16.mxu1 %v7225_v61  ;;  %v7259_v61 = vpack.c.bf16 %v6098_v21, %v6096_v20  ;;  %v7261_v24 = vpack.c.bf16 %v6103_v58, %v6101_v23 }
 0x4a0   : > { %7228 = vmatpush1.bf16.msra.mxu1 %v7227_v60  ;;  %v6107_v60 = vld [vmem:[%s12145_s4 + $0x7f8] sm:$0xff] }
 0x4a1   : > { %7230 = vmatprep.subr.bf16.mxu1 %v7229_v63  ;;  %v7263_v63 = vpack.c.bf16 %v6102_v26, %v6100_v25  ;;  %v7265_v30 = vpack.c.bf16 %v6107_v60, %v6105_v28 }
 0x4a4   : > { %7232 = vmatpush1.bf16.msra.mxu1 %v7231_v36  ;;  %v2800_v36 = vld [vmem:[%s12146_s26 + $0xb0] sm:$0xff] }
 0x4a5   : > { %7234 = vmatprep.subr.bf16.mxu1 %v7233_v38  ;;  %v2801_v38 = vld [vmem:[%s12146_s26 + $0xb8] sm:$0xff] }
 0x4a6   : > { %v9939_v46 = vpack.c.bf16 %v2801_v38, %v2800_v36 }
 0x4a8   : > { %7236 = vmatpush1.bf16.msra.mxu1 %v7235_v39  ;;  %7282 = vmatprep.subr.bf16.mxu0 %v9939_v46  ;;  %v2786_v39 = vld [vmem:[%s12146_s26 + $0x40] sm:$0xff] }
 0x4a9   : > { %7238 = vmatprep.subr.bf16.mxu1 %v7237_v9  ;;  %v2787_v9 = vld [vmem:[%s12146_s26 + $0x48] sm:$0xff] }
 0x4aa   : > { %v9965_v41 = vpack.c.bf16 %v2787_v9, %v2786_v39 }
 0x4ac   : > { %7240 = vmatpush1.bf16.msra.mxu1 %v7239_v45  ;;  %v2788_v45 = vld [vmem:[%s12146_s26 + $0x50] sm:$0xff] }
 0x4ad   : > { %7242 = vmatprep.subr.bf16.mxu1 %v7241_v42  ;;  %v2789_v42 = vld [vmem:[%s12146_s26 + $0x58] sm:$0xff] }
 0x4ae   : > { %v9983_v47 = vpack.c.bf16 %v2789_v42, %v2788_v45 }
 0x4b0   : > { %7244 = vmatpush1.bf16.msra.mxu1 %v7243_v59  ;;  %v2790_v59 = vld [vmem:[%s12146_s26 + $0x60] sm:$0xff] }
 0x4b1   : > { %7246 = vmatprep.subr.bf16.mxu1 %v7245_v5  ;;  %v2791_v5 = vld [vmem:[%s12146_s26 + $0x68] sm:$0xff] }
 0x4b2   : > { %v7295_v17 = vpack.c.bf16 %v2791_v5, %v2790_v59  ;;  %v2954_v59 = vld [vmem:[%s12148_s8] sm:$0x1] }
 0x4b4   : > { %7248 = vmatpush1.bf16.msra.mxu1 %v7247_v49  ;;  %v2792_v49 = vld [vmem:[%s12146_s26 + $0x70] sm:$0xff] }
 0x4b5   : > { %7250 = vmatprep.subr.bf16.mxu1 %v7249_v50  ;;  %v2793_v50 = vld [vmem:[%s12146_s26 + $0x78] sm:$0xff] }
 0x4b6   : > { %v7299_v51 = vpack.c.bf16 %v2793_v50, %v2792_v49 }
 0x4b8   : > { %7252 = vmatpush1.bf16.msra.mxu1 %v7251_v8 }
 0x4b9   : > { %7254 = vmatprep.subr.bf16.mxu1 %v7253_v10 }
 0x4bc   : > { %7256 = vmatpush1.bf16.msra.mxu1 %v7255_v18 }
 0x4bd   : > { %7258 = vmatprep.subr.bf16.mxu1 %v7257_v19 }
 0x4c0   : > { %7260 = vmatpush1.bf16.msra.mxu1 %v7259_v61 }
 0x4c1   : > { %7262 = vmatprep.subr.bf16.mxu1 %v7261_v24 }
 0x4c4   : > { %7264 = vmatpush1.bf16.msra.mxu1 %v7263_v63 }
 0x4c5   : > { %7266 = vmatprep.subr.bf16.mxu1 %v7265_v30 }
 0x4c8   : > { %7268 = vmatpush1.bf16.msra.mxu1 %v7267_v34 }
 0x4cb   : > { %2730 = vmatmul.mubr.f32.vlgmr.msra.gmra.mrb[24].mxu1 %v9683_v29  ;;  %v2784_v29 = vld [vmem:[%s12146_s26 + $0x30] sm:$0xff] }
 0x4cc   : > { %2735 = vmatprep.mubr.f32.mxu1 %v9687_v33 }
 0x4cf   : > { %2736 = vmatmul.mubr.f32.gmra.mrb[26].mxu1 %v9685_v31  ;;  %v2785_v31 = vld [vmem:[%s12146_s26 + $0x38] sm:$0xff] }
 0x4d0   : > { %3637 = vmatprep.mubr.f32.mxu1 %v8117_v1  ;;  %v9947_v33 = vpack.c.bf16 %v2785_v31, %v2784_v29 }
 0x4d2   : > { %7284 = vmatpush3.bf16.msra.mxu0 %v9947_v33 }
 0x4d3   : > { %7286 = vmatprep.subr.bf16.mxu0 %v9957_v12 }
 0x4d6   : > { %7288 = vmatpush3.bf16.msra.mxu0 %v9965_v41 }
 0x4d7   : > { %7290 = vmatprep.subr.bf16.mxu0 %v9975_v44 }
 0x4da   : > { %7292 = vmatpush3.bf16.msra.mxu0 %v9983_v47 }
 0x4db   : > { %7294 = vmatprep.subr.bf16.mxu0 %v7293_v27 }
 0x4de   : > { %7296 = vmatpush3.bf16.msra.mxu0 %v7295_v17 }
 0x4df   : > { %7298 = vmatprep.subr.bf16.mxu0 %v7297_v4 }
 0x4e2   : > { %7300 = vmatpush3.bf16.msra.mxu0 %v7299_v51 }
 0x4e3   : > { %7302 = vmatprep.subr.bf16.mxu0 %v9698_v35 }
 0x59e   : > { %v10012_v53 = vpop.f32.mrb[24].mxu1 }
 0x59f   : > { %v10014_v0 = vpop.f32.mrb[25].mxu1  ;;  %v2760_v8 = vmul.f32 %v10012_v53, %v10012_v53 }
 0x5a0   : > { %v2761_v35 = vmul.f32 %v10014_v0, %v10014_v0 }
 0x5a2   : > { %v10016_v3 = vpop.f32.mrb[26].mxu1 }
 0x5a3   : > { %v2746_v10 = vadd.f32 %v10016_v3, %v10012_v53  ;;  %v2762_v11 = vmul.f32 %v10016_v3, %v10016_v3  ;;  %v10024_v13 = vpop.f32.mrb[27].mxu1 }
 0x5a4   : > { %v2753_v14 = vadd.f32 %v10024_v13, %v10014_v0  ;;  %v2763_v15 = vmul.f32 %v10024_v13, %v10024_v13 }
 0x5a5   : > { %v2747_v18 = vrot.slane %v2746_v10, 4  ;;  %v2764_v19 = vadd.f32 %v2762_v11, %v2760_v8 }
 0x5a6   : > { %v2754_v20 = vrot.slane %v2753_v14, 4  ;;  %v2771_v21 = vadd.f32 %v2763_v15, %v2761_v35 }
 0x5a7   : > { %v2748_v23 = vadd.f32 %v2747_v18, %v2746_v10  ;;  %v2765_v31 = vrot.slane %v2764_v19, 4 }
 0x5a8   : > { %v2755_v58 = vadd.f32 %v2754_v20, %v2753_v14  ;;  %v2772_v61 = vrot.slane %v2771_v21, 4 }
 0x5a9   : > { %v2749_v24 = vrot.slane %v2748_v23, 2  ;;  %v2766_v55 = vadd.f32 %v2765_v31, %v2764_v19  ;;  %v6118_v31 = vld [vmem:[%s12108_s11 + $0x228] sm:$0xff] }
 0x5aa   : > { %v2756_v25 = vrot.slane %v2755_v58, 2  ;;  %v2773_v26 = vadd.f32 %v2772_v61, %v2771_v21 }
 0x5ab   : > { %v2750_v28 = vadd.f32 %v2749_v24, %v2748_v23 }
 0x5ac   : > { %v2757_v60 = vadd.f32 %v2756_v25, %v2755_v58  ;;  %v2774_v63 = vrot.slane %v2773_v26, 2 }
 0x5ad   : > { %v2751_v30 = vrot.slane %v2750_v28, 1 }
 0x5ae   : > { %v2758_v62 = vrot.slane %v2757_v60, 1  ;;  %v2775_v57 = vadd.f32 %v2774_v63, %v2773_v26 }
 0x5af   : > { %v2752_v38 = vadd.f32 %v2751_v30, %v2750_v28  ;;  %v6114_v30 = vld [vmem:[%s12108_s11 + $0x208] sm:$0xff] }
 0x5b0   : > { %v2759_v34 = vadd.f32 %v2758_v62, %v2757_v60  ;;  %v2776_v36 = vrot.slane %v2775_v57, 1  ;;  %v6116_v62 = vld [vmem:[%s12108_s11 + $0x218] sm:$0xff] }
 0x5b2   : > { %2874 = vmatprep.mubr.f32.mxu0 %v2759_v34  ;;  %v2777_v29 = vadd.f32 %v2776_v36, %v2775_v57  ;;  %v3146_v57 = vld [vmem:[%s12107_s10] sm:$0xff]  ;;  %v6177_v34 = vld [vmem:[%s12107_s10 + $0x10] sm:$0xff]  ;;  %v7349_v36 = vpack.c.bf16 %v6116_v62, %v6114_v30  ;;  %v6154_v62 = vld [vmem:[%s12108_s11 + $0x348] sm:$0xff] }
 0x5b3   : > { %2875 = vmatmul.mubr.f32.vlgmr.msra.gmra.mrb[28].mxu0 %v2752_v38  ;;  %v6113_v38 = vld [vmem:[%s12108_s11 + $0x200] sm:$0xff]  ;;  %v6151_v30 = vld [vmem:[%s12108_s11 + $0x330] sm:$0xff] }
 0x5b4   : > { %7304 = vmatpush3.bf16.msra.mxu0 %v9709_v52  ;;  %2945 = vmatprep.mubr.f32.mxu0 %v2777_v29  ;;  %v2767_v52 = vrot.slane %v2766_v55, 2  ;;  %v6115_v29 = vld [vmem:[%s12108_s11 + $0x210] sm:$0xff] }
 0x5b5   : > { %7306 = vmatprep.subr.bf16.mxu0 %v9711_v6 }
 0x5b6   : > { %v2768_v6 = vadd.f32 %v2767_v52, %v2766_v55  ;;  %v6120_v55 = vld [vmem:[%s12108_s11 + $0x238] sm:$0xff]  ;;  %v6111_v52 = vld [vmem:[%s12107_s10 + $0x8] sm:$0xff] }
 0x5b8   : > { %7308 = vmatpush3.bf16.msra.mxu0 %v9727_v16  ;;  %v2769_v16 = vrot.slane %v2768_v6, 1 }
 0x5b9   : > { %7310 = vmatprep.subr.bf16.mxu0 %v9730_v40 }
 0x5ba   : > { %v2770_v40 = vadd.f32 %v2769_v16, %v2768_v6  ;;  %v7351_v6 = vpack.c.bf16 %v6115_v29, %v6113_v38  ;;  %v6243_v16 = vld [vmem:[%s12107_s10 + $0x18] sm:$0xff]  ;;  %v6153_v38 = vld [vmem:[%s12108_s11 + $0x340] sm:$0xff]  ;;  %v6155_v29 = vld [vmem:[%s12108_s11 + $0x350] sm:$0xff] }
 0x5bc   : > { %7312 = vmatpush3.bf16.msra.mxu0 %v9739_v43  ;;  %v2962_v43 = vld [vmem:[%s12147_s1 + $0x8] sm:$0xff] }
 0x5bd   : > { %7314 = vmatprep.subr.bf16.mxu0 %v9939_v46  ;;  %v2964_v46 = vld [vmem:[%s12147_s1 + $0x18] sm:$0xff] }
 0x5be   : > { %v7333_v56 = vpack.c.bf16 %v2964_v46, %v2962_v43  ;;  %v6117_v43 = vld [vmem:[%s12108_s11 + $0x220] sm:$0xff]  ;;  %v6119_v46 = vld [vmem:[%s12108_s11 + $0x230] sm:$0xff] }
 0x5c0   : > { %7316 = vmatpush3.bf16.msra.mxu0 %v9947_v33  ;;  %v2961_v33 = vld [vmem:[%s12147_s1] sm:$0xff] }
 0x5c1   : > { %7318 = vmatprep.subr.bf16.mxu0 %v9957_v12  ;;  %v2963_v12 = vld [vmem:[%s12147_s1 + $0x10] sm:$0xff] }
 0x5c2   : > { %v7335_v39 = vpack.c.bf16 %v2963_v12, %v2961_v33  ;;  %v6122_v33 = vld [vmem:[%s12108_s11 + $0x248] sm:$0xff]  ;;  %v7355_v12 = vpack.c.bf16 %v6119_v46, %v6117_v43  ;;  %v6164_v46 = vld [vmem:[%s12108_s11 + $0x398] sm:$0xff] }
 0x5c3   : > { %v6162_v43 = vld [vmem:[%s12108_s11 + $0x388] sm:$0xff] }
 0x5c4   : > { %7320 = vmatpush3.bf16.msra.mxu0 %v9965_v41 }
 0x5c5   : > { %7322 = vmatprep.subr.bf16.mxu0 %v9975_v44 }
 0x5c8   : > { %7324 = vmatpush3.bf16.msra.mxu0 %v9983_v47 }
 0x5c9   : > { %7326 = vmatprep.subr.bf16.mxu0 %v7293_v27 }
 0x5cc   : > { %7328 = vmatpush3.bf16.msra.mxu0 %v7295_v17 }
 0x5cd   : > { %7330 = vmatprep.subr.bf16.mxu0 %v7297_v4 }
 0x5d0   : > { %7332 = vmatpush3.bf16.msra.mxu0 %v7299_v51 }
 0x5d1   : > { %7334 = vmatprep.subr.bf16.mxu0 %v7333_v56 }
 0x5d3   : > { %2946 = vmatmul.mubr.f32.vlgmr.msra.gmra.mrb[30].mxu0 %v2770_v40  ;;  %v7353_v40 = vpack.c.bf16 %v6120_v55, %v6118_v31  ;;  %v6158_v31 = vld [vmem:[%s12108_s11 + $0x368] sm:$0xff]  ;;  %v6160_v55 = vld [vmem:[%s12108_s11 + $0x378] sm:$0xff] }
 0x5d4   : > { %3033 = vmatprep.mubr.f32.mxu0 %v8117_v1  ;;  %7336 = vmatpush1.bf16.msra.mxu0 %v7335_v39 }
 0x5d5   : > { %7338 = vmatprep.subr.bf16.mxu0 %v7333_v56  ;;  %v6124_v56 = vld [vmem:[%s12108_s11 + $0x258] sm:$0xff] }
 0x686   : > { %v6547_v9 = vpop.f32.mrb[28].mxu0 }
 0x687   : > { %v6548_v41 = vpop.f32.mrb[29].mxu0 }
 0x688   : > { %v6549_v7 = vadd.f32 %v6548_v41, %v6547_v9  ;;  %v6121_v9 = vld [vmem:[%s12108_s11 + $0x240] sm:$0xff]  ;;  %v6123_v41 = vld [vmem:[%s12108_s11 + $0x250] sm:$0xff] }
 0x68a   : > { %v2880_v22 = vmul.f32 0.00390625, %v6549_v7  ;;  %v6126_v7 = vld [vmem:[%s12108_s11 + $0x268] sm:$0xff] }
 0x68c   : > { %v2952_v47 = vmul.f32 %v2880_v22, %v2880_v22 }
 0x6a6   : > { %v6582_v44 = vpop.f32.mrb[30].mxu0 }
 0x6a7   : > { %v6583_v45 = vpop.f32.mrb[31].mxu0 }
 0x6a8   : > { %v6584_v42 = vadd.f32 %v6583_v45, %v6582_v44  ;;  %v7359_v44 = vpack.c.bf16 %v6123_v41, %v6121_v9  ;;  %v6166_v9 = vld [vmem:[%s12108_s11 + $0x3a8] sm:$0xff]  ;;  %v6168_v41 = vld [vmem:[%s12108_s11 + $0x3b8] sm:$0xff] }
 0x6aa   : > { %v2951_v48 = vmul.f32 0.00390625, %v6584_v42  ;;  %v6125_v42 = vld [vmem:[%s12108_s11 + $0x260] sm:$0xff] }
 0x6ac   : > { %v2953_v2 = vsub.f32 %v2951_v48, %v2952_v47  ;;  %v6127_v47 = vld [vmem:[%s12108_s11 + $0x270] sm:$0xff]  ;;  %v6130_v48 = vld [vmem:[%s12108_s11 + $0x288] sm:$0xff] }
 0x6ae   : > { %v2955_v27 = vadd.f32 1e-05, %v2953_v2  ;;  %v6132_v2 = vld [vmem:[%s12108_s11 + $0x298] sm:$0xff] }
 0x6b0   : > { %8103 = vrsqrt.f32 %v2955_v27  ;;  %v7363_v27 = vpack.c.bf16 %v6127_v47, %v6125_v42  ;;  %v6170_v42 = vld [vmem:[%s12108_s11 + $0x3c8] sm:$0xff]  ;;  %v6172_v47 = vld [vmem:[%s12108_s11 + $0x3d8] sm:$0xff] }
 0x6ba   : > { %v8104_v5 = vpop.eup %8103 }
 0x6bb   : > { %v2957_v17 = vmul.f32 %v8104_v5, %v2954_v59  ;;  %v7365_v59 = vpack.c.bf16 %v6132_v2, %v6130_v48  ;;  %v6129_v5 = vld [vmem:[%s12108_s11 + $0x280] sm:$0xff]  ;;  %v7405_v2 = vpack.c.bf16 %v6172_v47, %v6170_v42 }
 0x6bd   : > { %6108 = vmatmul.mubr.msk.f32.vlgmr.msra.gmra.mrb[32].mxu0 %vm2965_vm2, %v2957_v17  ;;  %v2959_v54 = vmul.f32 %v2957_v17, %v2880_v22  ;;  %v6128_v22 = vld [vmem:[%s12108_s11 + $0x278] sm:$0xff]  ;;  %v6131_v17 = vld [vmem:[%s12108_s11 + $0x290] sm:$0xff] }
 0x6be   : > { %7340 = vmatpush1.bf16.msra.mxu0 %v7335_v39  ;;  %3107 = vmatprep.mubr.f32.mxu0 %v8117_v1  ;;  %v7357_v39 = vpack.c.bf16 %v6124_v56, %v6122_v33  ;;  %v7361_v45 = vpack.c.bf16 %v6128_v22, %v6126_v7  ;;  %v7397_v56 = vpack.c.bf16 %v6164_v46, %v6162_v43 }
 0x6bf   : > { %v2960_v4 = vsub.f32 %v2958_v32, %v2959_v54  ;;  %v6134_v32 = vld [vmem:[%s12108_s11 + $0x2a8] sm:$0xff]  ;;  %v6136_v54 = vld [vmem:[%s12108_s11 + $0x2b8] sm:$0xff]  ;;  %v7401_v22 = vpack.c.bf16 %v6168_v41, %v6166_v9 }
 0x6c1   : > { %6109 = vmatmul.mubr.msk.f32.vlgmr.msra.gmra.mrb[34].mxu0 %vm2965_vm2, %v2960_v4  ;;  %v7367_v4 = vpack.c.bf16 %v6131_v17, %v6129_v5  ;;  %v6174_v17 = vld [vmem:[%s12108_s11 + $0x3e8] sm:$0xff] }
 0x6c2   : > { %3214 = vmatprep.mubr.f32.mxu0 %v8117_v1 }
 0x790   : > { %v3035_v49 = vpop.f32.mrb[32].mxu0 }
 0x791   : > { %v3117_v50 = vrot.slane %v3035_v49, %v9024_v37  ;;  %v3037_v51 = vpop.f32.mrb[33].mxu0  ;;  %v7369_v49 = vpack.c.bf16 %v6136_v54, %v6134_v32  ;;  %v6176_v32 = vld [vmem:[%s12108_s11 + $0x3f8] sm:$0xff] }
 0x792   : > { %v3121_v8 = vrot.slane %v3037_v51, %v9024_v37  ;;  %v6135_v51 = vld [vmem:[%s12108_s11 + $0x2b0] sm:$0xff]  ;;  %v7409_v54 = vpack.c.bf16 %v6176_v32, %v6174_v17  ;;  %v3253_v32 = vld [vmem:[%s12108_s11 + $0x100] sm:$0xff] }
 0x793   : > { %v3122_v10 = vmul.f32 %v3117_v50, %v10012_v53  ;;  %v3124_v11 = vmul.f32 %v3117_v50, %v10016_v3  ;;  %v6133_v50 = vld [vmem:[%s12108_s11 + $0x2a0] sm:$0xff] }
 0x794   : > { %v3123_v35 = vmul.f32 %v3121_v8, %v10014_v0  ;;  %v3125_v14 = vmul.f32 %v3121_v8, %v10024_v13  ;;  %v3109_v15 = vpop.f32.mrb[34].mxu0  ;;  %v6138_v8 = vld [vmem:[%s12108_s11 + $0x2c8] sm:$0xff] }
 0x795   : > { %v3129_v18 = vrot.slane %v3109_v15, %v9024_v37  ;;  %v3111_v19 = vpop.f32.mrb[35].mxu0  ;;  %v6139_v15 = vld [vmem:[%s12108_s11 + $0x2d0] sm:$0xff] }
 0x796   : > { %v3133_v20 = vrot.slane %v3111_v19, %v9024_v37  ;;  %v6144_v19 = vld [vmem:[%s12108_s11 + $0x2f8] sm:$0xff] }
 0x797   : > { %v3134_v21 = vadd.f32 %v3129_v18, %v3122_v10  ;;  %v3136_v23 = vadd.f32 %v3129_v18, %v3124_v11  ;;  %v6140_v10 = vld [vmem:[%s12108_s11 + $0x2d8] sm:$0xff]  ;;  %v7371_v11 = vpack.c.bf16 %v6135_v51, %v6133_v50  ;;  %v6142_v18 = vld [vmem:[%s12108_s11 + $0x2e8] sm:$0xff] }
 0x798   : > { %v3135_v58 = vadd.f32 %v3133_v20, %v3123_v35  ;;  %v3137_v61 = vadd.f32 %v3133_v20, %v3125_v14  ;;  %v7373_v35 = vpack.c.bf16 %v6140_v10, %v6138_v8  ;;  %v6137_v14 = vld [vmem:[%s12108_s11 + $0x2c0] sm:$0xff]  ;;  %v3222_v51 = vld [vmem:[%s12108_s11 + $0x8] sm:$0xff]  ;;  %v3224_v8 = vld [vmem:[%s12108_s11 + $0x18] sm:$0xff] }
 0x799   : > { %v3138_v24 = vmul.f32 0.2, %v3134_v21  ;;  %v3140_v25 = vmul.f32 0.2, %v3136_v23  ;;  %v7375_v20 = vpack.c.bf16 %v6139_v15, %v6137_v14  ;;  %v7413_v10 = vpack.c.bf16 %v3224_v8, %v3222_v51  ;;  %v3221_v14 = vld [vmem:[%s12108_s11] sm:$0xff]  ;;  %v3223_v15 = vld [vmem:[%s12108_s11 + $0x10] sm:$0xff] }
 0x79a   : > { %v3139_v26 = vmul.f32 0.2, %v3135_v58  ;;  %v3141_v53 = vmul.f32 0.2, %v3137_v61  ;;  %v3257_v8 = vld [vmem:[%s12108_s11 + $0x120] sm:$0xff] }
 0x79b   : > { %v3142_v28 = vmax.f32 %v3134_v21, %v3138_v24  ;;  %v3144_v3 = vmax.f32 %v3136_v23, %v3140_v25  ;;  %v7377_v21 = vpack.c.bf16 %v6144_v19, %v6142_v18  ;;  %v6141_v23 = vld [vmem:[%s12108_s11 + $0x2e0] sm:$0xff]  ;;  %v6148_v24 = vld [vmem:[%s12108_s11 + $0x318] sm:$0xff]  ;;  %v3226_v18 = vld [vmem:[%s12108_s11 + $0x28] sm:$0xff] }
 0x79c   : > { %v3143_v60 = vmax.f32 %v3135_v58, %v3139_v26  ;;  %v3145_v0 = vmax.f32 %v3137_v61, %v3141_v53  ;;  %v6143_v58 = vld [vmem:[%s12108_s11 + $0x2f0] sm:$0xff]  ;;  %v6146_v61 = vld [vmem:[%s12108_s11 + $0x308] sm:$0xff]  ;;  %v6145_v53 = vld [vmem:[%s12108_s11 + $0x300] sm:$0xff] }
 0x79d   : > { %v7343_v63 = vpack.c.bf16 %v3144_v3, %v3142_v28  ;;  %v7379_v25 = vpack.c.bf16 %v6143_v58, %v6141_v23  ;;  %v7381_v26 = vpack.c.bf16 %v6148_v24, %v6146_v61  ;;  %v6147_v28 = vld [vmem:[%s12108_s11 + $0x310] sm:$0xff]  ;;  %v6150_v3 = vld [vmem:[%s12108_s11 + $0x328] sm:$0xff]  ;;  %v3228_v19 = vld [vmem:[%s12108_s11 + $0x38] sm:$0xff] }
 0x79e   : > { %v7341_v13 = vpack.c.bf16 %v3145_v0, %v3143_v60  ;;  %v6152_v60 = vld [vmem:[%s12108_s11 + $0x338] sm:$0xff]  ;;  %v7383_v0 = vpack.c.bf16 %v6147_v28, %v6145_v53  ;;  %v7417_v61 = vpack.c.bf16 %v3228_v19, %v3226_v18  ;;  %v3225_v24 = vld [vmem:[%s12108_s11 + $0x20] sm:$0xff]  ;;  %v3230_v53 = vld [vmem:[%s12108_s11 + $0x48] sm:$0xff] }
 0x79f   : > { %v3232_v28 = vld [vmem:[%s12108_s11 + $0x58] sm:$0xff]  ;;  %v3261_v19 = vld [vmem:[%s12108_s11 + $0x140] sm:$0xff] }
 0x7a0   : > { %7342 = vmatprep.subr.bf16.mxu0 %v7341_v13  ;;  %7478 = vmatprep.subr.bf16.mxu1 %v7341_v13 }
 0x7a1   : > { %7344 = vmatpush1.bf16.msra.mxu0 %v7343_v63  ;;  %7480 = vmatpush1.bf16.msra.mxu1 %v7343_v63 }
 0x7a2   : > { %7346 = vmatprep.subr.bf16.mxu0 %v7341_v13  ;;  %7546 = vmatprep.subr.bf16.mxu1 %v7341_v13  ;;  %v6149_v13 = vld [vmem:[%s12108_s11 + $0x320] sm:$0xff] }
 0x7a4   : > { %6110 = vmatmul.mubr.msk.f32.vlgmr.msra.gmra.mrb[36].mxu0 %vm2965_vm2, %v3146_v57  ;;  %6178 = vmatmul.mubr.msk.f32.vlgmr.msra.gmra.mrb[32].mxu1 %vm2965_vm2, %v6177_v34  ;;  %v6156_v57 = vld [vmem:[%s12108_s11 + $0x358] sm:$0xff]  ;;  %v7387_v34 = vpack.c.bf16 %v6151_v30, %v6149_v13  ;;  %v3234_v13 = vld [vmem:[%s12108_s11 + $0x68] sm:$0xff] }
 0x7a5   : > { %7348 = vmatpush1.bf16.msra.mxu0 %v7343_v63  ;;  %7548 = vmatpush1.bf16.msra.mxu1 %v7343_v63  ;;  %v7385_v63 = vpack.c.bf16 %v6152_v60, %v6150_v3  ;;  %v7421_v60 = vpack.c.bf16 %v3232_v28, %v3230_v53  ;;  %v3236_v30 = vld [vmem:[%s12108_s11 + $0x78] sm:$0xff]  ;;  %v3267_v53 = vld [vmem:[%s12108_s11 + $0x170] sm:$0xff]  ;;  %v3270_v28 = vld [vmem:[%s12108_s11 + $0x188] sm:$0xff] }
 0x7a6   : > { %3354 = vmatprep.mubr.f32.mxu0 %v8117_v1  ;;  %7350 = vmatprep.subr.bf16.mxu0 %v7349_v36  ;;  %v7389_v36 = vpack.c.bf16 %v6156_v57, %v6154_v62  ;;  %v7425_v57 = vpack.c.bf16 %v3236_v30, %v3234_v13  ;;  %v3271_v13 = vld [vmem:[%s12108_s11 + $0x190] sm:$0xff]  ;;  %v3274_v30 = vld [vmem:[%s12108_s11 + $0x1a8] sm:$0xff] }
 0x7a7   : > { %3851 = vmatprep.mubr.f32.mxu1 %v8117_v1 }
 0x7a8   : > { %6112 = vmatmul.mubr.msk.f32.vlgmr.msra.gmra.mrb[38].mxu0 %vm2965_vm2, %v6111_v52  ;;  %6244 = vmatmul.mubr.msk.f32.vlgmr.msra.gmra.mrb[34].mxu1 %vm2965_vm2, %v6243_v16  ;;  %v7391_v52 = vpack.c.bf16 %v6155_v29, %v6153_v38  ;;  %v6157_v16 = vld [vmem:[%s12108_s11 + $0x360] sm:$0xff]  ;;  %v3238_v38 = vld [vmem:[%s12108_s11 + $0x88] sm:$0xff]  ;;  %v3240_v29 = vld [vmem:[%s12108_s11 + $0x98] sm:$0xff] }
 0x7a9   : > { %7352 = vmatpush1.bf16.msra.mxu0 %v7351_v6  ;;  %v7393_v6 = vpack.c.bf16 %v6160_v55, %v6158_v31  ;;  %v7429_v55 = vpack.c.bf16 %v3240_v29, %v3238_v38  ;;  %v3275_v38 = vld [vmem:[%s12108_s11 + $0x1b0] sm:$0xff]  ;;  %v3278_v29 = vld [vmem:[%s12108_s11 + $0x1c8] sm:$0xff] }
 0x7aa   : > { %7354 = vmatprep.subr.bf16.mxu0 %v7353_v40  ;;  %v6159_v40 = vld [vmem:[%s12108_s11 + $0x370] sm:$0xff] }
 0x7ab   : > { %v7395_v33 = vpack.c.bf16 %v6159_v40, %v6157_v16  ;;  %v3242_v16 = vld [vmem:[%s12108_s11 + $0xa8] sm:$0xff]  ;;  %v3244_v40 = vld [vmem:[%s12108_s11 + $0xb8] sm:$0xff] }
 0x7ac   : > { %v7433_v46 = vpack.c.bf16 %v3244_v40, %v3242_v16  ;;  %v3279_v16 = vld [vmem:[%s12108_s11 + $0x1d0] sm:$0xff]  ;;  %v3282_v40 = vld [vmem:[%s12108_s11 + $0x1e8] sm:$0xff] }
 0x7ad   : > { %7356 = vmatpush1.bf16.msra.mxu0 %v7355_v12  ;;  %v6161_v12 = vld [vmem:[%s12108_s11 + $0x380] sm:$0xff] }
 0x7ae   : > { %7358 = vmatprep.subr.bf16.mxu0 %v7357_v39  ;;  %v6163_v39 = vld [vmem:[%s12108_s11 + $0x390] sm:$0xff] }
 0x7af   : > { %v7399_v7 = vpack.c.bf16 %v6163_v39, %v6161_v12  ;;  %v3246_v12 = vld [vmem:[%s12108_s11 + $0xc8] sm:$0xff]  ;;  %v3248_v39 = vld [vmem:[%s12108_s11 + $0xd8] sm:$0xff] }
 0x7b0   : > { %v7437_v41 = vpack.c.bf16 %v3248_v39, %v3246_v12  ;;  %v3283_v12 = vld [vmem:[%s12108_s11 + $0x1f0] sm:$0xff]  ;;  %v6180_v39 = vld [vmem:[%s12108_s11 + $0x408] sm:$0xff] }
 0x7b1   : > { %7360 = vmatpush1.bf16.msra.mxu0 %v7359_v44  ;;  %v6165_v44 = vld [vmem:[%s12108_s11 + $0x3a0] sm:$0xff] }
 0x7b2   : > { %7362 = vmatprep.subr.bf16.mxu0 %v7361_v45  ;;  %v6167_v45 = vld [vmem:[%s12108_s11 + $0x3b0] sm:$0xff] }
 0x7b3   : > { %v7403_v48 = vpack.c.bf16 %v6167_v45, %v6165_v44  ;;  %v3250_v44 = vld [vmem:[%s12108_s11 + $0xe8] sm:$0xff]  ;;  %v3252_v45 = vld [vmem:[%s12108_s11 + $0xf8] sm:$0xff] }
 0x7b4   : > { %v7441_v47 = vpack.c.bf16 %v3252_v45, %v3250_v44  ;;  %v6181_v44 = vld [vmem:[%s12108_s11 + $0x410] sm:$0xff] }
 0x7b5   : > { %7364 = vmatpush1.bf16.msra.mxu0 %v7363_v27  ;;  %v6169_v27 = vld [vmem:[%s12108_s11 + $0x3c0] sm:$0xff] }
 0x7b6   : > { %7366 = vmatprep.subr.bf16.mxu0 %v7365_v59  ;;  %v6171_v59 = vld [vmem:[%s12108_s11 + $0x3d0] sm:$0xff] }
 0x7b7   : > { %v7407_v5 = vpack.c.bf16 %v6171_v59, %v6169_v27  ;;  %v3254_v27 = vld [vmem:[%s12108_s11 + $0x108] sm:$0xff]  ;;  %v3256_v59 = vld [vmem:[%s12108_s11 + $0x118] sm:$0xff] }
 0x7b8   : > { %v7445_v17 = vpack.c.bf16 %v3256_v59, %v3254_v27  ;;  %v6183_v59 = vld [vmem:[%s12108_s11 + $0x420] sm:$0xff] }
 0x7b9   : > { %7368 = vmatpush1.bf16.msra.mxu0 %v7367_v4  ;;  %v6173_v4 = vld [vmem:[%s12108_s11 + $0x3e0] sm:$0xff] }
 0x7ba   : > { %7370 = vmatprep.subr.bf16.mxu0 %v7369_v49  ;;  %v6175_v49 = vld [vmem:[%s12108_s11 + $0x3f0] sm:$0xff] }
 0x7bb   : > { %v7411_v50 = vpack.c.bf16 %v6175_v49, %v6173_v4  ;;  %v3258_v4 = vld [vmem:[%s12108_s11 + $0x128] sm:$0xff]  ;;  %v3260_v49 = vld [vmem:[%s12108_s11 + $0x138] sm:$0xff] }
 0x7bc   : > { %v7449_v51 = vpack.c.bf16 %v3260_v49, %v3258_v4  ;;  %v6189_v4 = vld [vmem:[%s12108_s11 + $0x450] sm:$0xff]  ;;  %v4038_v49 = vld [vmem:[%s12109_s12 + $0x80] sm:$0xff] }
 0x7bd   : > { %7372 = vmatpush1.bf16.msra.mxu0 %v7371_v11 }
 0x7be   : > { %7374 = vmatprep.subr.bf16.mxu0 %v7373_v35 }
 0x7c1   : > { %7376 = vmatpush1.bf16.msra.mxu0 %v7375_v20 }
 0x7c2   : > { %7378 = vmatprep.subr.bf16.mxu0 %v7377_v21  ;;  %v7415_v21 = vpack.c.bf16 %v3223_v15, %v3221_v14  ;;  %v3264_v14 = vld [vmem:[%s12108_s11 + $0x158] sm:$0xff] }
 0x7c5   : > { %7380 = vmatpush1.bf16.msra.mxu0 %v7379_v25  ;;  %v3227_v25 = vld [vmem:[%s12108_s11 + $0x30] sm:$0xff] }
 0x7c6   : > { %7382 = vmatprep.subr.bf16.mxu0 %v7381_v26  ;;  %v7419_v3 = vpack.c.bf16 %v3227_v25, %v3225_v24  ;;  %v3265_v25 = vld [vmem:[%s12108_s11 + $0x160] sm:$0xff] }
 0x7c9   : > { %7384 = vmatpush1.bf16.msra.mxu0 %v7383_v0  ;;  %v3229_v0 = vld [vmem:[%s12108_s11 + $0x40] sm:$0xff] }
 0x7ca   : > { %7386 = vmatprep.subr.bf16.mxu0 %v7385_v63  ;;  %v3231_v63 = vld [vmem:[%s12108_s11 + $0x50] sm:$0xff] }
 0x7cb   : > { %v7423_v62 = vpack.c.bf16 %v3231_v63, %v3229_v0  ;;  %v3269_v63 = vld [vmem:[%s12108_s11 + $0x180] sm:$0xff] }
 0x7cd   : > { %7388 = vmatpush1.bf16.msra.mxu0 %v7387_v34  ;;  %v3233_v34 = vld [vmem:[%s12108_s11 + $0x60] sm:$0xff] }
 0x7ce   : > { %7390 = vmatprep.subr.bf16.mxu0 %v7389_v36  ;;  %v3235_v36 = vld [vmem:[%s12108_s11 + $0x70] sm:$0xff] }
 0x7cf   : > { %v7427_v31 = vpack.c.bf16 %v3235_v36, %v3233_v34  ;;  %v3273_v36 = vld [vmem:[%s12108_s11 + $0x1a0] sm:$0xff] }
 0x7d1   : > { %7392 = vmatpush1.bf16.msra.mxu0 %v7391_v52  ;;  %v3237_v52 = vld [vmem:[%s12108_s11 + $0x80] sm:$0xff] }
 0x7d2   : > { %7394 = vmatprep.subr.bf16.mxu0 %v7393_v6  ;;  %v3239_v6 = vld [vmem:[%s12108_s11 + $0x90] sm:$0xff] }
 0x7d3   : > { %v7431_v43 = vpack.c.bf16 %v3239_v6, %v3237_v52  ;;  %v3277_v6 = vld [vmem:[%s12108_s11 + $0x1c0] sm:$0xff] }
 0x7d5   : > { %7396 = vmatpush1.bf16.msra.mxu0 %v7395_v33  ;;  %v3241_v33 = vld [vmem:[%s12108_s11 + $0xa0] sm:$0xff] }
 0x7d6   : > { %7398 = vmatprep.subr.bf16.mxu0 %v7397_v56  ;;  %v3243_v56 = vld [vmem:[%s12108_s11 + $0xb0] sm:$0xff] }
 0x7d7   : > { %v7435_v9 = vpack.c.bf16 %v3243_v56, %v3241_v33  ;;  %v3281_v56 = vld [vmem:[%s12108_s11 + $0x1e0] sm:$0xff] }
 0x7d9   : > { %7400 = vmatpush1.bf16.msra.mxu0 %v7399_v7  ;;  %v3245_v7 = vld [vmem:[%s12108_s11 + $0xc0] sm:$0xff] }
 0x7da   : > { %7402 = vmatprep.subr.bf16.mxu0 %v7401_v22  ;;  %v3247_v22 = vld [vmem:[%s12108_s11 + $0xd0] sm:$0xff] }
 0x7db   : > { %v7439_v42 = vpack.c.bf16 %v3247_v22, %v3245_v7  ;;  %v6179_v22 = vld [vmem:[%s12108_s11 + $0x400] sm:$0xff] }
 0x7dd   : > { %7404 = vmatpush1.bf16.msra.mxu0 %v7403_v48  ;;  %v3249_v48 = vld [vmem:[%s12108_s11 + $0xe0] sm:$0xff] }
 0x7de   : > { %7406 = vmatprep.subr.bf16.mxu0 %v7405_v2  ;;  %v3251_v2 = vld [vmem:[%s12108_s11 + $0xf0] sm:$0xff] }
 0x7e1   : > { %7408 = vmatpush1.bf16.msra.mxu0 %v7407_v5  ;;  %v7443_v5 = vpack.c.bf16 %v3251_v2, %v3249_v48  ;;  %v7483_v48 = vpack.c.bf16 %v6181_v44, %v6179_v22  ;;  %v6199_v22 = vld [vmem:[%s12108_s11 + $0x4a0] sm:$0xff]  ;;  %v6201_v44 = vld [vmem:[%s12108_s11 + $0x4b0] sm:$0xff] }
 0x7e2   : > { %7410 = vmatprep.subr.bf16.mxu0 %v7409_v54  ;;  %v3255_v54 = vld [vmem:[%s12108_s11 + $0x110] sm:$0xff] }
 0x7e5   : > { %7412 = vmatpush1.bf16.msra.mxu0 %v7411_v50  ;;  %v7447_v50 = vpack.c.bf16 %v3255_v54, %v3253_v32  ;;  %v6190_v32 = vld [vmem:[%s12108_s11 + $0x458] sm:$0xff]  ;;  %v6187_v54 = vld [vmem:[%s12108_s11 + $0x440] sm:$0xff] }
 0x7e6   : > { %7414 = vmatprep.subr.bf16.mxu0 %v7413_v10  ;;  %v3259_v10 = vld [vmem:[%s12108_s11 + $0x130] sm:$0xff] }
 0x7e7   : > { %v7451_v15 = vpack.c.bf16 %v3259_v10, %v3257_v8  ;;  %v4023_v10 = vld [vmem:[%s12109_s12 + $0x8] sm:$0xff] }
 0x877   : > { %v10290_v11 = vpop.f32.mrb[36].mxu0  ;;  %v10304_v23 = vpop.f32.mrb[32].mxu1 }
 0x878   : > { %v3218_v35 = vpop.f32.mrb[37].mxu0  ;;  %v10312_v26 = vpop.f32.mrb[33].mxu1 }
 0x87b   : > { %v3356_v20 = vpop.f32.mrb[38].mxu0  ;;  %v10494_v45 = vpop.f32.mrb[34].mxu1 }
 0x87c   : > { %v3358_v58 = vpop.f32.mrb[39].mxu0  ;;  %v10502_v2 = vpop.f32.mrb[35].mxu1 }
 0x87d   : > { %3490 = vmatprep.mubr.f32.mxu0 %v3358_v58  ;;  %v3268_v58 = vld [vmem:[%s12108_s11 + $0x178] sm:$0xff] }
 0x87e   : > { %3491 = vmatmul.mubr.f32.vlgmr.msra.gmra.mrb[40].mxu0 %v3356_v20  ;;  %v3263_v20 = vld [vmem:[%s12108_s11 + $0x150] sm:$0xff] }
 0x87f   : > { %7416 = vmatpush1.bf16.msra.mxu0 %v7415_v21  ;;  %3561 = vmatprep.mubr.f32.mxu0 %v3218_v35  ;;  %v3262_v35 = vld [vmem:[%s12108_s11 + $0x148] sm:$0xff] }
 0x880   : > { %7418 = vmatprep.subr.bf16.mxu0 %v7417_v61  ;;  %v7453_v18 = vpack.c.bf16 %v3264_v14, %v3262_v35  ;;  %v3266_v21 = vld [vmem:[%s12108_s11 + $0x168] sm:$0xff]  ;;  %v7455_v61 = vpack.c.bf16 %v3263_v20, %v3261_v19  ;;  %v4040_v35 = vld [vmem:[%s12109_s12 + $0x90] sm:$0xff]  ;;  %v4041_v14 = vld [vmem:[%s12109_s12 + $0x98] sm:$0xff] }
 0x881   : > { %v7457_v24 = vpack.c.bf16 %v3268_v58, %v3266_v21  ;;  %v10546_v19 = vpack.c.bf16 %v4041_v14, %v4040_v35  ;;  %v4025_v20 = vld [vmem:[%s12109_s12 + $0x18] sm:$0xff]  ;;  %v4042_v21 = vld [vmem:[%s12109_s12 + $0xa0] sm:$0xff]  ;;  %v6192_v58 = vld [vmem:[%s12108_s11 + $0x468] sm:$0xff] }
 0x883   : > { %7420 = vmatpush1.bf16.msra.mxu0 %v7419_v3  ;;  %v3272_v3 = vld [vmem:[%s12108_s11 + $0x198] sm:$0xff] }
 0x884   : > { %7422 = vmatprep.subr.bf16.mxu0 %v7421_v60  ;;  %v7459_v60 = vpack.c.bf16 %v3267_v53, %v3265_v25  ;;  %v7461_v0 = vpack.c.bf16 %v3272_v3, %v3270_v28  ;;  %v7491_v53 = vpack.c.bf16 %v6189_v4, %v6187_v54  ;;  %v6191_v28 = vld [vmem:[%s12108_s11 + $0x460] sm:$0xff]  ;;  %v6210_v54 = vld [vmem:[%s12108_s11 + $0x4f8] sm:$0xff] }
 0x887   : > { %7424 = vmatpush1.bf16.msra.mxu0 %v7423_v62  ;;  %v3276_v62 = vld [vmem:[%s12108_s11 + $0x1b8] sm:$0xff] }
 0x888   : > { %7426 = vmatprep.subr.bf16.mxu0 %v7425_v57  ;;  %v7463_v57 = vpack.c.bf16 %v3271_v13, %v3269_v63  ;;  %v7465_v34 = vpack.c.bf16 %v3276_v62, %v3274_v30  ;;  %v6193_v13 = vld [vmem:[%s12108_s11 + $0x470] sm:$0xff]  ;;  %v4045_v62 = vld [vmem:[%s12109_s12 + $0xb8] sm:$0xff] }
 0x889   : > { %v4044_v30 = vld [vmem:[%s12109_s12 + $0xb0] sm:$0xff] }
 0x88b   : > { %7428 = vmatpush1.bf16.msra.mxu0 %v7427_v31  ;;  %v3280_v31 = vld [vmem:[%s12108_s11 + $0x1d8] sm:$0xff] }
 0x88c   : > { %7430 = vmatprep.subr.bf16.mxu0 %v7429_v55  ;;  %v7467_v55 = vpack.c.bf16 %v3275_v38, %v3273_v36  ;;  %v7469_v52 = vpack.c.bf16 %v3280_v31, %v3278_v29  ;;  %v7495_v38 = vpack.c.bf16 %v6193_v13, %v6191_v28  ;;  %v6195_v29 = vld [vmem:[%s12108_s11 + $0x480] sm:$0xff]  ;;  %v10604_v31 = vpack.c.bf16 %v4045_v62, %v4044_v30  ;;  %v6220_v28 = vld [vmem:[%s12108_s11 + $0x548] sm:$0xff]  ;;  %v6221_v30 = vld [vmem:[%s12108_s11 + $0x550] sm:$0xff] }
 0x88d   : > { %v6219_v13 = vld [vmem:[%s12108_s11 + $0x540] sm:$0xff]  ;;  %v6224_v62 = vld [vmem:[%s12108_s11 + $0x568] sm:$0xff] }
 0x88f   : > { %7432 = vmatpush1.bf16.msra.mxu0 %v7431_v43  ;;  %v3284_v43 = vld [vmem:[%s12108_s11 + $0x1f8] sm:$0xff] }
 0x890   : > { %7434 = vmatprep.subr.bf16.mxu0 %v7433_v46  ;;  %v7471_v46 = vpack.c.bf16 %v3279_v16, %v3277_v6  ;;  %v7473_v33 = vpack.c.bf16 %v3284_v43, %v3282_v40  ;;  %v6197_v16 = vld [vmem:[%s12108_s11 + $0x490] sm:$0xff]  ;;  %v4046_v40 = vld [vmem:[%s12109_s12 + $0xc0] sm:$0xff]  ;;  %v4047_v43 = vld [vmem:[%s12109_s12 + $0xc8] sm:$0xff] }
 0x893   : > { %7436 = vmatpush1.bf16.msra.mxu0 %v7435_v9  ;;  %v6182_v9 = vld [vmem:[%s12108_s11 + $0x418] sm:$0xff] }
 0x894   : > { %7438 = vmatprep.subr.bf16.mxu0 %v7437_v41  ;;  %v7475_v41 = vpack.c.bf16 %v3283_v12, %v3281_v56  ;;  %v7481_v7 = vpack.c.bf16 %v6182_v9, %v6180_v39  ;;  %v7499_v12 = vpack.c.bf16 %v6197_v16, %v6195_v29  ;;  %v10631_v39 = vpack.c.bf16 %v4047_v43, %v4046_v40  ;;  %v4030_v9 = vld [vmem:[%s12109_s12 + $0x40] sm:$0xff] }
 0x895   : > { %v6223_v29 = vld [vmem:[%s12108_s11 + $0x560] sm:$0xff] }
 0x896   : > { %v6227_v43 = vld [vmem:[%s12108_s11 + $0x580] sm:$0xff] }
 0x897   : > { %7440 = vmatpush1.bf16.msra.mxu0 %v7439_v42  ;;  %v6184_v42 = vld [vmem:[%s12108_s11 + $0x428] sm:$0xff] }
 0x898   : > { %7442 = vmatprep.subr.bf16.mxu0 %v7441_v47  ;;  %v6186_v47 = vld [vmem:[%s12108_s11 + $0x438] sm:$0xff] }
 0x899   : > { %v7485_v27 = vpack.c.bf16 %v6186_v47, %v6184_v42  ;;  %v6204_v42 = vld [vmem:[%s12108_s11 + $0x4c8] sm:$0xff]  ;;  %v6206_v47 = vld [vmem:[%s12108_s11 + $0x4d8] sm:$0xff] }
 0x89b   : > { %7444 = vmatpush1.bf16.msra.mxu0 %v7443_v5  ;;  %v6185_v5 = vld [vmem:[%s12108_s11 + $0x430] sm:$0xff] }
 0x89c   : > { %7446 = vmatprep.subr.bf16.mxu0 %v7445_v17  ;;  %v6188_v17 = vld [vmem:[%s12108_s11 + $0x448] sm:$0xff] }
 0x89f   : > { %7448 = vmatpush1.bf16.msra.mxu0 %v7447_v50  ;;  %v4039_v50 = vld [vmem:[%s12109_s12 + $0x88] sm:$0xff] }
 0x8a0   : > { %7450 = vmatprep.subr.bf16.mxu0 %v7449_v51  ;;  %v7487_v51 = vpack.c.bf16 %v6185_v5, %v6183_v59  ;;  %v10533_v8 = vpack.c.bf16 %v4039_v50, %v4038_v49  ;;  %v7505_v59 = vpack.c.bf16 %v6206_v47, %v6204_v42  ;;  %v6203_v5 = vld [vmem:[%s12108_s11 + $0x4c0] sm:$0xff]  ;;  %v6238_v42 = vld [vmem:[%s12108_s11 + $0x5d8] sm:$0xff] }
 0x8a1   : > { %v6207_v50 = vld [vmem:[%s12108_s11 + $0x4e0] sm:$0xff] }
 0x8a2   : > { %7614 = vmatprep.subr.bf16.mxu1 %v10533_v8 }
 0x8a3   : > { %7452 = vmatpush1.bf16.msra.mxu0 %v7451_v15  ;;  %v7489_v15 = vpack.c.bf16 %v6190_v32, %v6188_v17  ;;  %v6205_v17 = vld [vmem:[%s12108_s11 + $0x4d0] sm:$0xff]  ;;  %v6208_v32 = vld [vmem:[%s12108_s11 + $0x4e8] sm:$0xff] }
 0x8a4   : > { %7454 = vmatprep.subr.bf16.mxu0 %v7453_v18  ;;  %v7507_v4 = vpack.c.bf16 %v6205_v17, %v6203_v5  ;;  %v7509_v49 = vpack.c.bf16 %v6210_v54, %v6208_v32  ;;  %v6237_v5 = vld [vmem:[%s12108_s11 + $0x5d0] sm:$0xff]  ;;  %v6240_v17 = vld [vmem:[%s12108_s11 + $0x5e8] sm:$0xff]  ;;  %v6242_v32 = vld [vmem:[%s12108_s11 + $0x5f8] sm:$0xff] }
 0x8a7   : > { %7456 = vmatpush1.bf16.msra.mxu0 %v7455_v61  ;;  %v6194_v61 = vld [vmem:[%s12108_s11 + $0x478] sm:$0xff] }
 0x8a8   : > { %7458 = vmatprep.subr.bf16.mxu0 %v7457_v24  ;;  %v4043_v24 = vld [vmem:[%s12109_s12 + $0xa8] sm:$0xff]  ;;  %v7493_v63 = vpack.c.bf16 %v6194_v61, %v6192_v58 }
 0x8a9   : > { %v10574_v3 = vpack.c.bf16 %v4043_v24, %v4042_v21  ;;  %v6218_v21 = vld [vmem:[%s12108_s11 + $0x538] sm:$0xff]  ;;  %v6215_v24 = vld [vmem:[%s12108_s11 + $0x520] sm:$0xff] }
 0x8ab   : > { %7460 = vmatpush1.bf16.msra.mxu0 %v7459_v60  ;;  %v4026_v60 = vld [vmem:[%s12109_s12 + $0x20] sm:$0xff] }
 0x8ac   : > { %7462 = vmatprep.subr.bf16.mxu0 %v7461_v0  ;;  %v4027_v0 = vld [vmem:[%s12109_s12 + $0x28] sm:$0xff] }
 0x8ad   : > { %v10598_v36 = vpack.c.bf16 %v4027_v0, %v4026_v60  ;;  %v6222_v60 = vld [vmem:[%s12108_s11 + $0x558] sm:$0xff] }
 0x8af   : > { %7464 = vmatpush1.bf16.msra.mxu0 %v7463_v57  ;;  %v6196_v57 = vld [vmem:[%s12108_s11 + $0x488] sm:$0xff] }
 0x8b0   : > { %7466 = vmatprep.subr.bf16.mxu0 %v7465_v34  ;;  %v6198_v34 = vld [vmem:[%s12108_s11 + $0x498] sm:$0xff] }
 0x8b1   : > { %v7497_v6 = vpack.c.bf16 %v6198_v34, %v6196_v57  ;;  %v6226_v57 = vld [vmem:[%s12108_s11 + $0x578] sm:$0xff]  ;;  %v7523_v34 = vpack.c.bf16 %v6221_v30, %v6219_v13  ;;  %v6255_v13 = vld [vmem:[%s12108_s11 + $0x650] sm:$0xff]  ;;  %v6258_v30 = vld [vmem:[%s12108_s11 + $0x668] sm:$0xff] }
 0x8b3   : > { %7468 = vmatpush1.bf16.msra.mxu0 %v7467_v55  ;;  %v4028_v55 = vld [vmem:[%s12109_s12 + $0x30] sm:$0xff] }
 0x8b4   : > { %7470 = vmatprep.subr.bf16.mxu0 %v7469_v52  ;;  %v4029_v52 = vld [vmem:[%s12109_s12 + $0x38] sm:$0xff] }
 0x8b5   : > { %v10628_v56 = vpack.c.bf16 %v4029_v52, %v4028_v55  ;;  %v6225_v55 = vld [vmem:[%s12108_s11 + $0x570] sm:$0xff]  ;;  %v6228_v52 = vld [vmem:[%s12108_s11 + $0x588] sm:$0xff] }
 0x8b6   : > { %v7527_v16 = vpack.c.bf16 %v6225_v55, %v6223_v29  ;;  %v6264_v29 = vld [vmem:[%s12108_s11 + $0x698] sm:$0xff] }
 0x8b7   : > { %7472 = vmatpush1.bf16.msra.mxu0 %v7471_v46  ;;  %v6200_v46 = vld [vmem:[%s12108_s11 + $0x4a8] sm:$0xff] }
 0x8b8   : > { %7474 = vmatprep.subr.bf16.mxu0 %v7473_v33  ;;  %v6202_v33 = vld [vmem:[%s12108_s11 + $0x4b8] sm:$0xff] }
 0x8bb   : > { %7476 = vmatpush1.bf16.msra.mxu0 %v7475_v41  ;;  %v4031_v41 = vld [vmem:[%s12109_s12 + $0x48] sm:$0xff] }
 0x8bc   : > { %7482 = vmatprep.subr.bf16.mxu0 %v7481_v7  ;;  %v7501_v7 = vpack.c.bf16 %v6202_v33, %v6200_v46  ;;  %v6229_v46 = vld [vmem:[%s12108_s11 + $0x590] sm:$0xff]  ;;  %v6232_v33 = vld [vmem:[%s12108_s11 + $0x5a8] sm:$0xff] }
 0x8be   : > { %3562 = vmatmul.mubr.f32.vlgmr.msra.gmra.mrb[40].mxu0 %v10290_v11  ;;  %v4022_v11 = vld [vmem:[%s12109_s12] sm:$0xff] }
 0x8bf   : > { %7484 = vmatpush1.bf16.msra.mxu0 %v7483_v48  ;;  %3773 = vmatprep.mubr.f32.mxu0 %v10312_v26  ;;  %v10544_v18 = vpack.c.bf16 %v4023_v10, %v4022_v11  ;;  %v4024_v26 = vld [vmem:[%s12109_s12 + $0x10] sm:$0xff]  ;;  %v10652_v48 = vpack.c.bf16 %v4031_v41, %v4030_v9  ;;  %v6214_v10 = vld [vmem:[%s12108_s11 + $0x518] sm:$0xff]  ;;  %v7531_v9 = vpack.c.bf16 %v6229_v46, %v6227_v43 }
 0x8c0   : > { %7486 = vmatprep.subr.bf16.mxu0 %v7485_v27  ;;  %v10568_v25 = vpack.c.bf16 %v4025_v20, %v4024_v26  ;;  %v7503_v27 = vpack.c.bf16 %v6201_v44, %v6199_v22  ;;  %v6209_v11 = vld [vmem:[%s12108_s11 + $0x4f0] sm:$0xff]  ;;  %v6216_v20 = vld [vmem:[%s12108_s11 + $0x528] sm:$0xff]  ;;  %v6268_v43 = vld [vmem:[%s12108_s11 + $0x6b8] sm:$0xff] }
 0x8c1   : > { %7616 = vmatpush3.bf16.msra.mxu1 %v10544_v18  ;;  %v7511_v35 = vpack.c.bf16 %v6209_v11, %v6207_v50  ;;  %v6213_v26 = vld [vmem:[%s12108_s11 + $0x510] sm:$0xff]  ;;  %v7517_v61 = vpack.c.bf16 %v6218_v21, %v6216_v20  ;;  %v6236_v44 = vld [vmem:[%s12108_s11 + $0x5c8] sm:$0xff]  ;;  %v6252_v20 = vld [vmem:[%s12108_s11 + $0x638] sm:$0xff] }
 0x8c2   : > { %7618 = vmatprep.subr.bf16.mxu1 %v10546_v19  ;;  %v6233_v22 = vld [vmem:[%s12108_s11 + $0x5b0] sm:$0xff]  ;;  %v6246_v11 = vld [vmem:[%s12108_s11 + $0x608] sm:$0xff] }
 0x8c3   : > { %7488 = vmatpush1.bf16.msra.mxu0 %v7487_v51  ;;  %v6212_v51 = vld [vmem:[%s12108_s11 + $0x508] sm:$0xff]  ;;  %v6241_v50 = vld [vmem:[%s12108_s11 + $0x5f0] sm:$0xff] }
 0x8c4   : > { %7490 = vmatprep.subr.bf16.mxu0 %v7489_v15  ;;  %v7513_v14 = vpack.c.bf16 %v6214_v10, %v6212_v51  ;;  %v6211_v15 = vld [vmem:[%s12108_s11 + $0x500] sm:$0xff]  ;;  %v6248_v51 = vld [vmem:[%s12108_s11 + $0x618] sm:$0xff] }
 0x8c5   : > { %7620 = vmatpush3.bf16.msra.mxu1 %v10568_v25  ;;  %v7515_v58 = vpack.c.bf16 %v6213_v26, %v6211_v15  ;;  %v6247_v15 = vld [vmem:[%s12108_s11 + $0x610] sm:$0xff]  ;;  %v6250_v26 = vld [vmem:[%s12108_s11 + $0x628] sm:$0xff] }
 0x8c6   : > { %7622 = vmatprep.subr.bf16.mxu1 %v10574_v3 }
 0x8c7   : > { %7492 = vmatpush1.bf16.msra.mxu0 %v7491_v53  ;;  %v6217_v53 = vld [vmem:[%s12108_s11 + $0x530] sm:$0xff] }
 0x8c8   : > { %7494 = vmatprep.subr.bf16.mxu0 %v7493_v63  ;;  %v7519_v0 = vpack.c.bf16 %v6217_v53, %v6215_v24  ;;  %v7521_v63 = vpack.c.bf16 %v6222_v60, %v6220_v28  ;;  %v6251_v24 = vld [vmem:[%s12108_s11 + $0x630] sm:$0xff]  ;;  %v6254_v53 = vld [vmem:[%s12108_s11 + $0x648] sm:$0xff]  ;;  %v6256_v28 = vld [vmem:[%s12108_s11 + $0x658] sm:$0xff] }
 0x8c9   : > { %7624 = vmatpush3.bf16.msra.mxu1 %v10598_v36 }
 0x8ca   : > { %7626 = vmatprep.subr.bf16.mxu1 %v10604_v31 }
 0x8cb   : > { %7496 = vmatpush1.bf16.msra.mxu0 %v7495_v38  ;;  %v7525_v38 = vpack.c.bf16 %v6226_v57, %v6224_v62  ;;  %v6257_v57 = vld [vmem:[%s12108_s11 + $0x660] sm:$0xff] }
 0x8cc   : > { %7498 = vmatprep.subr.bf16.mxu0 %v7497_v6  ;;  %v6230_v6 = vld [vmem:[%s12108_s11 + $0x598] sm:$0xff] }
 0x8cd   : > { %7628 = vmatpush3.bf16.msra.mxu1 %v10628_v56  ;;  %v7529_v40 = vpack.c.bf16 %v6230_v6, %v6228_v52  ;;  %v6261_v6 = vld [vmem:[%s12108_s11 + $0x680] sm:$0xff] }
 0x8ce   : > { %7630 = vmatprep.subr.bf16.mxu1 %v10631_v39 }
 0x8cf   : > { %7500 = vmatpush1.bf16.msra.mxu0 %v7499_v12  ;;  %v6234_v12 = vld [vmem:[%s12108_s11 + $0x5b8] sm:$0xff] }
 0x8d0   : > { %7502 = vmatprep.subr.bf16.mxu0 %v7501_v7  ;;  %v7533_v41 = vpack.c.bf16 %v6234_v12, %v6232_v33  ;;  %v6231_v7 = vld [vmem:[%s12108_s11 + $0x5a0] sm:$0xff] }
 0x8d1   : > { %7632 = vmatpush3.bf16.msra.mxu1 %v10652_v48  ;;  %v7535_v47 = vpack.c.bf16 %v6233_v22, %v6231_v7  ;;  %v6265_v12 = vld [vmem:[%s12108_s11 + $0x6a0] sm:$0xff]  ;;  %v6272_v7 = vld [vmem:[%s12108_s11 + $0x6d8] sm:$0xff] }
 0x8d3   : > { %7504 = vmatpush1.bf16.msra.mxu0 %v7503_v27  ;;  %v7537_v27 = vpack.c.bf16 %v6238_v42, %v6236_v44  ;;  %v6269_v42 = vld [vmem:[%s12108_s11 + $0x6c0] sm:$0xff] }
 0x8d4   : > { %7506 = vmatprep.subr.bf16.mxu0 %v7505_v59  ;;  %v6235_v59 = vld [vmem:[%s12108_s11 + $0x5c0] sm:$0xff] }
 0x8d5   : > { %v7539_v54 = vpack.c.bf16 %v6237_v5, %v6235_v59  ;;  %v6276_v59 = vld [vmem:[%s12108_s11 + $0x6f8] sm:$0xff] }
 0x8d7   : > { %7508 = vmatpush1.bf16.msra.mxu0 %v7507_v4  ;;  %v7541_v4 = vpack.c.bf16 %v6242_v32, %v6240_v17  ;;  %v6273_v32 = vld [vmem:[%s12108_s11 + $0x6e0] sm:$0xff] }
 0x8d8   : > { %7510 = vmatprep.subr.bf16.mxu0 %v7509_v49  ;;  %v6239_v49 = vld [vmem:[%s12108_s11 + $0x5e0] sm:$0xff] }
 0x8d9   : > { %v7543_v10 = vpack.c.bf16 %v6241_v50, %v6239_v49  ;;  %v6280_v49 = vld [vmem:[%s12108_s11 + $0x718] sm:$0xff] }
 0x8db   : > { %7512 = vmatpush1.bf16.msra.mxu0 %v7511_v35  ;;  %v7549_v35 = vpack.c.bf16 %v6248_v51, %v6246_v11  ;;  %v6277_v51 = vld [vmem:[%s12108_s11 + $0x700] sm:$0xff] }
 0x8dc   : > { %7514 = vmatprep.subr.bf16.mxu0 %v7513_v14  ;;  %v6245_v14 = vld [vmem:[%s12108_s11 + $0x600] sm:$0xff] }
 0x8dd   : > { %v7551_v21 = vpack.c.bf16 %v6247_v15, %v6245_v14  ;;  %v6284_v14 = vld [vmem:[%s12108_s11 + $0x738] sm:$0xff] }
 0x8df   : > { %7516 = vmatpush1.bf16.msra.mxu0 %v7515_v58  ;;  %v7553_v58 = vpack.c.bf16 %v6252_v20, %v6250_v26  ;;  %v6281_v20 = vld [vmem:[%s12108_s11 + $0x720] sm:$0xff] }
 0x8e0   : > { %7518 = vmatprep.subr.bf16.mxu0 %v7517_v61  ;;  %v6249_v61 = vld [vmem:[%s12108_s11 + $0x620] sm:$0xff] }
 0x8e1   : > { %v7555_v60 = vpack.c.bf16 %v6251_v24, %v6249_v61  ;;  %v6288_v61 = vld [vmem:[%s12108_s11 + $0x758] sm:$0xff] }
 0x8e3   : > { %7520 = vmatpush1.bf16.msra.mxu0 %v7519_v0  ;;  %v7557_v0 = vpack.c.bf16 %v6256_v28, %v6254_v53  ;;  %v6285_v28 = vld [vmem:[%s12108_s11 + $0x740] sm:$0xff] }
 0x8e4   : > { %7522 = vmatprep.subr.bf16.mxu0 %v7521_v63  ;;  %v6253_v63 = vld [vmem:[%s12108_s11 + $0x640] sm:$0xff] }
 0x8e7   : > { %7524 = vmatpush1.bf16.msra.mxu0 %v7523_v34  ;;  %v6259_v34 = vld [vmem:[%s12108_s11 + $0x670] sm:$0xff] }
 0x8e8   : > { %7526 = vmatprep.subr.bf16.mxu0 %v7525_v38  ;;  %v6262_v38 = vld [vmem:[%s12108_s11 + $0x688] sm:$0xff]  ;;  %v7563_v55 = vpack.c.bf16 %v6259_v34, %v6257_v57  ;;  %v6296_v57 = vld [vmem:[%s12108_s11 + $0x798] sm:$0xff] }
 0x8e9   : > { %v7565_v52 = vpack.c.bf16 %v6264_v29, %v6262_v38  ;;  %v6293_v29 = vld [vmem:[%s12108_s11 + $0x780] sm:$0xff] }
 0x8eb   : > { %7528 = vmatpush1.bf16.msra.mxu0 %v7527_v16  ;;  %v6263_v16 = vld [vmem:[%s12108_s11 + $0x690] sm:$0xff] }
 0x8ec   : > { %7530 = vmatprep.subr.bf16.mxu0 %v7529_v40  ;;  %v6266_v40 = vld [vmem:[%s12108_s11 + $0x6a8] sm:$0xff]  ;;  %v7567_v46 = vpack.c.bf16 %v6263_v16, %v6261_v6  ;;  %v6300_v6 = vld [vmem:[%s12108_s11 + $0x7b8] sm:$0xff] }
 0x8ed   : > { %v7569_v33 = vpack.c.bf16 %v6268_v43, %v6266_v40  ;;  %v6297_v43 = vld [vmem:[%s12108_s11 + $0x7a0] sm:$0xff] }
 0x8ef   : > { %7532 = vmatpush1.bf16.msra.mxu0 %v7531_v9  ;;  %v6267_v9 = vld [vmem:[%s12108_s11 + $0x6b0] sm:$0xff] }
 0x8f0   : > { %7534 = vmatprep.subr.bf16.mxu0 %v7533_v41  ;;  %v6270_v41 = vld [vmem:[%s12108_s11 + $0x6c8] sm:$0xff]  ;;  %v7571_v22 = vpack.c.bf16 %v6267_v9, %v6265_v12  ;;  %v6304_v12 = vld [vmem:[%s12108_s11 + $0x7d8] sm:$0xff] }
 0x8f1   : > { %v7573_v44 = vpack.c.bf16 %v6272_v7, %v6270_v41  ;;  %v6301_v7 = vld [vmem:[%s12108_s11 + $0x7c0] sm:$0xff] }
 0x8f3   : > { %7536 = vmatpush1.bf16.msra.mxu0 %v7535_v47  ;;  %v6271_v47 = vld [vmem:[%s12108_s11 + $0x6d0] sm:$0xff] }
 0x8f4   : > { %7538 = vmatprep.subr.bf16.mxu0 %v7537_v27  ;;  %v6274_v27 = vld [vmem:[%s12108_s11 + $0x6e8] sm:$0xff]  ;;  %v7575_v5 = vpack.c.bf16 %v6271_v47, %v6269_v42  ;;  %v6308_v42 = vld [vmem:[%s12108_s11 + $0x7f8] sm:$0xff] }
 0x8f5   : > { %v7577_v17 = vpack.c.bf16 %v6276_v59, %v6274_v27  ;;  %v6305_v59 = vld [vmem:[%s12108_s11 + $0x7e0] sm:$0xff] }
 0x8f7   : > { %7540 = vmatpush1.bf16.msra.mxu0 %v7539_v54  ;;  %v6275_v54 = vld [vmem:[%s12108_s11 + $0x6f0] sm:$0xff] }
 0x8f8   : > { %7542 = vmatprep.subr.bf16.mxu0 %v7541_v4  ;;  %v6278_v4 = vld [vmem:[%s12108_s11 + $0x708] sm:$0xff]  ;;  %v7579_v50 = vpack.c.bf16 %v6275_v54, %v6273_v32  ;;  %v4048_v32 = vld [vmem:[%s12109_s12 + $0xd0] sm:$0xff]  ;;  %v4049_v54 = vld [vmem:[%s12109_s12 + $0xd8] sm:$0xff] }
 0x8f9   : > { %v7581_v11 = vpack.c.bf16 %v6280_v49, %v6278_v4  ;;  %v7633_v4 = vpack.c.bf16 %v4049_v54, %v4048_v32  ;;  %v4032_v49 = vld [vmem:[%s12109_s12 + $0x50] sm:$0xff] }
 0x8fb   : > { %7544 = vmatpush1.bf16.msra.mxu0 %v7543_v10  ;;  %v6279_v10 = vld [vmem:[%s12108_s11 + $0x710] sm:$0xff]  ;;  %7634 = vmatprep.subr.bf16.mxu1 %v7633_v4 }
 0x8fc   : > { %7550 = vmatprep.subr.bf16.mxu0 %v7549_v35  ;;  %v6282_v35 = vld [vmem:[%s12108_s11 + $0x728] sm:$0xff]  ;;  %v7583_v15 = vpack.c.bf16 %v6279_v10, %v6277_v51 }
 0x8fd   : > { %v7585_v26 = vpack.c.bf16 %v6284_v14, %v6282_v35  ;;  %v4051_v51 = vld [vmem:[%s12109_s12 + $0xe8] sm:$0xff]  ;;  %v4034_v35 = vld [vmem:[%s12109_s12 + $0x60] sm:$0xff] }
 0x8fe   : > { %3774 = vmatmul.mubr.f32.vlgmr.msra.gmra.mrb[40].mxu0 %v10304_v23  ;;  %v6260_v23 = vld [vmem:[%s12108_s11 + $0x678] sm:$0xff]  ;;  %v4035_v14 = vld [vmem:[%s12109_s12 + $0x68] sm:$0xff] }
 0x8ff   : > { %7552 = vmatpush1.bf16.msra.mxu0 %v7551_v21  ;;  %3987 = vmatprep.mubr.f32.mxu0 %v10502_v2  ;;  %v7559_v2 = vpack.c.bf16 %v6255_v13, %v6253_v63  ;;  %v7561_v62 = vpack.c.bf16 %v6260_v23, %v6258_v30  ;;  %v6283_v21 = vld [vmem:[%s12108_s11 + $0x730] sm:$0xff]  ;;  %v6292_v63 = vld [vmem:[%s12108_s11 + $0x778] sm:$0xff]  ;;  %v6289_v23 = vld [vmem:[%s12108_s11 + $0x760] sm:$0xff] }
 0x900   : > { %7554 = vmatprep.subr.bf16.mxu0 %v7553_v58  ;;  %v6286_v58 = vld [vmem:[%s12108_s11 + $0x748] sm:$0xff]  ;;  %v7587_v24 = vpack.c.bf16 %v6283_v21, %v6281_v20  ;;  %v4053_v20 = vld [vmem:[%s12109_s12 + $0xf8] sm:$0xff]  ;;  %v4036_v21 = vld [vmem:[%s12109_s12 + $0x70] sm:$0xff] }
 0x901   : > { %v7589_v53 = vpack.c.bf16 %v6288_v61, %v6286_v58  ;;  %v4037_v61 = vld [vmem:[%s12109_s12 + $0x78] sm:$0xff] }
 0x903   : > { %7556 = vmatpush1.bf16.msra.mxu0 %v7555_v60  ;;  %v6287_v60 = vld [vmem:[%s12108_s11 + $0x750] sm:$0xff] }
 0x904   : > { %7558 = vmatprep.subr.bf16.mxu0 %v7557_v0  ;;  %v6290_v0 = vld [vmem:[%s12108_s11 + $0x768] sm:$0xff]  ;;  %v7591_v13 = vpack.c.bf16 %v6287_v60, %v6285_v28 }
 0x905   : > { %v7593_v30 = vpack.c.bf16 %v6292_v63, %v6290_v0 }
 0x907   : > { %7560 = vmatpush1.bf16.msra.mxu0 %v7559_v2  ;;  %v6291_v2 = vld [vmem:[%s12108_s11 + $0x770] sm:$0xff] }
 0x908   : > { %7562 = vmatprep.subr.bf16.mxu0 %v7561_v62  ;;  %v6294_v62 = vld [vmem:[%s12108_s11 + $0x788] sm:$0xff]  ;;  %v7595_v34 = vpack.c.bf16 %v6291_v2, %v6289_v23 }
 0x909   : > { %v7597_v38 = vpack.c.bf16 %v6296_v57, %v6294_v62 }
 0x90b   : > { %7564 = vmatpush1.bf16.msra.mxu0 %v7563_v55  ;;  %v6295_v55 = vld [vmem:[%s12108_s11 + $0x790] sm:$0xff] }
 0x90c   : > { %7566 = vmatprep.subr.bf16.mxu0 %v7565_v52  ;;  %v6298_v52 = vld [vmem:[%s12108_s11 + $0x7a8] sm:$0xff]  ;;  %v7599_v16 = vpack.c.bf16 %v6295_v55, %v6293_v29 }
 0x90d   : > { %v7601_v40 = vpack.c.bf16 %v6300_v6, %v6298_v52 }
 0x90f   : > { %7568 = vmatpush1.bf16.msra.mxu0 %v7567_v46  ;;  %v6299_v46 = vld [vmem:[%s12108_s11 + $0x7b0] sm:$0xff] }
 0x910   : > { %7570 = vmatprep.subr.bf16.mxu0 %v7569_v33  ;;  %v6302_v33 = vld [vmem:[%s12108_s11 + $0x7c8] sm:$0xff]  ;;  %v7603_v9 = vpack.c.bf16 %v6299_v46, %v6297_v43 }
 0x911   : > { %v7605_v41 = vpack.c.bf16 %v6304_v12, %v6302_v33 }
 0x913   : > { %7572 = vmatpush1.bf16.msra.mxu0 %v7571_v22  ;;  %v6303_v22 = vld [vmem:[%s12108_s11 + $0x7d0] sm:$0xff] }
 0x914   : > { %7574 = vmatprep.subr.bf16.mxu0 %v7573_v44  ;;  %v6306_v44 = vld [vmem:[%s12108_s11 + $0x7e8] sm:$0xff]  ;;  %v7607_v47 = vpack.c.bf16 %v6303_v22, %v6301_v7 }
 0x915   : > { %v7609_v27 = vpack.c.bf16 %v6308_v42, %v6306_v44  ;;  %v4209_v44 = vld [vmem:[%s12110_s13 + $0x20] sm:$0xff]  ;;  %v4211_v42 = vld [vmem:[%s12110_s13 + $0x30] sm:$0xff] }
 0x917   : > { %7576 = vmatpush1.bf16.msra.mxu0 %v7575_v5  ;;  %v6307_v5 = vld [vmem:[%s12108_s11 + $0x7f0] sm:$0xff] }
 0x918   : > { %7578 = vmatprep.subr.bf16.mxu0 %v7577_v17  ;;  %v7611_v17 = vpack.c.bf16 %v6307_v5, %v6305_v59 }
 0x91b   : > { %7580 = vmatpush1.bf16.msra.mxu0 %v7579_v50  ;;  %v4033_v50 = vld [vmem:[%s12109_s12 + $0x58] sm:$0xff] }
 0x91c   : > { %7582 = vmatprep.subr.bf16.mxu0 %v7581_v11  ;;  %v4050_v11 = vld [vmem:[%s12109_s12 + $0xe0] sm:$0xff] }
 0x91d   : > { %v7637_v10 = vpack.c.bf16 %v4051_v51, %v4050_v11  ;;  %v4198_v51 = vld [vmem:[%s12111_s14] sm:$0x1] }
 0x91f   : > { %7584 = vmatpush1.bf16.msra.mxu0 %v7583_v15  ;;  %v7639_v15 = vpack.c.bf16 %v4035_v14, %v4034_v35 }
 0x920   : > { %7586 = vmatprep.subr.bf16.mxu0 %v7585_v26  ;;  %v4052_v26 = vld [vmem:[%s12109_s12 + $0xf0] sm:$0xff] }
 0x921   : > { %v7641_v58 = vpack.c.bf16 %v4053_v20, %v4052_v26 }
 0x923   : > { %7588 = vmatpush1.bf16.msra.mxu0 %v7587_v24  ;;  %v7643_v24 = vpack.c.bf16 %v4037_v61, %v4036_v21 }
 0x924   : > { %7590 = vmatprep.subr.bf16.mxu0 %v7589_v53 }
 0x927   : > { %7592 = vmatpush1.bf16.msra.mxu0 %v7591_v13 }
 0x928   : > { %7594 = vmatprep.subr.bf16.mxu0 %v7593_v30 }
 0x92b   : > { %7596 = vmatpush1.bf16.msra.mxu0 %v7595_v34 }
 0x92c   : > { %7598 = vmatprep.subr.bf16.mxu0 %v7597_v38 }
 0x92f   : > { %7600 = vmatpush1.bf16.msra.mxu0 %v7599_v16 }
 0x930   : > { %7602 = vmatprep.subr.bf16.mxu0 %v7601_v40 }
 0x933   : > { %7604 = vmatpush1.bf16.msra.mxu0 %v7603_v9  ;;  %v4210_v9 = vld [vmem:[%s12110_s13 + $0x28] sm:$0xff] }
 0x934   : > { %7606 = vmatprep.subr.bf16.mxu0 %v7605_v41  ;;  %v4212_v41 = vld [vmem:[%s12110_s13 + $0x38] sm:$0xff] }
 0x935   : > { %v7681_v22 = vpack.c.bf16 %v4212_v41, %v4210_v9  ;;  %v6329_v9 = vld [vmem:[%s12114_s17 + $0x278] sm:$0xff] }
 0x937   : > { %7608 = vmatpush1.bf16.msra.mxu0 %v7607_v47  ;;  %v7683_v47 = vpack.c.bf16 %v4211_v42, %v4209_v44  ;;  %v6328_v44 = vld [vmem:[%s12114_s17 + $0x270] sm:$0xff]  ;;  %v6331_v42 = vld [vmem:[%s12114_s17 + $0x288] sm:$0xff] }
 0x938   : > { %7610 = vmatprep.subr.bf16.mxu0 %v7609_v27 }
 0x93b   : > { %7612 = vmatpush1.bf16.msra.mxu0 %v7611_v17 }
 0x93e   : > { %3988 = vmatmul.mubr.f32.vlgmr.msra.gmra.mrb[40].mxu0 %v10494_v45  ;;  %v7635_v45 = vpack.c.bf16 %v4033_v50, %v4032_v49 }
 0x93f   : > { %4877 = vmatprep.mubr.f32.mxu0 %v8117_v1 }
 0x940   : > { %7636 = vmatpush3.bf16.msra.mxu1 %v7635_v45 }
 0x941   : > { %7638 = vmatprep.subr.bf16.mxu1 %v7637_v10 }
 0x944   : > { %7640 = vmatpush3.bf16.msra.mxu1 %v7639_v15 }
 0x945   : > { %7642 = vmatprep.subr.bf16.mxu1 %v7641_v58 }
 0x948   : > { %7644 = vmatpush3.bf16.msra.mxu1 %v7643_v24 }
 0x949   : > { %7646 = vmatprep.subr.bf16.mxu1 %v10533_v8 }
 0xa11   : > { %v11003_v53 = vpop.f32.mrb[40].mxu0 }
 0xa12   : > { %v3996_v28 = vrot.slane %v11003_v53, 4  ;;  %v11006_v60 = vpop.f32.mrb[41].mxu0  ;;  %v4008_v46 = vmul.f32 %v11003_v53, %v11003_v53 }
 0xa13   : > { %v4002_v0 = vrot.slane %v11006_v60, 4  ;;  %v4009_v63 = vmul.f32 %v11006_v60, %v11006_v60 }
 0xa14   : > { %v3997_v13 = vadd.f32 %v3996_v28, %v11003_v53  ;;  %v4010_v33 = vrot.slane %v4008_v46, 4 }
 0xa15   : > { %v4003_v30 = vadd.f32 %v4002_v0, %v11006_v60  ;;  %v4016_v23 = vrot.slane %v4009_v63, 4 }
 0xa16   : > { %v3998_v2 = vrot.slane %v3997_v13, 2  ;;  %v4011_v12 = vadd.f32 %v4010_v33, %v4008_v46 }
 0xa17   : > { %v4004_v62 = vrot.slane %v4003_v30, 2  ;;  %v4017_v57 = vadd.f32 %v4016_v23, %v4009_v63 }
 0xa18   : > { %v3999_v8 = vadd.f32 %v3998_v2, %v3997_v13 }
 0xa19   : > { %v4005_v34 = vadd.f32 %v4004_v62, %v4003_v30  ;;  %v4018_v38 = vrot.slane %v4017_v57, 2 }
 0xa1a   : > { %v4000_v29 = vrot.slane %v3999_v8, 1 }
 0xa1b   : > { %v4006_v55 = vrot.slane %v4005_v34, 1  ;;  %v4019_v52 = vadd.f32 %v4018_v38, %v4017_v57  ;;  %v4385_v38 = vld [vmem:[%s12113_s16] sm:$0xf] }
 0xa1c   : > { %v4001_v40 = vadd.f32 %v4000_v29, %v3999_v8  ;;  %v6314_v29 = vld [vmem:[%s12114_s17 + $0x200] sm:$0xff] }
 0xa1d   : > { %v4007_v6 = vadd.f32 %v4006_v55, %v4005_v34  ;;  %v4020_v16 = vrot.slane %v4019_v52, 1  ;;  %v6315_v34 = vld [vmem:[%s12114_s17 + $0x208] sm:$0xff]  ;;  %v6316_v55 = vld [vmem:[%s12114_s17 + $0x210] sm:$0xff] }
 0xa1e   : > { %v7695_v46 = vpack.c.bf16 %v6316_v55, %v6314_v29 }
 0xa1f   : > { %4118 = vmatprep.mubr.f32.mxu1 %v4007_v6  ;;  %v4021_v43 = vadd.f32 %v4020_v16, %v4019_v52  ;;  %v6378_v52 = vld [vmem:[%s12113_s16 + $0x8] sm:$0xf] }
 0xa20   : > { %4119 = vmatmul.mubr.f32.vlgmr.msra.gmra.mrb[36].mxu1 %v4001_v40  ;;  %v6319_v16 = vld [vmem:[%s12114_s17 + $0x228] sm:$0xff]  ;;  %v6321_v40 = vld [vmem:[%s12114_s17 + $0x238] sm:$0xff] }
 0xa21   : > { %7648 = vmatpush3.bf16.msra.mxu1 %v10544_v18  ;;  %4189 = vmatprep.mubr.f32.mxu1 %v4021_v43  ;;  %v4012_v18 = vrot.slane %v4011_v12, 2  ;;  %v6312_v43 = vld [vmem:[%s12113_s16 + $0x4] sm:$0xf]  ;;  %v7697_v33 = vpack.c.bf16 %v6321_v40, %v6319_v16  ;;  %v6359_v16 = vld [vmem:[%s12114_s17 + $0x368] sm:$0xff]  ;;  %v6361_v40 = vld [vmem:[%s12114_s17 + $0x378] sm:$0xff] }
 0xa22   : > { %7650 = vmatprep.subr.bf16.mxu1 %v10546_v19 }
 0xa23   : > { %v4013_v19 = vadd.f32 %v4012_v18, %v4011_v12  ;;  %v6318_v12 = vld [vmem:[%s12114_s17 + $0x220] sm:$0xff]  ;;  %v6320_v18 = vld [vmem:[%s12114_s17 + $0x230] sm:$0xff] }
 0xa25   : > { %7652 = vmatpush3.bf16.msra.mxu1 %v10568_v25  ;;  %v4014_v25 = vrot.slane %v4013_v19, 1 }
 0xa26   : > { %7654 = vmatprep.subr.bf16.mxu1 %v10574_v3 }
 0xa27   : > { %v4015_v3 = vadd.f32 %v4014_v25, %v4013_v19  ;;  %v6323_v19 = vld [vmem:[%s12114_s17 + $0x248] sm:$0xff]  ;;  %v6325_v25 = vld [vmem:[%s12114_s17 + $0x258] sm:$0xff] }
 0xa29   : > { %7656 = vmatpush3.bf16.msra.mxu1 %v10598_v36  ;;  %v4206_v36 = vld [vmem:[%s12110_s13 + $0x8] sm:$0xff] }
 0xa2a   : > { %7658 = vmatprep.subr.bf16.mxu1 %v10604_v31  ;;  %v4208_v31 = vld [vmem:[%s12110_s13 + $0x18] sm:$0xff] }
 0xa2d   : > { %7660 = vmatpush3.bf16.msra.mxu1 %v10628_v56  ;;  %v4205_v56 = vld [vmem:[%s12110_s13] sm:$0xff] }
 0xa2e   : > { %7662 = vmatprep.subr.bf16.mxu1 %v10631_v39  ;;  %v7677_v39 = vpack.c.bf16 %v4208_v31, %v4206_v36  ;;  %v7699_v36 = vpack.c.bf16 %v6320_v18, %v6318_v12  ;;  %v7701_v31 = vpack.c.bf16 %v6325_v25, %v6323_v19  ;;  %v6360_v12 = vld [vmem:[%s12114_s17 + $0x370] sm:$0xff]  ;;  %v6363_v18 = vld [vmem:[%s12114_s17 + $0x388] sm:$0xff]  ;;  %v6365_v19 = vld [vmem:[%s12114_s17 + $0x398] sm:$0xff] }
 0xa31   : > { %7664 = vmatpush3.bf16.msra.mxu1 %v10652_v48  ;;  %v4207_v48 = vld [vmem:[%s12110_s13 + $0x10] sm:$0xff] }
 0xa32   : > { %7666 = vmatprep.subr.bf16.mxu1 %v7633_v4  ;;  %v7679_v7 = vpack.c.bf16 %v4207_v48, %v4205_v56  ;;  %v6322_v56 = vld [vmem:[%s12114_s17 + $0x240] sm:$0xff]  ;;  %v6327_v48 = vld [vmem:[%s12114_s17 + $0x268] sm:$0xff] }
 0xa35   : > { %7668 = vmatpush3.bf16.msra.mxu1 %v7635_v45 }
 0xa36   : > { %7670 = vmatprep.subr.bf16.mxu1 %v7637_v10 }
 0xa39   : > { %7672 = vmatpush3.bf16.msra.mxu1 %v7639_v15  ;;  %v4202_v15 = vld [vmem:[%s12112_s15] sm:$0x1] }
 0xa3a   : > { %7674 = vmatprep.subr.bf16.mxu1 %v7641_v58 }
 0xa3d   : > { %7676 = vmatpush3.bf16.msra.mxu1 %v7643_v24 }
 0xa3e   : > { %7678 = vmatprep.subr.bf16.mxu1 %v7677_v39 }
 0xa40   : > { %4190 = vmatmul.mubr.f32.vlgmr.msra.gmra.mrb[38].mxu1 %v4015_v3  ;;  %v6444_v3 = vld [vmem:[%s12113_s16 + $0xc] sm:$0xf] }
 0xa41   : > { %4280 = vmatprep.mubr.f32.mxu1 %v8117_v1  ;;  %7680 = vmatpush1.bf16.msra.mxu1 %v7679_v7 }
 0xa42   : > { %7682 = vmatprep.subr.bf16.mxu1 %v7681_v22 }
 0xa45   : > { %7684 = vmatpush1.bf16.msra.mxu1 %v7683_v47 }
 0xa46   : > { %7686 = vmatprep.subr.bf16.mxu1 %v7677_v39  ;;  %v6324_v39 = vld [vmem:[%s12114_s17 + $0x250] sm:$0xff] }
 0xa47   : > { %v7703_v41 = vpack.c.bf16 %v6324_v39, %v6322_v56  ;;  %v6367_v56 = vld [vmem:[%s12114_s17 + $0x3a8] sm:$0xff]  ;;  %v6369_v39 = vld [vmem:[%s12114_s17 + $0x3b8] sm:$0xff] }
 0xaf3   : > { %v6617_v27 = vpop.f32.mrb[36].mxu1 }
 0xaf4   : > { %v6618_v59 = vpop.f32.mrb[37].mxu1 }
 0xaf5   : > { %v6619_v5 = vadd.f32 %v6618_v59, %v6617_v27 }
 0xaf7   : > { %v4124_v17 = vmul.f32 0.015625, %v6619_v5  ;;  %v6330_v5 = vld [vmem:[%s12114_s17 + $0x280] sm:$0xff] }
 0xaf9   : > { %v4196_v49 = vmul.f32 %v4124_v17, %v4124_v17 }
 0xb13   : > { %v6652_v32 = vpop.f32.mrb[38].mxu1 }
 0xb14   : > { %v6653_v54 = vpop.f32.mrb[39].mxu1 }
 0xb15   : > { %v6654_v4 = vadd.f32 %v6653_v54, %v6652_v32  ;;  %v6335_v32 = vld [vmem:[%s12114_s17 + $0x2a8] sm:$0xff]  ;;  %v6337_v54 = vld [vmem:[%s12114_s17 + $0x2b8] sm:$0xff] }
 0xb17   : > { %v4195_v50 = vmul.f32 0.015625, %v6654_v4 }
 0xb19   : > { %v4197_v45 = vsub.f32 %v4195_v50, %v4196_v49  ;;  %v7713_v49 = vpack.c.bf16 %v6337_v54, %v6335_v32  ;;  %v6334_v50 = vld [vmem:[%s12114_s17 + $0x2a0] sm:$0xff]  ;;  %v6377_v32 = vld [vmem:[%s12114_s17 + $0x3f8] sm:$0xff] }
 0xb1b   : > { %v4199_v11 = vadd.f32 1e-05, %v4197_v45  ;;  %v6336_v45 = vld [vmem:[%s12114_s17 + $0x2b0] sm:$0xff] }
 0xb1d   : > { %8105 = vrsqrt.f32 %v4199_v11  ;;  %v6339_v11 = vld [vmem:[%s12114_s17 + $0x2c8] sm:$0xff] }
 0xb27   : > { %v8106_v10 = vpop.eup %8105 }
 0xb28   : > { %v4201_v35 = vmul.f32 %v8106_v10, %v4198_v51  ;;  %v6341_v51 = vld [vmem:[%s12114_s17 + $0x2d8] sm:$0xff]  ;;  %v7715_v10 = vpack.c.bf16 %v6336_v45, %v6334_v50  ;;  %v4462_v45 = vld [vmem:[%s12114_s17 + $0x8] sm:$0xff] }
 0xb2a   : > { %6309 = vmatmul.mubr.msk.f32.vlgmr.msra.gmra.mrb[40].mxu1 %vm1829_vm1, %v4201_v35  ;;  %v4203_v14 = vmul.f32 %v4201_v35, %v4124_v17  ;;  %v6332_v17 = vld [vmem:[%s12114_s17 + $0x290] sm:$0xff]  ;;  %v7717_v35 = vpack.c.bf16 %v6341_v51, %v6339_v11  ;;  %v4464_v11 = vld [vmem:[%s12114_s17 + $0x18] sm:$0xff] }
 0xb2b   : > { %7688 = vmatpush1.bf16.msra.mxu1 %v7679_v7  ;;  %4354 = vmatprep.mubr.f32.mxu1 %v8117_v1  ;;  %v7705_v7 = vpack.c.bf16 %v6329_v9, %v6327_v48  ;;  %v7711_v4 = vpack.c.bf16 %v6332_v17, %v6330_v5  ;;  %v7745_v9 = vpack.c.bf16 %v6369_v39, %v6367_v56  ;;  %v6375_v17 = vld [vmem:[%s12114_s17 + $0x3e8] sm:$0xff] }
 0xb2c   : > { %7690 = vmatprep.subr.bf16.mxu1 %v7681_v22  ;;  %v4204_v26 = vsub.f32 %v4202_v15, %v4203_v14  ;;  %v6326_v22 = vld [vmem:[%s12114_s17 + $0x260] sm:$0xff]  ;;  %v6340_v15 = vld [vmem:[%s12114_s17 + $0x2d0] sm:$0xff]  ;;  %v7753_v54 = vpack.c.bf16 %v6377_v32, %v6375_v17  ;;  %v7757_v51 = vpack.c.bf16 %v4464_v11, %v4462_v45 }
 0xb2d   : > { %v7707_v27 = vpack.c.bf16 %v6328_v44, %v6326_v22  ;;  %v6338_v14 = vld [vmem:[%s12114_s17 + $0x2c0] sm:$0xff]  ;;  %v6371_v22 = vld [vmem:[%s12114_s17 + $0x3c8] sm:$0xff]  ;;  %v6373_v44 = vld [vmem:[%s12114_s17 + $0x3d8] sm:$0xff] }
 0xb2e   : > { %v4493_v32 = vld [vmem:[%s12114_s17 + $0x100] sm:$0xff] }
 0xb2f   : > { %7692 = vmatpush1.bf16.msra.mxu1 %v7683_v47  ;;  %v6333_v47 = vld [vmem:[%s12114_s17 + $0x298] sm:$0xff]  ;;  %v4497_v11 = vld [vmem:[%s12114_s17 + $0x120] sm:$0xff] }
 0xb30   : > { %v7709_v59 = vpack.c.bf16 %v6333_v47, %v6331_v42  ;;  %v7749_v47 = vpack.c.bf16 %v6373_v44, %v6371_v22 }
 0xb32   : > { %6310 = vmatmul.mubr.msk.f32.vlgmr.msra.gmra.mrb[42].mxu1 %vm1829_vm1, %v4204_v26  ;;  %v6343_v26 = vld [vmem:[%s12114_s17 + $0x2e8] sm:$0xff] }
 0xb33   : > { %4454 = vmatprep.mubr.f32.mxu1 %v8117_v1 }
 0xbfd   : > { %v4282_v20 = vpop.f32.mrb[40].mxu1 }
 0xbfe   : > { %v4364_v21 = vrot.slane %v4282_v20, %v9024_v37  ;;  %v4284_v58 = vpop.f32.mrb[41].mxu1  ;;  %v6345_v20 = vld [vmem:[%s12114_s17 + $0x2f8] sm:$0xff] }
 0xbff   : > { %v4368_v61 = vrot.slane %v4284_v58, %v9024_v37  ;;  %v7721_v58 = vpack.c.bf16 %v6345_v20, %v6343_v26  ;;  %v4466_v26 = vld [vmem:[%s12114_s17 + $0x28] sm:$0xff]  ;;  %v4468_v20 = vld [vmem:[%s12114_s17 + $0x38] sm:$0xff] }
 0xc00   : > { %v4369_v24 = vmul.f32 %v4364_v21, %v11003_v53  ;;  %v6317_v53 = vld [vmem:[%s12114_s17 + $0x218] sm:$0xff]  ;;  %v7719_v21 = vpack.c.bf16 %v6340_v15, %v6338_v14  ;;  %v4461_v14 = vld [vmem:[%s12114_s17] sm:$0xff]  ;;  %v4463_v15 = vld [vmem:[%s12114_s17 + $0x10] sm:$0xff] }
 0xc01   : > { %v4370_v28 = vmul.f32 %v4368_v61, %v11006_v60  ;;  %v7693_v6 = vpack.c.bf16 %v6317_v53, %v6315_v34  ;;  %v6342_v61 = vld [vmem:[%s12114_s17 + $0x2e0] sm:$0xff]  ;;  %v6352_v53 = vld [vmem:[%s12114_s17 + $0x330] sm:$0xff] }
 0xc02   : > { %v6350_v34 = vld [vmem:[%s12114_s17 + $0x320] sm:$0xff] }
 0xc03   : > { %v7731_v29 = vpack.c.bf16 %v6352_v53, %v6350_v34  ;;  %v4474_v34 = vld [vmem:[%s12114_s17 + $0x68] sm:$0xff]  ;;  %v4476_v53 = vld [vmem:[%s12114_s17 + $0x78] sm:$0xff] }
 0xc05   : > { %v4356_v0 = vpop.f32.mrb[42].mxu1 }
 0xc06   : > { %v4374_v63 = vrot.slane %v4356_v0, %v9024_v37  ;;  %v4358_v13 = vpop.f32.mrb[43].mxu1  ;;  %v6349_v0 = vld [vmem:[%s12114_s17 + $0x318] sm:$0xff] }
 0xc07   : > { %v4378_v30 = vrot.slane %v4358_v13, %v9024_v37 }
 0xc08   : > { %v4379_v23 = vadd.f32 %v4374_v63, %v4369_v24  ;;  %v6344_v24 = vld [vmem:[%s12114_s17 + $0x2f0] sm:$0xff] }
 0xc09   : > { %v4380_v2 = vadd.f32 %v4378_v30, %v4370_v28  ;;  %v6347_v28 = vld [vmem:[%s12114_s17 + $0x308] sm:$0xff]  ;;  %v7723_v63 = vpack.c.bf16 %v6344_v24, %v6342_v61  ;;  %v6346_v30 = vld [vmem:[%s12114_s17 + $0x300] sm:$0xff] }
 0xc0a   : > { %v4381_v62 = vmul.f32 0.2, %v4379_v23  ;;  %v7725_v13 = vpack.c.bf16 %v6349_v0, %v6347_v28  ;;  %v7761_v28 = vpack.c.bf16 %v4468_v20, %v4466_v26  ;;  %v4465_v0 = vld [vmem:[%s12114_s17 + $0x20] sm:$0xff] }
 0xc0b   : > { %v4382_v57 = vmul.f32 0.2, %v4380_v2  ;;  %v4501_v20 = vld [vmem:[%s12114_s17 + $0x140] sm:$0xff] }
 0xc0c   : > { %v4383_v60 = vmax.f32 %v4379_v23, %v4381_v62  ;;  %v6348_v23 = vld [vmem:[%s12114_s17 + $0x310] sm:$0xff]  ;;  %v6353_v62 = vld [vmem:[%s12114_s17 + $0x338] sm:$0xff] }
 0xc0d   : > { %v4384_v8 = vmax.f32 %v4380_v2, %v4382_v57  ;;  %v6351_v2 = vld [vmem:[%s12114_s17 + $0x328] sm:$0xff]  ;;  %v7727_v57 = vpack.c.bf16 %v6348_v23, %v6346_v30  ;;  %v4472_v23 = vld [vmem:[%s12114_s17 + $0x58] sm:$0xff] }
 0xc0e   : > { %v4470_v30 = vld [vmem:[%s12114_s17 + $0x48] sm:$0xff] }
 0xc0f   : > { %4390 = vmatprep.subr.mxu1 %v4384_v8  ;;  %4813 = vmatprep.subr.mxu0 %v4384_v8 }
 0xc10   : > { %4391 = vmatpush1.msra.mxu1 %v4383_v60  ;;  %4814 = vmatpush1.msra.mxu0 %v4383_v60 }
 0xc11   : > { %6311 = vmatmul.mubr.msk.f32.vlgmr.msra.gmra.mrb[44].mxu1 %vm4386_vm3, %v4385_v38  ;;  %4530 = vmatprep.subr.mxu1 %v4384_v8  ;;  %v6357_v38 = vld [vmem:[%s12114_s17 + $0x358] sm:$0xff] }
 0xc12   : > { %5027 = vmatprep.subr.mxu0 %v4384_v8  ;;  %4531 = vmatpush1.msra.mxu1 %v4383_v60  ;;  %v7729_v8 = vpack.c.bf16 %v6353_v62, %v6351_v2  ;;  %v7765_v62 = vpack.c.bf16 %v4472_v23, %v4470_v30  ;;  %v4507_v30 = vld [vmem:[%s12114_s17 + $0x170] sm:$0xff]  ;;  %v4510_v23 = vld [vmem:[%s12114_s17 + $0x188] sm:$0xff] }
 0xc13   : > { %6379 = vmatmul.mubr.msk.f32.vlgmr.msra.gmra.mrb[42].mxu0 %vm4386_vm3, %v6378_v52  ;;  %4594 = vmatprep.mubr.f32.mxu1 %v8117_v1  ;;  %v6354_v52 = vld [vmem:[%s12114_s17 + $0x340] sm:$0xff] }
 0xc14   : > { %5028 = vmatpush1.msra.mxu0 %v4383_v60  ;;  %7694 = vmatprep.subr.bf16.mxu1 %v7693_v6  ;;  %v6355_v60 = vld [vmem:[%s12114_s17 + $0x348] sm:$0xff]  ;;  %v6356_v6 = vld [vmem:[%s12114_s17 + $0x350] sm:$0xff] }
 0xc15   : > { %6313 = vmatmul.mubr.msk.f32.vlgmr.msra.gmra.mrb[46].mxu1 %vm4386_vm3, %v6312_v43  ;;  %5091 = vmatprep.mubr.f32.mxu0 %v8117_v1  ;;  %v7733_v55 = vpack.c.bf16 %v6357_v38, %v6355_v60  ;;  %v7735_v43 = vpack.c.bf16 %v6356_v6, %v6354_v52  ;;  %v7769_v38 = vpack.c.bf16 %v4476_v53, %v4474_v34  ;;  %v4478_v52 = vld [vmem:[%s12114_s17 + $0x88] sm:$0xff]  ;;  %v4480_v6 = vld [vmem:[%s12114_s17 + $0x98] sm:$0xff]  ;;  %v4511_v34 = vld [vmem:[%s12114_s17 + $0x190] sm:$0xff] }
 0xc16   : > { %7696 = vmatpush1.bf16.msra.mxu1 %v7695_v46  ;;  %v7737_v46 = vpack.c.bf16 %v6361_v40, %v6359_v16  ;;  %v7773_v40 = vpack.c.bf16 %v4480_v6, %v4478_v52  ;;  %v4514_v53 = vld [vmem:[%s12114_s17 + $0x1a8] sm:$0xff]  ;;  %v4515_v52 = vld [vmem:[%s12114_s17 + $0x1b0] sm:$0xff] }
 0xc17   : > { %7698 = vmatprep.subr.bf16.mxu1 %v7697_v33  ;;  %6445 = vmatmul.mubr.msk.f32.vlgmr.msra.gmra.mrb[44].mxu0 %vm4386_vm3, %v6444_v3  ;;  %v6358_v33 = vld [vmem:[%s12114_s17 + $0x360] sm:$0xff]  ;;  %v7741_v3 = vpack.c.bf16 %v6365_v19, %v6363_v18  ;;  %v4518_v6 = vld [vmem:[%s12114_s17 + $0x1c8] sm:$0xff] }
 0xc18   : > { %v7739_v25 = vpack.c.bf16 %v6360_v12, %v6358_v33  ;;  %v4482_v33 = vld [vmem:[%s12114_s17 + $0xa8] sm:$0xff]  ;;  %v4484_v12 = vld [vmem:[%s12114_s17 + $0xb8] sm:$0xff] }
 0xc19   : > { %v7777_v19 = vpack.c.bf16 %v4484_v12, %v4482_v33  ;;  %v4519_v33 = vld [vmem:[%s12114_s17 + $0x1d0] sm:$0xff]  ;;  %v4522_v12 = vld [vmem:[%s12114_s17 + $0x1e8] sm:$0xff] }
 0xc1a   : > { %7700 = vmatpush1.bf16.msra.mxu1 %v7699_v36  ;;  %v6362_v36 = vld [vmem:[%s12114_s17 + $0x380] sm:$0xff] }
 0xc1b   : > { %7702 = vmatprep.subr.bf16.mxu1 %v7701_v31  ;;  %v6364_v31 = vld [vmem:[%s12114_s17 + $0x390] sm:$0xff] }
 0xc1c   : > { %v7743_v48 = vpack.c.bf16 %v6364_v31, %v6362_v36  ;;  %v4486_v36 = vld [vmem:[%s12114_s17 + $0xc8] sm:$0xff]  ;;  %v4488_v31 = vld [vmem:[%s12114_s17 + $0xd8] sm:$0xff] }
 0xc1d   : > { %v7781_v39 = vpack.c.bf16 %v4488_v31, %v4486_v36  ;;  %v4523_v36 = vld [vmem:[%s12114_s17 + $0x1f0] sm:$0xff]  ;;  %v6381_v31 = vld [vmem:[%s12114_s17 + $0x408] sm:$0xff] }
 0xc1e   : > { %7704 = vmatpush1.bf16.msra.mxu1 %v7703_v41  ;;  %v6366_v41 = vld [vmem:[%s12114_s17 + $0x3a0] sm:$0xff] }
 0xc1f   : > { %7706 = vmatprep.subr.bf16.mxu1 %v7705_v7  ;;  %v6368_v7 = vld [vmem:[%s12114_s17 + $0x3b0] sm:$0xff] }
 0xc20   : > { %v7747_v42 = vpack.c.bf16 %v6368_v7, %v6366_v41  ;;  %v4490_v41 = vld [vmem:[%s12114_s17 + $0xe8] sm:$0xff]  ;;  %v4492_v7 = vld [vmem:[%s12114_s17 + $0xf8] sm:$0xff] }
 0xc21   : > { %v7785_v44 = vpack.c.bf16 %v4492_v7, %v4490_v41  ;;  %v6382_v41 = vld [vmem:[%s12114_s17 + $0x410] sm:$0xff] }
 0xc22   : > { %7708 = vmatpush1.bf16.msra.mxu1 %v7707_v27  ;;  %v6370_v27 = vld [vmem:[%s12114_s17 + $0x3c0] sm:$0xff] }
 0xc23   : > { %7710 = vmatprep.subr.bf16.mxu1 %v7709_v59  ;;  %v6372_v59 = vld [vmem:[%s12114_s17 + $0x3d0] sm:$0xff] }
 0xc24   : > { %v7751_v5 = vpack.c.bf16 %v6372_v59, %v6370_v27  ;;  %v4494_v27 = vld [vmem:[%s12114_s17 + $0x108] sm:$0xff]  ;;  %v4496_v59 = vld [vmem:[%s12114_s17 + $0x118] sm:$0xff] }
 0xc25   : > { %v7789_v17 = vpack.c.bf16 %v4496_v59, %v4494_v27  ;;  %v6384_v59 = vld [vmem:[%s12114_s17 + $0x420] sm:$0xff] }
 0xc26   : > { %7712 = vmatpush1.bf16.msra.mxu1 %v7711_v4  ;;  %v6374_v4 = vld [vmem:[%s12114_s17 + $0x3e0] sm:$0xff] }
 0xc27   : > { %7714 = vmatprep.subr.bf16.mxu1 %v7713_v49  ;;  %v6376_v49 = vld [vmem:[%s12114_s17 + $0x3f0] sm:$0xff] }
 0xc28   : > { %v7755_v50 = vpack.c.bf16 %v6376_v49, %v6374_v4  ;;  %v4498_v4 = vld [vmem:[%s12114_s17 + $0x128] sm:$0xff]  ;;  %v4500_v49 = vld [vmem:[%s12114_s17 + $0x138] sm:$0xff] }
 0xc29   : > { %v7793_v45 = vpack.c.bf16 %v4500_v49, %v4498_v4  ;;  %v6390_v4 = vld [vmem:[%s12114_s17 + $0x450] sm:$0xff]  ;;  %v5283_v49 = vld [vmem:[%s12115_s18 + $0x80] sm:$0xff] }
 0xc2a   : > { %7716 = vmatpush1.bf16.msra.mxu1 %v7715_v10 }
 0xc2b   : > { %7718 = vmatprep.subr.bf16.mxu1 %v7717_v35 }
 0xc2e   : > { %7720 = vmatpush1.bf16.msra.mxu1 %v7719_v21 }
 0xc2f   : > { %7722 = vmatprep.subr.bf16.mxu1 %v7721_v58  ;;  %v7759_v58 = vpack.c.bf16 %v4463_v15, %v4461_v14  ;;  %v4504_v14 = vld [vmem:[%s12114_s17 + $0x158] sm:$0xff] }
 0xc32   : > { %7724 = vmatpush1.bf16.msra.mxu1 %v7723_v63  ;;  %v4467_v63 = vld [vmem:[%s12114_s17 + $0x30] sm:$0xff] }
 0xc33   : > { %7726 = vmatprep.subr.bf16.mxu1 %v7725_v13  ;;  %v7763_v2 = vpack.c.bf16 %v4467_v63, %v4465_v0  ;;  %v4505_v63 = vld [vmem:[%s12114_s17 + $0x160] sm:$0xff] }
 0xc36   : > { %7728 = vmatpush1.bf16.msra.mxu1 %v7727_v57  ;;  %v4469_v57 = vld [vmem:[%s12114_s17 + $0x40] sm:$0xff] }
 0xc37   : > { %7730 = vmatprep.subr.bf16.mxu1 %v7729_v8  ;;  %v4471_v8 = vld [vmem:[%s12114_s17 + $0x50] sm:$0xff] }
 0xc38   : > { %v7767_v60 = vpack.c.bf16 %v4471_v8, %v4469_v57  ;;  %v4509_v8 = vld [vmem:[%s12114_s17 + $0x180] sm:$0xff] }
 0xc3a   : > { %7732 = vmatpush1.bf16.msra.mxu1 %v7731_v29  ;;  %v4473_v29 = vld [vmem:[%s12114_s17 + $0x60] sm:$0xff] }
 0xc3b   : > { %7734 = vmatprep.subr.bf16.mxu1 %v7733_v55  ;;  %v4475_v55 = vld [vmem:[%s12114_s17 + $0x70] sm:$0xff] }
 0xc3c   : > { %v7771_v16 = vpack.c.bf16 %v4475_v55, %v4473_v29  ;;  %v4513_v55 = vld [vmem:[%s12114_s17 + $0x1a0] sm:$0xff] }
 0xc3e   : > { %7736 = vmatpush1.bf16.msra.mxu1 %v7735_v43  ;;  %v4477_v43 = vld [vmem:[%s12114_s17 + $0x80] sm:$0xff] }
 0xc3f   : > { %7738 = vmatprep.subr.bf16.mxu1 %v7737_v46  ;;  %v4479_v46 = vld [vmem:[%s12114_s17 + $0x90] sm:$0xff] }
 0xc40   : > { %v7775_v18 = vpack.c.bf16 %v4479_v46, %v4477_v43  ;;  %v4517_v46 = vld [vmem:[%s12114_s17 + $0x1c0] sm:$0xff] }
 0xc42   : > { %7740 = vmatpush1.bf16.msra.mxu1 %v7739_v25  ;;  %v4481_v25 = vld [vmem:[%s12114_s17 + $0xa0] sm:$0xff] }
 0xc43   : > { %7742 = vmatprep.subr.bf16.mxu1 %v7741_v3  ;;  %v4483_v3 = vld [vmem:[%s12114_s17 + $0xb0] sm:$0xff] }
 0xc44   : > { %v7779_v56 = vpack.c.bf16 %v4483_v3, %v4481_v25  ;;  %v4521_v3 = vld [vmem:[%s12114_s17 + $0x1e0] sm:$0xff] }
 0xc46   : > { %7744 = vmatpush1.bf16.msra.mxu1 %v7743_v48  ;;  %v4485_v48 = vld [vmem:[%s12114_s17 + $0xc0] sm:$0xff] }
 0xc47   : > { %7746 = vmatprep.subr.bf16.mxu1 %v7745_v9  ;;  %v4487_v9 = vld [vmem:[%s12114_s17 + $0xd0] sm:$0xff] }
 0xc48   : > { %v7783_v22 = vpack.c.bf16 %v4487_v9, %v4485_v48  ;;  %v6380_v9 = vld [vmem:[%s12114_s17 + $0x400] sm:$0xff] }
 0xc4a   : > { %7748 = vmatpush1.bf16.msra.mxu1 %v7747_v42  ;;  %v4489_v42 = vld [vmem:[%s12114_s17 + $0xe0] sm:$0xff] }
 0xc4b   : > { %7750 = vmatprep.subr.bf16.mxu1 %v7749_v47  ;;  %v4491_v47 = vld [vmem:[%s12114_s17 + $0xf0] sm:$0xff] }
 0xc4e   : > { %7752 = vmatpush1.bf16.msra.mxu1 %v7751_v5  ;;  %v7787_v5 = vpack.c.bf16 %v4491_v47, %v4489_v42  ;;  %v7823_v42 = vpack.c.bf16 %v6382_v41, %v6380_v9  ;;  %v6405_v9 = vld [vmem:[%s12114_s17 + $0x4c8] sm:$0xff]  ;;  %v6407_v41 = vld [vmem:[%s12114_s17 + $0x4d8] sm:$0xff] }
 0xc4f   : > { %7754 = vmatprep.subr.bf16.mxu1 %v7753_v54  ;;  %v4495_v54 = vld [vmem:[%s12114_s17 + $0x110] sm:$0xff] }
 0xc52   : > { %7756 = vmatpush1.bf16.msra.mxu1 %v7755_v50  ;;  %v7791_v50 = vpack.c.bf16 %v4495_v54, %v4493_v32  ;;  %v6391_v32 = vld [vmem:[%s12114_s17 + $0x458] sm:$0xff]  ;;  %v6388_v54 = vld [vmem:[%s12114_s17 + $0x440] sm:$0xff] }
 0xc53   : > { %7758 = vmatprep.subr.bf16.mxu1 %v7757_v51  ;;  %v4499_v51 = vld [vmem:[%s12114_s17 + $0x130] sm:$0xff] }
 0xc54   : > { %v7795_v15 = vpack.c.bf16 %v4499_v51, %v4497_v11  ;;  %v5268_v51 = vld [vmem:[%s12115_s18 + $0x8] sm:$0xff] }
 0xce4   : > { %v11281_v10 = vpop.f32.mrb[44].mxu1 }
 0xce5   : > { %v4458_v35 = vpop.f32.mrb[45].mxu1 }
 0xce6   : > { %v11295_v61 = vpop.f32.mrb[42].mxu0 }
 0xce7   : > { %v11303_v13 = vpop.f32.mrb[43].mxu0 }
 0xce8   : > { %v4596_v21 = vpop.f32.mrb[46].mxu1 }
 0xce9   : > { %v4598_v24 = vpop.f32.mrb[47].mxu1 }
 0xcea   : > { %4730 = vmatprep.mubr.f32.mxu1 %v4598_v24  ;;  %v4508_v24 = vld [vmem:[%s12114_s17 + $0x178] sm:$0xff]  ;;  %v11485_v7 = vpop.f32.mrb[44].mxu0 }
 0xceb   : > { %4731 = vmatmul.mubr.f32.vlgmr.msra.gmra.mrb[48].mxu1 %v4596_v21  ;;  %v4503_v21 = vld [vmem:[%s12114_s17 + $0x150] sm:$0xff]  ;;  %v11493_v47 = vpop.f32.mrb[45].mxu0 }
 0xcec   : > { %7760 = vmatpush1.bf16.msra.mxu1 %v7759_v58  ;;  %4801 = vmatprep.mubr.f32.mxu1 %v4458_v35  ;;  %v4502_v35 = vld [vmem:[%s12114_s17 + $0x148] sm:$0xff] }
 0xced   : > { %7762 = vmatprep.subr.bf16.mxu1 %v7761_v28  ;;  %v7797_v26 = vpack.c.bf16 %v4504_v14, %v4502_v35  ;;  %v4506_v58 = vld [vmem:[%s12114_s17 + $0x168] sm:$0xff]  ;;  %v7799_v28 = vpack.c.bf16 %v4503_v21, %v4501_v20  ;;  %v5285_v35 = vld [vmem:[%s12115_s18 + $0x90] sm:$0xff]  ;;  %v5286_v14 = vld [vmem:[%s12115_s18 + $0x98] sm:$0xff] }
 0xcee   : > { %v7801_v0 = vpack.c.bf16 %v4508_v24, %v4506_v58  ;;  %v11537_v20 = vpack.c.bf16 %v5286_v14, %v5285_v35  ;;  %v5270_v21 = vld [vmem:[%s12115_s18 + $0x18] sm:$0xff]  ;;  %v5287_v58 = vld [vmem:[%s12115_s18 + $0xa0] sm:$0xff]  ;;  %v6393_v24 = vld [vmem:[%s12114_s17 + $0x468] sm:$0xff] }
 0xcef   : > { %v6414_v35 = vld [vmem:[%s12114_s17 + $0x510] sm:$0xff]  ;;  %v6417_v14 = vld [vmem:[%s12114_s17 + $0x528] sm:$0xff] }
 0xcf0   : > { %7764 = vmatpush1.bf16.msra.mxu1 %v7763_v2  ;;  %v4512_v2 = vld [vmem:[%s12114_s17 + $0x198] sm:$0xff] }
 0xcf1   : > { %7766 = vmatprep.subr.bf16.mxu1 %v7765_v62  ;;  %v7803_v62 = vpack.c.bf16 %v4507_v30, %v4505_v63  ;;  %v7805_v57 = vpack.c.bf16 %v4512_v2, %v4510_v23  ;;  %v7831_v30 = vpack.c.bf16 %v6390_v4, %v6388_v54  ;;  %v6392_v23 = vld [vmem:[%s12114_s17 + $0x460] sm:$0xff]  ;;  %v6410_v4 = vld [vmem:[%s12114_s17 + $0x4f0] sm:$0xff] }
 0xcf2   : > { %v6408_v54 = vld [vmem:[%s12114_s17 + $0x4e0] sm:$0xff] }
 0xcf4   : > { %7768 = vmatpush1.bf16.msra.mxu1 %v7767_v60  ;;  %v4516_v60 = vld [vmem:[%s12114_s17 + $0x1b8] sm:$0xff] }
 0xcf5   : > { %7770 = vmatprep.subr.bf16.mxu1 %v7769_v38  ;;  %v7807_v38 = vpack.c.bf16 %v4511_v34, %v4509_v8  ;;  %v7809_v29 = vpack.c.bf16 %v4516_v60, %v4514_v53  ;;  %v6394_v34 = vld [vmem:[%s12114_s17 + $0x470] sm:$0xff]  ;;  %v5290_v60 = vld [vmem:[%s12115_s18 + $0xb8] sm:$0xff] }
 0xcf6   : > { %v5289_v53 = vld [vmem:[%s12115_s18 + $0xb0] sm:$0xff] }
 0xcf8   : > { %7772 = vmatpush1.bf16.msra.mxu1 %v7771_v16  ;;  %v4520_v16 = vld [vmem:[%s12114_s17 + $0x1d8] sm:$0xff] }
 0xcf9   : > { %7774 = vmatprep.subr.bf16.mxu1 %v7773_v40  ;;  %v7811_v40 = vpack.c.bf16 %v4515_v52, %v4513_v55  ;;  %v7813_v43 = vpack.c.bf16 %v4520_v16, %v4518_v6  ;;  %v7835_v52 = vpack.c.bf16 %v6394_v34, %v6392_v23  ;;  %v6396_v6 = vld [vmem:[%s12114_s17 + $0x480] sm:$0xff]  ;;  %v11595_v16 = vpack.c.bf16 %v5290_v60, %v5289_v53  ;;  %v6427_v34 = vld [vmem:[%s12114_s17 + $0x578] sm:$0xff] }
 0xcfc   : > { %7776 = vmatpush1.bf16.msra.mxu1 %v7775_v18  ;;  %v4524_v18 = vld [vmem:[%s12114_s17 + $0x1f8] sm:$0xff] }
 0xcfd   : > { %7778 = vmatprep.subr.bf16.mxu1 %v7777_v19  ;;  %v7815_v19 = vpack.c.bf16 %v4519_v33, %v4517_v46  ;;  %v7817_v25 = vpack.c.bf16 %v4524_v18, %v4522_v12  ;;  %v6398_v33 = vld [vmem:[%s12114_s17 + $0x490] sm:$0xff]  ;;  %v5291_v12 = vld [vmem:[%s12115_s18 + $0xc0] sm:$0xff]  ;;  %v5292_v18 = vld [vmem:[%s12115_s18 + $0xc8] sm:$0xff] }
 0xd00   : > { %7780 = vmatpush1.bf16.msra.mxu1 %v7779_v56  ;;  %v6383_v56 = vld [vmem:[%s12114_s17 + $0x418] sm:$0xff] }
 0xd01   : > { %7782 = vmatprep.subr.bf16.mxu1 %v7781_v39  ;;  %v7819_v39 = vpack.c.bf16 %v4523_v36, %v4521_v3  ;;  %v7821_v48 = vpack.c.bf16 %v6383_v56, %v6381_v31  ;;  %v7839_v36 = vpack.c.bf16 %v6398_v33, %v6396_v6  ;;  %v11622_v31 = vpack.c.bf16 %v5292_v18, %v5291_v12  ;;  %v6431_v6 = vld [vmem:[%s12114_s17 + $0x598] sm:$0xff]  ;;  %v6430_v33 = vld [vmem:[%s12114_s17 + $0x590] sm:$0xff]  ;;  %v6433_v12 = vld [vmem:[%s12114_s17 + $0x5a8] sm:$0xff] }
 0xd02   : > { %v6435_v18 = vld [vmem:[%s12114_s17 + $0x5b8] sm:$0xff] }
 0xd04   : > { %7784 = vmatpush1.bf16.msra.mxu1 %v7783_v22  ;;  %v6385_v22 = vld [vmem:[%s12114_s17 + $0x428] sm:$0xff] }
 0xd05   : > { %7786 = vmatprep.subr.bf16.mxu1 %v7785_v44  ;;  %v6387_v44 = vld [vmem:[%s12114_s17 + $0x438] sm:$0xff] }
 0xd06   : > { %v7825_v27 = vpack.c.bf16 %v6387_v44, %v6385_v22  ;;  %v7845_v44 = vpack.c.bf16 %v6407_v41, %v6405_v9 }
 0xd08   : > { %7788 = vmatpush1.bf16.msra.mxu1 %v7787_v5  ;;  %v6386_v5 = vld [vmem:[%s12114_s17 + $0x430] sm:$0xff] }
 0xd09   : > { %7790 = vmatprep.subr.bf16.mxu1 %v7789_v17  ;;  %v6389_v17 = vld [vmem:[%s12114_s17 + $0x448] sm:$0xff] }
 0xd0c   : > { %7792 = vmatpush1.bf16.msra.mxu1 %v7791_v50  ;;  %v5284_v50 = vld [vmem:[%s12115_s18 + $0x88] sm:$0xff] }
 0xd0d   : > { %7794 = vmatprep.subr.bf16.mxu1 %v7793_v45  ;;  %v7827_v45 = vpack.c.bf16 %v6386_v5, %v6384_v59  ;;  %v11524_v11 = vpack.c.bf16 %v5284_v50, %v5283_v49  ;;  %v6409_v59 = vld [vmem:[%s12114_s17 + $0x4e8] sm:$0xff]  ;;  %v6411_v5 = vld [vmem:[%s12114_s17 + $0x4f8] sm:$0xff] }
 0xd0e   : > { %v6413_v49 = vld [vmem:[%s12114_s17 + $0x508] sm:$0xff]  ;;  %v6415_v50 = vld [vmem:[%s12114_s17 + $0x518] sm:$0xff] }
 0xd0f   : > { %7950 = vmatprep.subr.bf16.mxu0 %v11524_v11 }
 0xd10   : > { %7796 = vmatpush1.bf16.msra.mxu1 %v7795_v15  ;;  %v7829_v15 = vpack.c.bf16 %v6391_v32, %v6389_v17  ;;  %v7849_v32 = vpack.c.bf16 %v6411_v5, %v6409_v59 }
 0xd11   : > { %7798 = vmatprep.subr.bf16.mxu1 %v7797_v26 }
 0xd14   : > { %7800 = vmatpush1.bf16.msra.mxu1 %v7799_v28  ;;  %v6395_v28 = vld [vmem:[%s12114_s17 + $0x478] sm:$0xff] }
 0xd15   : > { %7802 = vmatprep.subr.bf16.mxu1 %v7801_v0  ;;  %v5288_v0 = vld [vmem:[%s12115_s18 + $0xa8] sm:$0xff]  ;;  %v7833_v8 = vpack.c.bf16 %v6395_v28, %v6393_v24  ;;  %v6418_v24 = vld [vmem:[%s12114_s17 + $0x530] sm:$0xff] }
 0xd16   : > { %v11565_v2 = vpack.c.bf16 %v5288_v0, %v5287_v58  ;;  %v6416_v58 = vld [vmem:[%s12114_s17 + $0x520] sm:$0xff]  ;;  %v6421_v28 = vld [vmem:[%s12114_s17 + $0x548] sm:$0xff]  ;;  %v6423_v0 = vld [vmem:[%s12114_s17 + $0x558] sm:$0xff] }
 0xd17   : > { %v7861_v23 = vpack.c.bf16 %v6423_v0, %v6421_v28 }
 0xd18   : > { %7804 = vmatpush1.bf16.msra.mxu1 %v7803_v62  ;;  %v5271_v62 = vld [vmem:[%s12115_s18 + $0x20] sm:$0xff] }
 0xd19   : > { %7806 = vmatprep.subr.bf16.mxu1 %v7805_v57  ;;  %v5272_v57 = vld [vmem:[%s12115_s18 + $0x28] sm:$0xff] }
 0xd1a   : > { %v11589_v55 = vpack.c.bf16 %v5272_v57, %v5271_v62  ;;  %v6420_v62 = vld [vmem:[%s12114_s17 + $0x540] sm:$0xff]  ;;  %v6422_v57 = vld [vmem:[%s12114_s17 + $0x550] sm:$0xff] }
 0xd1b   : > { %v7863_v53 = vpack.c.bf16 %v6422_v57, %v6420_v62  ;;  %v6459_v62 = vld [vmem:[%s12114_s17 + $0x668] sm:$0xff] }
 0xd1c   : > { %7808 = vmatpush1.bf16.msra.mxu1 %v7807_v38  ;;  %v6397_v38 = vld [vmem:[%s12114_s17 + $0x488] sm:$0xff] }
 0xd1d   : > { %7810 = vmatprep.subr.bf16.mxu1 %v7809_v29  ;;  %v6399_v29 = vld [vmem:[%s12114_s17 + $0x498] sm:$0xff] }
 0xd1e   : > { %v7837_v46 = vpack.c.bf16 %v6399_v29, %v6397_v38  ;;  %v6424_v38 = vld [vmem:[%s12114_s17 + $0x560] sm:$0xff]  ;;  %v6426_v29 = vld [vmem:[%s12114_s17 + $0x570] sm:$0xff] }
 0xd20   : > { %7812 = vmatpush1.bf16.msra.mxu1 %v7811_v40  ;;  %v5273_v40 = vld [vmem:[%s12115_s18 + $0x30] sm:$0xff] }
 0xd21   : > { %7814 = vmatprep.subr.bf16.mxu1 %v7813_v43  ;;  %v5274_v43 = vld [vmem:[%s12115_s18 + $0x38] sm:$0xff] }
 0xd22   : > { %v11619_v3 = vpack.c.bf16 %v5274_v43, %v5273_v40  ;;  %v7867_v40 = vpack.c.bf16 %v6426_v29, %v6424_v38 }
 0xd24   : > { %7816 = vmatpush1.bf16.msra.mxu1 %v7815_v19  ;;  %v6401_v19 = vld [vmem:[%s12114_s17 + $0x4a8] sm:$0xff] }
 0xd25   : > { %7818 = vmatprep.subr.bf16.mxu1 %v7817_v25  ;;  %v6403_v25 = vld [vmem:[%s12114_s17 + $0x4b8] sm:$0xff] }
 0xd26   : > { %v7841_v56 = vpack.c.bf16 %v6403_v25, %v6401_v19  ;;  %v7873_v25 = vpack.c.bf16 %v6435_v18, %v6433_v12  ;;  %v6466_v12 = vld [vmem:[%s12114_s17 + $0x6a0] sm:$0xff]  ;;  %v6468_v18 = vld [vmem:[%s12114_s17 + $0x6b0] sm:$0xff] }
 0xd28   : > { %7820 = vmatpush1.bf16.msra.mxu1 %v7819_v39  ;;  %v6400_v39 = vld [vmem:[%s12114_s17 + $0x4a0] sm:$0xff] }
 0xd29   : > { %7822 = vmatprep.subr.bf16.mxu1 %v7821_v48  ;;  %v6402_v48 = vld [vmem:[%s12114_s17 + $0x4b0] sm:$0xff] }
 0xd2a   : > { %v7843_v22 = vpack.c.bf16 %v6402_v48, %v6400_v39  ;;  %v6437_v39 = vld [vmem:[%s12114_s17 + $0x5c8] sm:$0xff]  ;;  %v6439_v48 = vld [vmem:[%s12114_s17 + $0x5d8] sm:$0xff] }
 0xd2b   : > { %4802 = vmatmul.mubr.f32.vlgmr.msra.gmra.mrb[48].mxu1 %v11281_v10  ;;  %v5267_v10 = vld [vmem:[%s12115_s18] sm:$0xff]  ;;  %v7877_v41 = vpack.c.bf16 %v6439_v48, %v6437_v39  ;;  %v6472_v48 = vld [vmem:[%s12114_s17 + $0x6d0] sm:$0xff] }
 0xd2c   : > { %7824 = vmatpush1.bf16.msra.mxu1 %v7823_v42  ;;  %5013 = vmatprep.mubr.f32.mxu1 %v11303_v13  ;;  %v11535_v26 = vpack.c.bf16 %v5268_v51, %v5267_v10  ;;  %v5269_v13 = vld [vmem:[%s12115_s18 + $0x10] sm:$0xff]  ;;  %v6404_v42 = vld [vmem:[%s12114_s17 + $0x4c0] sm:$0xff]  ;;  %v7851_v10 = vpack.c.bf16 %v6410_v4, %v6408_v54  ;;  %v6447_v54 = vld [vmem:[%s12114_s17 + $0x608] sm:$0xff] }
 0xd2d   : > { %7826 = vmatprep.subr.bf16.mxu1 %v7825_v27  ;;  %v11559_v63 = vpack.c.bf16 %v5270_v21, %v5269_v13  ;;  %v6406_v27 = vld [vmem:[%s12114_s17 + $0x4d0] sm:$0xff]  ;;  %v6412_v51 = vld [vmem:[%s12114_s17 + $0x500] sm:$0xff]  ;;  %v6449_v4 = vld [vmem:[%s12114_s17 + $0x618] sm:$0xff] }
 0xd2e   : > { %7952 = vmatpush3.bf16.msra.mxu0 %v11535_v26  ;;  %v7847_v17 = vpack.c.bf16 %v6406_v27, %v6404_v42  ;;  %v7855_v13 = vpack.c.bf16 %v6414_v35, %v6412_v51  ;;  %v6441_v42 = vld [vmem:[%s12114_s17 + $0x5e8] sm:$0xff]  ;;  %v6443_v27 = vld [vmem:[%s12114_s17 + $0x5f8] sm:$0xff]  ;;  %v6470_v39 = vld [vmem:[%s12114_s17 + $0x6c0] sm:$0xff] }
 0xd2f   : > { %7954 = vmatprep.subr.bf16.mxu0 %v11537_v20  ;;  %v7881_v5 = vpack.c.bf16 %v6443_v27, %v6441_v42  ;;  %v6451_v51 = vld [vmem:[%s12114_s17 + $0x628] sm:$0xff]  ;;  %v6453_v35 = vld [vmem:[%s12114_s17 + $0x638] sm:$0xff]  ;;  %v6474_v42 = vld [vmem:[%s12114_s17 + $0x6e0] sm:$0xff] }
 0xd30   : > { %7828 = vmatpush1.bf16.msra.mxu1 %v7827_v45  ;;  %v7853_v45 = vpack.c.bf16 %v6415_v50, %v6413_v49  ;;  %v7885_v50 = vpack.c.bf16 %v6449_v4, %v6447_v54  ;;  %v6476_v27 = vld [vmem:[%s12114_s17 + $0x6f0] sm:$0xff]  ;;  %v6478_v54 = vld [vmem:[%s12114_s17 + $0x700] sm:$0xff] }
 0xd31   : > { %7830 = vmatprep.subr.bf16.mxu1 %v7829_v15  ;;  %v6419_v15 = vld [vmem:[%s12114_s17 + $0x538] sm:$0xff]  ;;  %v6480_v4 = vld [vmem:[%s12114_s17 + $0x710] sm:$0xff] }
 0xd32   : > { %7956 = vmatpush3.bf16.msra.mxu0 %v11559_v63  ;;  %v7857_v21 = vpack.c.bf16 %v6419_v15, %v6417_v14  ;;  %v7889_v15 = vpack.c.bf16 %v6453_v35, %v6451_v51  ;;  %v6482_v51 = vld [vmem:[%s12114_s17 + $0x720] sm:$0xff]  ;;  %v6484_v35 = vld [vmem:[%s12114_s17 + $0x730] sm:$0xff] }
 0xd33   : > { %7958 = vmatprep.subr.bf16.mxu0 %v11565_v2 }
 0xd34   : > { %7832 = vmatpush1.bf16.msra.mxu1 %v7831_v30  ;;  %v7859_v30 = vpack.c.bf16 %v6418_v24, %v6416_v58  ;;  %v6455_v58 = vld [vmem:[%s12114_s17 + $0x648] sm:$0xff]  ;;  %v6457_v24 = vld [vmem:[%s12114_s17 + $0x658] sm:$0xff] }
 0xd35   : > { %7834 = vmatprep.subr.bf16.mxu1 %v7833_v8  ;;  %v6425_v8 = vld [vmem:[%s12114_s17 + $0x568] sm:$0xff]  ;;  %v7893_v0 = vpack.c.bf16 %v6457_v24, %v6455_v58  ;;  %v6486_v58 = vld [vmem:[%s12114_s17 + $0x740] sm:$0xff]  ;;  %v6488_v24 = vld [vmem:[%s12114_s17 + $0x750] sm:$0xff] }
 0xd36   : > { %7960 = vmatpush3.bf16.msra.mxu0 %v11589_v55  ;;  %v7865_v60 = vpack.c.bf16 %v6427_v34, %v6425_v8  ;;  %v6458_v8 = vld [vmem:[%s12114_s17 + $0x660] sm:$0xff]  ;;  %v6460_v34 = vld [vmem:[%s12114_s17 + $0x670] sm:$0xff] }
 0xd37   : > { %7962 = vmatprep.subr.bf16.mxu0 %v11595_v16  ;;  %v7899_v38 = vpack.c.bf16 %v6460_v34, %v6458_v8 }
 0xd38   : > { %7836 = vmatpush1.bf16.msra.mxu1 %v7835_v52  ;;  %v6429_v52 = vld [vmem:[%s12114_s17 + $0x588] sm:$0xff] }
 0xd39   : > { %7838 = vmatprep.subr.bf16.mxu1 %v7837_v46  ;;  %v7869_v43 = vpack.c.bf16 %v6431_v6, %v6429_v52  ;;  %v6428_v46 = vld [vmem:[%s12114_s17 + $0x580] sm:$0xff]  ;;  %v6464_v6 = vld [vmem:[%s12114_s17 + $0x690] sm:$0xff] }
 0xd3a   : > { %7964 = vmatpush3.bf16.msra.mxu0 %v11619_v3  ;;  %v7871_v19 = vpack.c.bf16 %v6430_v33, %v6428_v46  ;;  %v6462_v52 = vld [vmem:[%s12114_s17 + $0x680] sm:$0xff] }
 0xd3b   : > { %7966 = vmatprep.subr.bf16.mxu0 %v11622_v31  ;;  %v7903_v46 = vpack.c.bf16 %v6464_v6, %v6462_v52 }
 0xd3c   : > { %7840 = vmatpush1.bf16.msra.mxu1 %v7839_v36  ;;  %v6432_v36 = vld [vmem:[%s12114_s17 + $0x5a0] sm:$0xff] }
 0xd3d   : > { %7842 = vmatprep.subr.bf16.mxu1 %v7841_v56  ;;  %v6434_v56 = vld [vmem:[%s12114_s17 + $0x5b0] sm:$0xff] }
 0xd3e   : > { %v7875_v9 = vpack.c.bf16 %v6434_v56, %v6432_v36  ;;  %v7907_v36 = vpack.c.bf16 %v6468_v18, %v6466_v12 }
 0xd40   : > { %7844 = vmatpush1.bf16.msra.mxu1 %v7843_v22  ;;  %v6436_v22 = vld [vmem:[%s12114_s17 + $0x5c0] sm:$0xff] }
 0xd41   : > { %7846 = vmatprep.subr.bf16.mxu1 %v7845_v44  ;;  %v6438_v44 = vld [vmem:[%s12114_s17 + $0x5d0] sm:$0xff] }
 0xd42   : > { %v7879_v59 = vpack.c.bf16 %v6438_v44, %v6436_v22  ;;  %v7911_v22 = vpack.c.bf16 %v6472_v48, %v6470_v39 }
 0xd44   : > { %7848 = vmatpush1.bf16.msra.mxu1 %v7847_v17  ;;  %v6440_v17 = vld [vmem:[%s12114_s17 + $0x5e0] sm:$0xff] }
 0xd45   : > { %7850 = vmatprep.subr.bf16.mxu1 %v7849_v32  ;;  %v6442_v32 = vld [vmem:[%s12114_s17 + $0x5f0] sm:$0xff] }
 0xd46   : > { %v7883_v49 = vpack.c.bf16 %v6442_v32, %v6440_v17  ;;  %v7915_v17 = vpack.c.bf16 %v6476_v27, %v6474_v42  ;;  %v5276_v42 = vld [vmem:[%s12115_s18 + $0x48] sm:$0xff] }
 0xd48   : > { %7852 = vmatpush1.bf16.msra.mxu1 %v7851_v10  ;;  %v6446_v10 = vld [vmem:[%s12114_s17 + $0x600] sm:$0xff] }
 0xd49   : > { %7854 = vmatprep.subr.bf16.mxu1 %v7853_v45  ;;  %v6448_v45 = vld [vmem:[%s12114_s17 + $0x610] sm:$0xff] }
 0xd4a   : > { %v7887_v14 = vpack.c.bf16 %v6448_v45, %v6446_v10  ;;  %v7919_v10 = vpack.c.bf16 %v6480_v4, %v6478_v54  ;;  %v5295_v4 = vld [vmem:[%s12115_s18 + $0xe0] sm:$0xff] }
 0xd4c   : > { %7856 = vmatpush1.bf16.msra.mxu1 %v7855_v13  ;;  %v6450_v13 = vld [vmem:[%s12114_s17 + $0x620] sm:$0xff] }
 0xd4d   : > { %7858 = vmatprep.subr.bf16.mxu1 %v7857_v21  ;;  %v6452_v21 = vld [vmem:[%s12114_s17 + $0x630] sm:$0xff] }
 0xd4e   : > { %v7891_v28 = vpack.c.bf16 %v6452_v21, %v6450_v13  ;;  %v7923_v13 = vpack.c.bf16 %v6484_v35, %v6482_v51  ;;  %v5297_v35 = vld [vmem:[%s12115_s18 + $0xf0] sm:$0xff] }
 0xd50   : > { %7860 = vmatpush1.bf16.msra.mxu1 %v7859_v30  ;;  %v6454_v30 = vld [vmem:[%s12114_s17 + $0x640] sm:$0xff] }
 0xd51   : > { %7862 = vmatprep.subr.bf16.mxu1 %v7861_v23  ;;  %v6456_v23 = vld [vmem:[%s12114_s17 + $0x650] sm:$0xff] }
 0xd54   : > { %7864 = vmatpush1.bf16.msra.mxu1 %v7863_v53  ;;  %v6463_v53 = vld [vmem:[%s12114_s17 + $0x688] sm:$0xff] }
 0xd55   : > { %7866 = vmatprep.subr.bf16.mxu1 %v7865_v60  ;;  %v6465_v60 = vld [vmem:[%s12114_s17 + $0x698] sm:$0xff] }
 0xd56   : > { %v7901_v29 = vpack.c.bf16 %v6465_v60, %v6463_v53  ;;  %v6494_v53 = vld [vmem:[%s12114_s17 + $0x780] sm:$0xff]  ;;  %v6496_v60 = vld [vmem:[%s12114_s17 + $0x790] sm:$0xff] }
 0xd57   : > { %v7935_v52 = vpack.c.bf16 %v6496_v60, %v6494_v53 }
 0xd58   : > { %7868 = vmatpush1.bf16.msra.mxu1 %v7867_v40  ;;  %v6467_v40 = vld [vmem:[%s12114_s17 + $0x6a8] sm:$0xff] }
 0xd59   : > { %7870 = vmatprep.subr.bf16.mxu1 %v7869_v43  ;;  %v6469_v43 = vld [vmem:[%s12114_s17 + $0x6b8] sm:$0xff] }
 0xd5a   : > { %v7905_v33 = vpack.c.bf16 %v6469_v43, %v6467_v40  ;;  %v6498_v40 = vld [vmem:[%s12114_s17 + $0x7a0] sm:$0xff]  ;;  %v6500_v43 = vld [vmem:[%s12114_s17 + $0x7b0] sm:$0xff] }
 0xd5b   : > { %v7939_v12 = vpack.c.bf16 %v6500_v43, %v6498_v40 }
 0xd5c   : > { %7872 = vmatpush1.bf16.msra.mxu1 %v7871_v19  ;;  %v6471_v19 = vld [vmem:[%s12114_s17 + $0x6c8] sm:$0xff] }
 0xd5d   : > { %7874 = vmatprep.subr.bf16.mxu1 %v7873_v25  ;;  %v6473_v25 = vld [vmem:[%s12114_s17 + $0x6d8] sm:$0xff] }
 0xd5e   : > { %v7909_v56 = vpack.c.bf16 %v6473_v25, %v6471_v19  ;;  %v6502_v19 = vld [vmem:[%s12114_s17 + $0x7c0] sm:$0xff]  ;;  %v6504_v25 = vld [vmem:[%s12114_s17 + $0x7d0] sm:$0xff] }
 0xd5f   : > { %v7943_v39 = vpack.c.bf16 %v6504_v25, %v6502_v19 }
 0xd60   : > { %7876 = vmatpush1.bf16.msra.mxu1 %v7875_v9  ;;  %v6475_v9 = vld [vmem:[%s12114_s17 + $0x6e8] sm:$0xff] }
 0xd61   : > { %7878 = vmatprep.subr.bf16.mxu1 %v7877_v41  ;;  %v6477_v41 = vld [vmem:[%s12114_s17 + $0x6f8] sm:$0xff] }
 0xd62   : > { %v7913_v44 = vpack.c.bf16 %v6477_v41, %v6475_v9  ;;  %v6506_v9 = vld [vmem:[%s12114_s17 + $0x7e0] sm:$0xff]  ;;  %v6508_v41 = vld [vmem:[%s12114_s17 + $0x7f0] sm:$0xff] }
 0xd64   : > { %7880 = vmatpush1.bf16.msra.mxu1 %v7879_v59  ;;  %v6479_v59 = vld [vmem:[%s12114_s17 + $0x708] sm:$0xff] }
 0xd65   : > { %7882 = vmatprep.subr.bf16.mxu1 %v7881_v5  ;;  %v6481_v5 = vld [vmem:[%s12114_s17 + $0x718] sm:$0xff] }
 0xd66   : > { %v7917_v32 = vpack.c.bf16 %v6481_v5, %v6479_v59  ;;  %v5293_v59 = vld [vmem:[%s12115_s18 + $0xd0] sm:$0xff] }
 0xd68   : > { %7884 = vmatpush1.bf16.msra.mxu1 %v7883_v49  ;;  %v6483_v49 = vld [vmem:[%s12114_s17 + $0x728] sm:$0xff] }
 0xd69   : > { %7886 = vmatprep.subr.bf16.mxu1 %v7885_v50  ;;  %v6485_v50 = vld [vmem:[%s12114_s17 + $0x738] sm:$0xff] }
 0xd6a   : > { %v7921_v45 = vpack.c.bf16 %v6485_v50, %v6483_v49  ;;  %v5296_v49 = vld [vmem:[%s12115_s18 + $0xe8] sm:$0xff] }
 0xd6b   : > { %5014 = vmatmul.mubr.f32.vlgmr.msra.gmra.mrb[48].mxu1 %v11295_v61  ;;  %v6461_v61 = vld [vmem:[%s12114_s17 + $0x678] sm:$0xff]  ;;  %v7973_v50 = vpack.c.bf16 %v5296_v49, %v5295_v4 }
 0xd6c   : > { %7888 = vmatpush1.bf16.msra.mxu1 %v7887_v14  ;;  %5227 = vmatprep.mubr.f32.mxu1 %v11493_v47  ;;  %v7895_v47 = vpack.c.bf16 %v6456_v23, %v6454_v30  ;;  %v7897_v57 = vpack.c.bf16 %v6461_v61, %v6459_v62  ;;  %v6487_v14 = vld [vmem:[%s12114_s17 + $0x748] sm:$0xff]  ;;  %v7927_v30 = vpack.c.bf16 %v6488_v24, %v6486_v58  ;;  %v6490_v62 = vld [vmem:[%s12114_s17 + $0x760] sm:$0xff]  ;;  %v6492_v61 = vld [vmem:[%s12114_s17 + $0x770] sm:$0xff] }
 0xd6d   : > { %7890 = vmatprep.subr.bf16.mxu1 %v7889_v15  ;;  %v6489_v15 = vld [vmem:[%s12114_s17 + $0x758] sm:$0xff]  ;;  %v7931_v8 = vpack.c.bf16 %v6492_v61, %v6490_v62 }
 0xd6e   : > { %v7925_v21 = vpack.c.bf16 %v6489_v15, %v6487_v14  ;;  %v5298_v14 = vld [vmem:[%s12115_s18 + $0xf8] sm:$0xff] }
 0xd6f   : > { %v7977_v15 = vpack.c.bf16 %v5298_v14, %v5297_v35  ;;  %v5465_v4 = vld [vmem:[%s12116_s19 + $0x78] sm:$0xff] }
 0xd70   : > { %7892 = vmatpush1.bf16.msra.mxu1 %v7891_v28  ;;  %v6491_v28 = vld [vmem:[%s12114_s17 + $0x768] sm:$0xff] }
 0xd71   : > { %7894 = vmatprep.subr.bf16.mxu1 %v7893_v0  ;;  %v6493_v0 = vld [vmem:[%s12114_s17 + $0x778] sm:$0xff] }
 0xd72   : > { %v7929_v23 = vpack.c.bf16 %v6493_v0, %v6491_v28 }
 0xd74   : > { %7896 = vmatpush1.bf16.msra.mxu1 %v7895_v47  ;;  %v6495_v47 = vld [vmem:[%s12114_s17 + $0x788] sm:$0xff] }
 0xd75   : > { %7898 = vmatprep.subr.bf16.mxu1 %v7897_v57  ;;  %v6497_v57 = vld [vmem:[%s12114_s17 + $0x798] sm:$0xff] }
 0xd76   : > { %v7933_v34 = vpack.c.bf16 %v6497_v57, %v6495_v47 }
 0xd78   : > { %7900 = vmatpush1.bf16.msra.mxu1 %v7899_v38  ;;  %v6499_v38 = vld [vmem:[%s12114_s17 + $0x7a8] sm:$0xff] }
 0xd79   : > { %7902 = vmatprep.subr.bf16.mxu1 %v7901_v29  ;;  %v6501_v29 = vld [vmem:[%s12114_s17 + $0x7b8] sm:$0xff] }
 0xd7a   : > { %v7937_v6 = vpack.c.bf16 %v6501_v29, %v6499_v38 }
 0xd7c   : > { %7904 = vmatpush1.bf16.msra.mxu1 %v7903_v46  ;;  %v6503_v46 = vld [vmem:[%s12114_s17 + $0x7c8] sm:$0xff] }
 0xd7d   : > { %7906 = vmatprep.subr.bf16.mxu1 %v7905_v33  ;;  %v6505_v33 = vld [vmem:[%s12114_s17 + $0x7d8] sm:$0xff] }
 0xd7e   : > { %v7941_v18 = vpack.c.bf16 %v6505_v33, %v6503_v46 }
 0xd80   : > { %7908 = vmatpush1.bf16.msra.mxu1 %v7907_v36  ;;  %v6507_v36 = vld [vmem:[%s12114_s17 + $0x7e8] sm:$0xff] }
 0xd81   : > { %7910 = vmatprep.subr.bf16.mxu1 %v7909_v56  ;;  %v6509_v56 = vld [vmem:[%s12114_s17 + $0x7f8] sm:$0xff] }
 0xd82   : > { %v7945_v48 = vpack.c.bf16 %v6509_v56, %v6507_v36  ;;  %v5450_v56 = vld [vmem:[%s12116_s19] sm:$0xff] }
 0xd84   : > { %7912 = vmatpush1.bf16.msra.mxu1 %v7911_v22  ;;  %v7947_v22 = vpack.c.bf16 %v6508_v41, %v6506_v9  ;;  %v5455_v9 = vld [vmem:[%s12116_s19 + $0x28] sm:$0xff]  ;;  %v5457_v41 = vld [vmem:[%s12116_s19 + $0x38] sm:$0xff] }
 0xd85   : > { %7914 = vmatprep.subr.bf16.mxu1 %v7913_v44  ;;  %v5275_v44 = vld [vmem:[%s12115_s18 + $0x40] sm:$0xff] }
 0xd86   : > { %v11953_v27 = vpack.c.bf16 %v5276_v42, %v5275_v44  ;;  %v5454_v44 = vld [vmem:[%s12116_s19 + $0x20] sm:$0xff]  ;;  %v5456_v42 = vld [vmem:[%s12116_s19 + $0x30] sm:$0xff] }
 0xd88   : > { %7916 = vmatpush1.bf16.msra.mxu1 %v7915_v17  ;;  %7968 = vmatpush3.bf16.msra.mxu0 %v11953_v27  ;;  %v5277_v17 = vld [vmem:[%s12115_s18 + $0x50] sm:$0xff] }
 0xd89   : > { %7918 = vmatprep.subr.bf16.mxu1 %v7917_v32  ;;  %v5278_v32 = vld [vmem:[%s12115_s18 + $0x58] sm:$0xff] }
 0xd8a   : > { %v7971_v54 = vpack.c.bf16 %v5278_v32, %v5277_v17  ;;  %v5460_v32 = vld [vmem:[%s12116_s19 + $0x50] sm:$0xff] }
 0xd8c   : > { %7920 = vmatpush1.bf16.msra.mxu1 %v7919_v10  ;;  %v5279_v10 = vld [vmem:[%s12115_s18 + $0x60] sm:$0xff] }
 0xd8d   : > { %7922 = vmatprep.subr.bf16.mxu1 %v7921_v45  ;;  %v5280_v45 = vld [vmem:[%s12115_s18 + $0x68] sm:$0xff] }
 0xd8e   : > { %v7975_v51 = vpack.c.bf16 %v5280_v45, %v5279_v10  ;;  %v5462_v10 = vld [vmem:[%s12116_s19 + $0x60] sm:$0xff]  ;;  %v5464_v45 = vld [vmem:[%s12116_s19 + $0x70] sm:$0xff] }
 0xd90   : > { %7924 = vmatpush1.bf16.msra.mxu1 %v7923_v13  ;;  %v5281_v13 = vld [vmem:[%s12115_s18 + $0x70] sm:$0xff] }
 0xd91   : > { %7926 = vmatprep.subr.bf16.mxu1 %v7925_v21  ;;  %v5282_v21 = vld [vmem:[%s12115_s18 + $0x78] sm:$0xff] }
 0xd92   : > { %v7979_v58 = vpack.c.bf16 %v5282_v21, %v5281_v13 }
 0xd94   : > { %7928 = vmatpush1.bf16.msra.mxu1 %v7927_v30 }
 0xd95   : > { %7930 = vmatprep.subr.bf16.mxu1 %v7929_v23 }
 0xd98   : > { %7932 = vmatpush1.bf16.msra.mxu1 %v7931_v8 }
 0xd99   : > { %7934 = vmatprep.subr.bf16.mxu1 %v7933_v34 }
 0xd9c   : > { %7936 = vmatpush1.bf16.msra.mxu1 %v7935_v52 }
 0xd9d   : > { %7938 = vmatprep.subr.bf16.mxu1 %v7937_v6 }
 0xda0   : > { %7940 = vmatpush1.bf16.msra.mxu1 %v7939_v12 }
 0xda1   : > { %7942 = vmatprep.subr.bf16.mxu1 %v7941_v18 }
 0xda4   : > { %7944 = vmatpush1.bf16.msra.mxu1 %v7943_v39  ;;  %v5452_v39 = vld [vmem:[%s12116_s19 + $0x10] sm:$0xff] }
 0xda5   : > { %7946 = vmatprep.subr.bf16.mxu1 %v7945_v48  ;;  %v8015_v48 = vpack.c.bf16 %v5452_v39, %v5450_v56 }
 0xda8   : > { %7948 = vmatpush1.bf16.msra.mxu1 %v7947_v22  ;;  %v8017_v22 = vpack.c.bf16 %v5457_v41, %v5455_v9  ;;  %v5656_v41 = vld [vmem:[#allocation2] sm:$0x1] }
 0xdab   : > { %5228 = vmatmul.mubr.f32.vlgmr.msra.gmra.mrb[48].mxu1 %v11485_v7  ;;  %v5294_v7 = vld [vmem:[%s12115_s18 + $0xd8] sm:$0xff] }
 0xdac   : > { %v11962_v5 = vpack.c.bf16 %v5294_v7, %v5293_v59  ;;  %v5459_v59 = vld [vmem:[%s12116_s19 + $0x48] sm:$0xff]  ;;  %v5461_v7 = vld [vmem:[%s12116_s19 + $0x58] sm:$0xff] }
 0xdad   : > { %v8021_v17 = vpack.c.bf16 %v5461_v7, %v5459_v59 }
 0xdae   : > { %7970 = vmatprep.subr.bf16.mxu0 %v11962_v5 }
 0xdaf   : > { %7972 = vmatpush3.bf16.msra.mxu0 %v7971_v54 }
 0xdb0   : > { %7974 = vmatprep.subr.bf16.mxu0 %v7973_v50 }
 0xdb3   : > { %7976 = vmatpush3.bf16.msra.mxu0 %v7975_v51 }
 0xdb4   : > { %7978 = vmatprep.subr.bf16.mxu0 %v7977_v15 }
 0xdb7   : > { %7980 = vmatpush3.bf16.msra.mxu0 %v7979_v58 }
 0xdb8   : > { %7982 = vmatprep.subr.bf16.mxu0 %v11524_v11 }
 0xe7e   : > { %v11996_v24 = vpop.f32.mrb[48].mxu1 }
 0xe7f   : > { %v5237_v28 = vsel %vm5236_vm4, %v11996_v24, 0.0  ;;  %v12000_v0 = vpop.f32.mrb[49].mxu1  ;;  %v5251_v19 = vmul.f32 %v11996_v24, %v11996_v24 }
 0xe80   : > { %v5238_v30 = vrot.slane %v5237_v28, 4  ;;  %v5244_v23 = vsel %vm5236_vm4, %v12000_v0, 0.0  ;;  %v5252_v62 = vmul.f32 %v12000_v0, %v12000_v0 }
 0xe81   : > { %v5245_v61 = vrot.slane %v5244_v23, 4  ;;  %v5253_v25 = vsel %vm5236_vm4, %v5251_v19, 0.0 }
 0xe82   : > { %v5239_v47 = vadd.f32 %v5238_v30, %v5237_v28  ;;  %v5260_v57 = vsel %vm5236_vm4, %v5252_v62, 0.0  ;;  %v5254_v36 = vrot.slane %v5253_v25, 4 }
 0xe83   : > { %v5246_v11 = vadd.f32 %v5245_v61, %v5244_v23  ;;  %v5261_v8 = vrot.slane %v5260_v57, 4 }
 0xe84   : > { %v5240_v34 = vrot.slane %v5239_v47, 2 }
 0xe85   : > { %v5247_v53 = vrot.slane %v5246_v11, 2  ;;  %v5262_v60 = vadd.f32 %v5261_v8, %v5260_v57 }
 0xe86   : > { %v5241_v38 = vadd.f32 %v5240_v34, %v5239_v47  ;;  %v5443_v47 = vld [vmem:[%s12117_s20] sm:$0x1] }
 0xe87   : > { %v5248_v29 = vadd.f32 %v5247_v53, %v5246_v11  ;;  %v5263_v52 = vrot.slane %v5262_v60, 2  ;;  %v5447_v34 = vld [vmem:[%s12118_s21] sm:$0x1] }
 0xe88   : > { %v5242_v6 = vrot.slane %v5241_v38, 1 }
 0xe89   : > { %v5249_v40 = vrot.slane %v5248_v29, 1  ;;  %v5264_v43 = vadd.f32 %v5263_v52, %v5262_v60 }
 0xe8a   : > { %v5243_v12 = vadd.f32 %v5242_v6, %v5241_v38 }
 0xe8b   : > { %v5250_v46 = vadd.f32 %v5249_v40, %v5248_v29  ;;  %v5265_v33 = vrot.slane %v5264_v43, 1 }
 0xe8d   : > { %5363 = vmatprep.mubr.f32.mxu0 %v5250_v46  ;;  %v5266_v18 = vadd.f32 %v5265_v33, %v5264_v43 }
 0xe8e   : > { %5364 = vmatmul.mubr.f32.vlgmr.msra.gmra.mrb[46].mxu0 %v5243_v12 }
 0xe8f   : > { %7984 = vmatpush3.bf16.msra.mxu0 %v11535_v26  ;;  %5434 = vmatprep.mubr.f32.mxu0 %v5266_v18  ;;  %v5255_v26 = vadd.f32 %v5254_v36, %v5253_v25  ;;  %v5638_v18 = vld [vmem:[%s12119_s22] sm:$0xff] }
 0xe90   : > { %7986 = vmatprep.subr.bf16.mxu0 %v11537_v20 }
 0xe91   : > { %v5256_v20 = vrot.slane %v5255_v26, 2 }
 0xe93   : > { %7988 = vmatpush3.bf16.msra.mxu0 %v11559_v63  ;;  %v5257_v63 = vadd.f32 %v5256_v20, %v5255_v26  ;;  %v5640_v26 = vcombine.high %v5638_v18, %v5638_v18 }
 0xe94   : > { %7990 = vmatprep.subr.bf16.mxu0 %v11565_v2 }
 0xe95   : > { %v5258_v2 = vrot.slane %v5257_v63, 1 }
 0xe97   : > { %7992 = vmatpush3.bf16.msra.mxu0 %v11589_v55  ;;  %v5259_v55 = vadd.f32 %v5258_v2, %v5257_v63 }
 0xe98   : > { %7994 = vmatprep.subr.bf16.mxu0 %v11595_v16  ;;  %v5451_v16 = vld [vmem:[%s12116_s19 + $0x8] sm:$0xff] }
 0xe9b   : > { %7996 = vmatpush3.bf16.msra.mxu0 %v11619_v3  ;;  %v5453_v3 = vld [vmem:[%s12116_s19 + $0x18] sm:$0xff] }
 0xe9c   : > { %7998 = vmatprep.subr.bf16.mxu0 %v11622_v31  ;;  %v8013_v31 = vpack.c.bf16 %v5453_v3, %v5451_v16 }
 0xe9f   : > { %8000 = vmatpush3.bf16.msra.mxu0 %v11953_v27  ;;  %v8019_v27 = vpack.c.bf16 %v5456_v42, %v5454_v44 }
 0xea0   : > { %8002 = vmatprep.subr.bf16.mxu0 %v11962_v5  ;;  %v5458_v5 = vld [vmem:[%s12116_s19 + $0x40] sm:$0xff] }
 0xea1   : > { %v8023_v49 = vpack.c.bf16 %v5460_v32, %v5458_v5 }
 0xea3   : > { %8004 = vmatpush3.bf16.msra.mxu0 %v7971_v54  ;;  %v5463_v54 = vld [vmem:[%s12116_s19 + $0x68] sm:$0xff] }
 0xea4   : > { %8006 = vmatprep.subr.bf16.mxu0 %v7973_v50  ;;  %v8025_v50 = vpack.c.bf16 %v5465_v4, %v5463_v54 }
 0xea7   : > { %8008 = vmatpush3.bf16.msra.mxu0 %v7975_v51  ;;  %v8027_v51 = vpack.c.bf16 %v5464_v45, %v5462_v10 }
 0xea8   : > { %8010 = vmatprep.subr.bf16.mxu0 %v7977_v15 }
 0xeab   : > { %8012 = vmatpush3.bf16.msra.mxu0 %v7979_v58 }
 0xeac   : > { %8014 = vmatprep.subr.bf16.mxu0 %v8013_v31 }
 0xeae   : > { %5435 = vmatmul.mubr.f32.vlgmr.msra.gmra.mrb[48].mxu0 %v5259_v55 }
 0xeaf   : > { %5533 = vmatprep.mubr.f32.mxu0 %v8117_v1  ;;  %8016 = vmatpush1.bf16.msra.mxu0 %v8015_v48 }
 0xeb0   : > { %8018 = vmatprep.subr.bf16.mxu0 %v8017_v22 }
 0xeb3   : > { %8020 = vmatpush1.bf16.msra.mxu0 %v8019_v27 }
 0xeb4   : > { %8022 = vmatprep.subr.bf16.mxu0 %v8021_v17 }
 0xeb7   : > { %8024 = vmatpush1.bf16.msra.mxu0 %v8023_v49 }
 0xeb8   : > { %8026 = vmatprep.subr.bf16.mxu0 %v8025_v50 }
 0xebb   : > { %8028 = vmatpush1.bf16.msra.mxu0 %v8027_v51 }
 0xebc   : > { %8030 = vmatprep.subr.bf16.mxu0 %v8013_v31 }
 0xf61   : > { %v6687_v35 = vpop.f32.mrb[46].mxu0 }
 0xf62   : > { %v6688_v14 = vpop.f32.mrb[47].mxu0 }
 0xf63   : > { %v6689_v15 = vadd.f32 %v6688_v14, %v6687_v35 }
 0xf65   : > { %v5369_v13 = vmul.f32 0.0625, %v6689_v15 }
 0xf67   : > { %v5441_v30 = vmul.f32 %v5369_v13, %v5369_v13 }
 0xf81   : > { %v6722_v21 = vpop.f32.mrb[48].mxu0 }
 0xf82   : > { %v6723_v58 = vpop.f32.mrb[49].mxu0 }
 0xf83   : > { %v6724_v28 = vadd.f32 %v6723_v58, %v6722_v21 }
 0xf85   : > { %v5440_v23 = vmul.f32 0.0625, %v6724_v28 }
 0xf87   : > { %v5442_v62 = vsub.f32 %v5440_v23, %v5441_v30 }
 0xf89   : > { %v5444_v61 = vadd.f32 1e-05, %v5442_v62 }
 0xf8b   : > { %8107 = vrsqrt.f32 %v5444_v61 }
 0xf95   : > { %v8108_v57 = vpop.eup %8107 }
 0xf96   : > { %v5446_v11 = vmul.f32 %v8108_v57, %v5443_v47 }
 0xf98   : > { %6510 = vmatmul.mubr.msk.f32.vlgmr.msra.gmra.mrb[50].mxu0 %vm756_vm0, %v5446_v11  ;;  %v5448_v8 = vmul.f32 %v5446_v11, %v5369_v13 }
 0xf99   : > { %8032 = vmatpush1.bf16.msra.mxu0 %v8015_v48  ;;  %5607 = vmatprep.mubr.f32.mxu0 %v8117_v1 }
 0xf9a   : > { %8034 = vmatprep.subr.bf16.mxu0 %v8017_v22  ;;  %v5449_v53 = vsub.f32 %v5447_v34, %v5448_v8 }
 0xf9d   : > { %8036 = vmatpush1.bf16.msra.mxu0 %v8019_v27 }
 0xf9e   : > { %8038 = vmatprep.subr.bf16.mxu0 %v8021_v17 }
 0xfa1   : > { %8040 = vmatpush1.bf16.msra.mxu0 %v8023_v49 }
 0xfa2   : > { %8042 = vmatprep.subr.bf16.mxu0 %v8025_v50 }
 0xfa5   : > { %8044 = vmatpush1.bf16.msra.mxu0 %v8027_v51 }
 0xfa8   : > { %6511 = vmatmul.mubr.msk.f32.vlgmr.msra.gmra.mrb[52].mxu0 %vm756_vm0, %v5449_v53 }
0x106b   : > { %v5535_v60 = vpop.f32.mrb[50].mxu0 }
0x106c   : > { %v5617_v38 = vrot.slane %v5535_v60, %v9024_v37  ;;  %v5537_v29 = vpop.f32.mrb[51].mxu0 }
0x106d   : > { %v5621_v52 = vrot.slane %v5537_v29, %v9024_v37 }
0x106e   : > { %v5622_v1 = vmul.f32 %v5617_v38, %v11996_v24 }
0x106f   : > { %v5623_v6 = vmul.f32 %v5621_v52, %v12000_v0 }
0x107b   : > { %v5609_v40 = vpop.f32.mrb[52].mxu0 }
0x107c   : > { %v5627_v43 = vrot.slane %v5609_v40, %v9024_v37  ;;  %v5611_v46 = vpop.f32.mrb[53].mxu0 }
0x107d   : > { %v5631_v33 = vrot.slane %v5611_v46, %v9024_v37 }
0x107e   : > { %v5632_v12 = vadd.f32 %v5627_v43, %v5622_v1 }
0x107f   : > { %v5633_v19 = vadd.f32 %v5631_v33, %v5623_v6 }
0x1080   : > { %v5634_v25 = vmul.f32 0.2, %v5632_v12 }
0x1081   : > { %v5635_v36 = vmul.f32 0.2, %v5633_v19 }
0x1082   : > { %v5636_v20 = vmax.f32 %v5632_v12, %v5634_v25 }
0x1083   : > { %v5637_v63 = vmax.f32 %v5633_v19, %v5635_v36 }
0x1084   : > { %v5642_v24 = vmul.f32 %v5638_v18, %v5636_v20 }
0x1085   : > { %v5643_v0 = vmul.f32 %v5640_v26, %v5637_v63 }
0x1086   : > { %v5644_v2 = vsel %vm5236_vm4, %v5642_v24, 0.0 }
0x1087   : > { %v5645_v55 = vsel %vm5236_vm4, %v5643_v0, 0.0 }
0x1088   : > { %v5646_v16 = vadd.f32 %v5645_v55, %v5644_v2 }
0x108a   : > { %5647 = vadd.xlane.f32.xlu0 %v5646_v16 }
0x1117   : > { %v5648_v37 = vpop.xlane.xlu0 %5647 }
0x1118   : > { %v5649_v3 = vsel %vm5236_vm4, %v5648_v37, 0.0 }
0x1119   : > { %v5650_v31 = vrot.slane %v5649_v3, 4 }
0x111b   : > { %v5651_v56 = vadd.f32 %v5650_v31, %v5649_v3 }
0x111d   : > { %v5652_v39 = vrot.slane %v5651_v56, 2 }
0x111f   : > { %v5653_v48 = vadd.f32 %v5652_v39, %v5651_v56 }
0x1121   : > { %v5654_v9 = vrot.slane %v5653_v48, 1 }
0x1123   : > { %v5655_v22 = vadd.f32 %v5654_v9, %v5653_v48 }
0x1125   : > { %v5657_v44 = vadd.f32 %v5656_v41, %v5655_v22 }
0x1127   : > { %5659 = vst.msk [vmem:[%s735_s6] sm:$0x1] %vm5658_vm5, %v5657_v44 }
0x1128 PF: > { %s36_s27 = sadd.s32 1, %s8115_s27  }
0x1129   : > { %p33_p4 = scmp.ge.s32.totalorder %s36_s27, 4  }
0x112b   :  { %35 = sbr.rel (!%p33_p4) target bundleno = 10 (0xa), region = 170 }

</bundles_post_ra>
